<compile_context>
chip_gen: v7x
topology: tpu7x:2x2x1
jax: 0.10.0
libtpu: 0.0.40
codegen_flags: <defaults>
</compile_context>

<pallas_src>
import jax
import jax.numpy as jnp
from jax.experimental import pallas as pl
from jax.experimental.pallas import tpu as pltpu

# ---------------- model sizes (single-layer, unidirectional LSTM) ----------
BATCH = 2
SEQ = 8
FEAT_DIM = 64
UNIT_DIM = 8
HIDDEN = UNIT_DIM * 64          # 512 (must equal fc1 in/out = 512)
AU_NUM = 12


def _tnet_lstm_kernel(x3_ref,    # (3B, D)   bf16  time steps 0..2, flattened
                      wih_ref,   # (D, 4H)   bf16  W_ih^T, gate cols [i,f,o,g]
                      b_ref,     # (1, 4H)   f32   b_ih + b_hh, same col order
                      whh_ref,   # (H, 4H)   bf16  W_hh^T, gate cols [i,f,o,g]
                      wh_ref,    # (H, A)    bf16  fused head weight
                      bh_ref,    # (1, A)    f32   fused head bias
                      out_ref):  # (B, A)    f32   class-1 probabilities
    B, _ = out_ref.shape
    H = whh_ref.shape[0]

    # Input projection for t = 0..2 in ONE matmul, bias folded in once
    # (never re-broadcast inside the recurrence).
    xp = jnp.dot(x3_ref[...], wih_ref[...],
                 preferred_element_type=jnp.float32) + b_ref[...]   # (3B, 4H)

    # Gate columns are pre-ordered [i, f, o, g]: one sigmoid over 3H lanes,
    # one tanh over the trailing H lanes.  Elementwise math stays f32
    # (portable to v5e; bf16 gate math only pays off once B is large).
    def lstm_cell(gates, c_prev):
        sig = jax.nn.sigmoid(gates[:, :3 * H])
        i_g = sig[:, 0 * H:1 * H]
        f_g = sig[:, 1 * H:2 * H]
        o_g = sig[:, 2 * H:3 * H]
        g_g = jnp.tanh(gates[:, 3 * H:])
        c_new = f_g * c_prev + i_g * g_g
        h_new = o_g * jnp.tanh(c_new)
        return h_new, c_new

    # t = 0 specialized: h = c = 0  =>  no recurrent matmul, no f*c term.
    g0 = xp[0:B]
    sig0 = jax.nn.sigmoid(g0[:, :3 * H])
    c = sig0[:, 0:H] * jnp.tanh(g0[:, 3 * H:])          # i * g
    h = sig0[:, 2 * H:3 * H] * jnp.tanh(c)              # o * tanh(c)

    # t = 1, 2 — statically unrolled so the LLO scheduler sees across steps.
    for t in (1, 2):
        gates = xp[t * B:(t + 1) * B] + jnp.dot(
            h.astype(jnp.bfloat16), whh_ref[...],
            preferred_element_type=jnp.float32)
        h, c = lstm_cell(gates, c)

    # Fused head: fc1 -> dropout(identity) -> fc2 -> log_softmax(dim=1)
    # -> [:,1,:].exp()  ==  sigmoid(h2 @ w_head + b_head).
    z = jnp.dot(h.astype(jnp.bfloat16), wh_ref[...],
                preferred_element_type=jnp.float32) + bh_ref[...]
    out_ref[...] = jax.nn.sigmoid(z)


@jax.jit
def tnet_lstm_forward(feats, kp):
    """feats: (B, T, D) float32 -> (B, AU_NUM) float32 (class-1 probabilities)."""
    B, T, D = feats.shape
    A = kp["w_head"].shape[1]
    assert T >= 3, "output depends on the hidden state at t == 2"

    # transpose(0, 1) in the PyTorch module: batch-major -> time-major.
    # Only t = 0..2 can influence the output (fc1 consumes feats_output[2]).
    x = jnp.transpose(feats, (1, 0, 2)).astype(jnp.float32)      # (T, B, D)
    x3 = x[:3].reshape(3 * B, D).astype(jnp.bfloat16)            # (3B, D)

    vmem = pl.BlockSpec(memory_space=pltpu.MemorySpace.VMEM)
    out = pl.pallas_call(
        _tnet_lstm_kernel,
        out_shape=jax.ShapeDtypeStruct((B, A), jnp.float32),
        in_specs=[vmem] * 6,     # prologue issues all weight DMAs concurrently
        out_specs=vmem,
    )(x3, kp["wih_t"], kp["b"], kp["whh_t"], kp["w_head"], kp["b_head"])
    return out


# ---------------- parameters ----------------
def init_pytorch_params(key):
    """PyTorch-layout parameters (gate row order i, f, g, o), f32."""
    ks = jax.random.split(key, 8)
    k_lstm = 1.0 / jnp.sqrt(float(HIDDEN))
    k_fc1 = 1.0 / jnp.sqrt(512.0)
    k_fc2 = 1.0 / jnp.sqrt(float(HIDDEN))

    def u(k, shape, bound):
        return jax.random.uniform(k, shape, jnp.float32, -bound, bound)

    return {
        "w_ih": u(ks[0], (4 * HIDDEN, FEAT_DIM), k_lstm),
        "w_hh": u(ks[1], (4 * HIDDEN, HIDDEN), k_lstm),
        "b_ih": u(ks[2], (4 * HIDDEN,), k_lstm),
        "b_hh": u(ks[3], (4 * HIDDEN,), k_lstm),
        "w_fc1": u(ks[4], (512, 512), k_fc1),
        "b_fc1": u(ks[5], (512,), k_fc1),
        "w_fc2": u(ks[6], (2 * AU_NUM, HIDDEN), k_fc2),
        "b_fc2": u(ks[7], (2 * AU_NUM,), k_fc2),
    }


def prepare_params(pt):
    """Wrapper-side transform:
      * transpose, reorder LSTM gate cols [i,f,g,o] -> [i,f,o,g], fold biases;
      * fuse fc1 and fc2 and the 2-class log_softmax into one (H, A) head:
          z1 - z0 = h2 @ (W1^T @ W2d^T) + (b1 @ W2d^T + b2d),
          W2d = W2[A:] - W2[:A],  b2d = b2[A:] - b2[:A],
        so the kernel epilogue is just sigmoid(h2 @ w_head + b_head);
      * cast weight matrices to bf16 (halves the HBM weight DMA).
    Optionally W_hh/W_ih could be further quantized to int8 (v5e/v6e) or fp8
    (v7x) for another ~2x byte cut if accuracy tolerance allows."""
    H, A = HIDDEN, AU_NUM
    perm = jnp.concatenate([jnp.arange(0, 2 * H),
                            jnp.arange(3 * H, 4 * H),
                            jnp.arange(2 * H, 3 * H)])
    w2d = pt["w_fc2"][A:] - pt["w_fc2"][:A]                      # (A, H)
    b2d = pt["b_fc2"][A:] - pt["b_fc2"][:A]                      # (A,)
    w_head = jnp.dot(pt["w_fc1"].T, w2d.T,
                     precision=jax.lax.Precision.HIGHEST)        # (512, A)
    b_head = jnp.dot(pt["b_fc1"], w2d.T,
                     precision=jax.lax.Precision.HIGHEST) + b2d  # (A,)
    return {
        "wih_t": pt["w_ih"].T[:, perm].astype(jnp.bfloat16),               # (D, 4H)
        "whh_t": pt["w_hh"].T[:, perm].astype(jnp.bfloat16),               # (H, 4H)
        "b": (pt["b_ih"] + pt["b_hh"])[perm][None, :].astype(jnp.float32),  # (1, 4H)
        "w_head": w_head.astype(jnp.bfloat16),                             # (H, A)
        "b_head": b_head[None, :].astype(jnp.float32),                     # (1, A)
    }


# ---------------- pure-JAX reference (full f32, original unfused form) -----
def reference_forward(feats, pt):
    """Mirrors the PyTorch forward (inference branch) in full f32, standard
    gate order i,f,g,o, with the original fc1 -> dropout -> fc2 ->
    log_softmax -> [:,1,:].exp() head (no fusion), so it independently checks
    both the semantics and the fused/bf16 kernel's accuracy."""
    H, A = HIDDEN, AU_NUM
    hi = jax.lax.Precision.HIGHEST

    x = jnp.transpose(feats, (1, 0, 2)).astype(jnp.float32)   # (T, B, D)
    T, B, _ = x.shape
    b = (pt["b_ih"] + pt["b_hh"])[None, :]

    h = jnp.zeros((B, H), jnp.float32)
    c = jnp.zeros((B, H), jnp.float32)
    h2 = None
    for t in range(T):
        gates = (jnp.dot(x[t], pt["w_ih"].T, precision=hi)
                 + jnp.dot(h, pt["w_hh"].T, precision=hi) + b)
        i_g = jax.nn.sigmoid(gates[:, 0 * H:1 * H])
        f_g = jax.nn.sigmoid(gates[:, 1 * H:2 * H])
        g_g = jnp.tanh(gates[:, 2 * H:3 * H])
        o_g = jax.nn.sigmoid(gates[:, 3 * H:4 * H])
        c = f_g * c + i_g * g_g
        h = o_g * jnp.tanh(c)
        if t == 2:
            h2 = h
    y1 = jnp.dot(h2, pt["w_fc1"].T, precision=hi) + pt["b_fc1"][None, :]
    logits = jnp.dot(y1, pt["w_fc2"].T, precision=hi) + pt["b_fc2"][None, :]
    au = logits.reshape(B, 2, A)
    au = jax.nn.log_softmax(au, axis=1)
    return jnp.exp(au[:, 1, :])


if __name__ == "__main__":
    key = jax.random.PRNGKey(0)
    k_x, k_p = jax.random.split(key)

    feats = jax.random.normal(k_x, (BATCH, SEQ, FEAT_DIM), jnp.float32)
    pt_params = init_pytorch_params(k_p)
    kparams = prepare_params(pt_params)

    out = jax.block_until_ready(tnet_lstm_forward(feats, kparams))
    ref = jax.block_until_ready(reference_forward(feats, pt_params))

    assert out.shape == (BATCH, AU_NUM), out.shape
    max_diff = float(jnp.max(jnp.abs(out - ref)))
    # Kernel uses bf16 weights + offline-fused head; reference is full f32 in
    # the original (unfused) form, so the diff is pure bf16 rounding (~1e-4).
    assert max_diff < 5e-3, f"max abs diff = {max_diff}"

    print("KERNEL_OK")
</pallas_src>

<mosaic_0001>
module attributes {stable_mosaic.version = 11 : i64} {
  func.func @_tnet_lstm_kernel(%arg0: memref<6x64xbf16, #tpu.memory_space<vmem>>, %arg1: memref<64x2048xbf16, #tpu.memory_space<vmem>>, %arg2: memref<1x2048xf32, #tpu.memory_space<vmem>>, %arg3: memref<512x2048xbf16, #tpu.memory_space<vmem>>, %arg4: memref<512x12xbf16, #tpu.memory_space<vmem>>, %arg5: memref<1x12xf32, #tpu.memory_space<vmem>>, %arg6: memref<2x12xf32, #tpu.memory_space<vmem>>) attributes {dimension_semantics = [], scalar_prefetch = 0 : i64, scratch_operands = 0 : i64, tpu.core_type = #tpu.core_type<tc>} {
    %c0 = arith.constant 0 : index
    %c0_0 = arith.constant 0 : index
    %0 = vector.load %arg0[%c0, %c0_0] : memref<6x64xbf16, #tpu.memory_space<vmem>>, vector<6x64xbf16>
    %c0_1 = arith.constant 0 : index
    %c0_2 = arith.constant 0 : index
    %1 = vector.load %arg1[%c0_1, %c0_2] : memref<64x2048xbf16, #tpu.memory_space<vmem>>, vector<64x2048xbf16>
    %cst = arith.constant dense<0.000000e+00> : vector<6x2048xf32>
    %2 = tpu.matmul %0, %1, %cst {dimension_numbers = #tpu.dot_dimension_numbers<[1], [0], [0], [1], [0, 0, 1, 1], [], []>} : vector<6x64xbf16>, vector<64x2048xbf16>, vector<6x2048xf32> -> vector<6x2048xf32>
    %c0_3 = arith.constant 0 : index
    %c0_4 = arith.constant 0 : index
    %3 = vector.load %arg2[%c0_3, %c0_4] : memref<1x2048xf32, #tpu.memory_space<vmem>>, vector<1x2048xf32>
    %4 = vector.broadcast %3 : vector<1x2048xf32> to vector<6x2048xf32>
    %5 = arith.addf %2, %4 : vector<6x2048xf32>
    %6 = vector.extract_strided_slice %5 {offsets = [0, 0], sizes = [2, 2048], strides = [1, 1]} : vector<6x2048xf32> to vector<2x2048xf32>
    %7 = vector.extract_strided_slice %6 {offsets = [0, 0], sizes = [2, 1536], strides = [1, 1]} : vector<2x2048xf32> to vector<2x1536xf32>
    %8 = arith.negf %7 : vector<2x1536xf32>
    %9 = math.exp %8 : vector<2x1536xf32>
    %cst_5 = arith.constant 1.000000e+00 : f32
    %10 = vector.broadcast %cst_5 : f32 to vector<2x1536xf32>
    %11 = arith.addf %10, %9 : vector<2x1536xf32>
    %12 = arith.divf %10, %11 : vector<2x1536xf32>
    %13 = vector.extract_strided_slice %12 {offsets = [0, 0], sizes = [2, 512], strides = [1, 1]} : vector<2x1536xf32> to vector<2x512xf32>
    %14 = vector.extract_strided_slice %6 {offsets = [0, 1536], sizes = [2, 512], strides = [1, 1]} : vector<2x2048xf32> to vector<2x512xf32>
    %15 = math.tanh %14 : vector<2x512xf32>
    %16 = arith.mulf %13, %15 : vector<2x512xf32>
    %17 = vector.extract_strided_slice %12 {offsets = [0, 1024], sizes = [2, 512], strides = [1, 1]} : vector<2x1536xf32> to vector<2x512xf32>
    %18 = math.tanh %16 : vector<2x512xf32>
    %19 = arith.mulf %17, %18 : vector<2x512xf32>
    %20 = vector.extract_strided_slice %5 {offsets = [2, 0], sizes = [2, 2048], strides = [1, 1]} : vector<6x2048xf32> to vector<2x2048xf32>
    %21 = arith.truncf %19 : vector<2x512xf32> to vector<2x512xbf16>
    %c0_6 = arith.constant 0 : index
    %c0_7 = arith.constant 0 : index
    %22 = vector.load %arg3[%c0_6, %c0_7] : memref<512x2048xbf16, #tpu.memory_space<vmem>>, vector<512x2048xbf16>
    %cst_8 = arith.constant dense<0.000000e+00> : vector<2x2048xf32>
    %23 = tpu.matmul %21, %22, %cst_8 {dimension_numbers = #tpu.dot_dimension_numbers<[1], [0], [0], [1], [0, 0, 1, 1], [], []>} : vector<2x512xbf16>, vector<512x2048xbf16>, vector<2x2048xf32> -> vector<2x2048xf32>
    %24 = arith.addf %20, %23 : vector<2x2048xf32>
    %25 = vector.extract_strided_slice %24 {offsets = [0, 0], sizes = [2, 1536], strides = [1, 1]} : vector<2x2048xf32> to vector<2x1536xf32>
    %26 = arith.negf %25 : vector<2x1536xf32>
    %27 = math.exp %26 : vector<2x1536xf32>
    %cst_9 = arith.constant 1.000000e+00 : f32
    %28 = vector.broadcast %cst_9 : f32 to vector<2x1536xf32>
    %29 = arith.addf %28, %27 : vector<2x1536xf32>
    %30 = arith.divf %28, %29 : vector<2x1536xf32>
    %31 = vector.extract_strided_slice %30 {offsets = [0, 0], sizes = [2, 512], strides = [1, 1]} : vector<2x1536xf32> to vector<2x512xf32>
    %32 = vector.extract_strided_slice %30 {offsets = [0, 512], sizes = [2, 512], strides = [1, 1]} : vector<2x1536xf32> to vector<2x512xf32>
    %33 = vector.extract_strided_slice %30 {offsets = [0, 1024], sizes = [2, 512], strides = [1, 1]} : vector<2x1536xf32> to vector<2x512xf32>
    %34 = vector.extract_strided_slice %24 {offsets = [0, 1536], sizes = [2, 512], strides = [1, 1]} : vector<2x2048xf32> to vector<2x512xf32>
    %35 = math.tanh %34 : vector<2x512xf32>
    %36 = arith.mulf %32, %16 : vector<2x512xf32>
    %37 = arith.mulf %31, %35 : vector<2x512xf32>
    %38 = arith.addf %36, %37 : vector<2x512xf32>
    %39 = math.tanh %38 : vector<2x512xf32>
    %40 = arith.mulf %33, %39 : vector<2x512xf32>
    %41 = vector.extract_strided_slice %5 {offsets = [4, 0], sizes = [2, 2048], strides = [1, 1]} : vector<6x2048xf32> to vector<2x2048xf32>
    %42 = arith.truncf %40 : vector<2x512xf32> to vector<2x512xbf16>
    %c0_10 = arith.constant 0 : index
    %c0_11 = arith.constant 0 : index
    %43 = vector.load %arg3[%c0_10, %c0_11] : memref<512x2048xbf16, #tpu.memory_space<vmem>>, vector<512x2048xbf16>
    %cst_12 = arith.constant dense<0.000000e+00> : vector<2x2048xf32>
    %44 = tpu.matmul %42, %43, %cst_12 {dimension_numbers = #tpu.dot_dimension_numbers<[1], [0], [0], [1], [0, 0, 1, 1], [], []>} : vector<2x512xbf16>, vector<512x2048xbf16>, vector<2x2048xf32> -> vector<2x2048xf32>
    %45 = arith.addf %41, %44 : vector<2x2048xf32>
    %46 = vector.extract_strided_slice %45 {offsets = [0, 0], sizes = [2, 1536], strides = [1, 1]} : vector<2x2048xf32> to vector<2x1536xf32>
    %47 = arith.negf %46 : vector<2x1536xf32>
    %48 = math.exp %47 : vector<2x1536xf32>
    %cst_13 = arith.constant 1.000000e+00 : f32
    %49 = vector.broadcast %cst_13 : f32 to vector<2x1536xf32>
    %50 = arith.addf %49, %48 : vector<2x1536xf32>
    %51 = arith.divf %49, %50 : vector<2x1536xf32>
    %52 = vector.extract_strided_slice %51 {offsets = [0, 0], sizes = [2, 512], strides = [1, 1]} : vector<2x1536xf32> to vector<2x512xf32>
    %53 = vector.extract_strided_slice %51 {offsets = [0, 512], sizes = [2, 512], strides = [1, 1]} : vector<2x1536xf32> to vector<2x512xf32>
    %54 = vector.extract_strided_slice %51 {offsets = [0, 1024], sizes = [2, 512], strides = [1, 1]} : vector<2x1536xf32> to vector<2x512xf32>
    %55 = vector.extract_strided_slice %45 {offsets = [0, 1536], sizes = [2, 512], strides = [1, 1]} : vector<2x2048xf32> to vector<2x512xf32>
    %56 = math.tanh %55 : vector<2x512xf32>
    %57 = arith.mulf %53, %38 : vector<2x512xf32>
    %58 = arith.mulf %52, %56 : vector<2x512xf32>
    %59 = arith.addf %57, %58 : vector<2x512xf32>
    %60 = math.tanh %59 : vector<2x512xf32>
    %61 = arith.mulf %54, %60 : vector<2x512xf32>
    %62 = arith.truncf %61 : vector<2x512xf32> to vector<2x512xbf16>
    %c0_14 = arith.constant 0 : index
    %c0_15 = arith.constant 0 : index
    %63 = vector.load %arg4[%c0_14, %c0_15] : memref<512x12xbf16, #tpu.memory_space<vmem>>, vector<512x12xbf16>
    %cst_16 = arith.constant dense<0.000000e+00> : vector<2x12xf32>
    %64 = tpu.matmul %62, %63, %cst_16 {dimension_numbers = #tpu.dot_dimension_numbers<[1], [0], [0], [1], [0, 0, 1, 1], [], []>} : vector<2x512xbf16>, vector<512x12xbf16>, vector<2x12xf32> -> vector<2x12xf32>
    %c0_17 = arith.constant 0 : index
    %c0_18 = arith.constant 0 : index
    %65 = vector.load %arg5[%c0_17, %c0_18] : memref<1x12xf32, #tpu.memory_space<vmem>>, vector<1x12xf32>
    %66 = vector.broadcast %65 : vector<1x12xf32> to vector<2x12xf32>
    %67 = arith.addf %64, %66 : vector<2x12xf32>
    %68 = arith.negf %67 : vector<2x12xf32>
    %69 = math.exp %68 : vector<2x12xf32>
    %cst_19 = arith.constant 1.000000e+00 : f32
    %70 = vector.broadcast %cst_19 : f32 to vector<2x12xf32>
    %71 = arith.addf %70, %69 : vector<2x12xf32>
    %72 = arith.divf %70, %71 : vector<2x12xf32>
    %c0_20 = arith.constant 0 : index
    %c0_21 = arith.constant 0 : index
    %73 = vector.load %arg6[%c0_20, %c0_21] : memref<2x12xf32, #tpu.memory_space<vmem>>, vector<2x12xf32>
    tpu.vector_store %arg6[%c0_20, %c0_21], %72 {strides = array<i32>} : memref<2x12xf32, #tpu.memory_space<vmem>>, vector<2x12xf32>,
    return
  }
}

</mosaic_0001>

<bundles_post_ra>
// kernel: tnet_lstm_forward.1
= control target key start
LH: loop header
LB: loop body
LE: loop exit
PB: predicated region body
PF: predicated region fallthrough
CT: control target
= control target key end

     0   :  { %11 = vsyncpa [#allocation3], 0  ;;  %s9739_s0 = inlined_call_operand.vmem [shape: bf16[6,64], index: 0, kind: input, shape index: {}]   ;;  %s9740_s1 = inlined_call_operand.hbm [shape: bf16[64,2048], index: 1, kind: input, shape index: {}]   ;;  %s9741_s2 = inlined_call_operand.hbm [shape: f32[1,2048], index: 2, kind: input, shape index: {}]   ;;  %s9742_s3 = inlined_call_operand.hbm [shape: bf16[512,2048], index: 3, kind: input, shape index: {}]   ;;  %s9743_s4 = inlined_call_operand.vmem [shape: bf16[512,12], index: 4, kind: input, shape index: {}]   ;;  %s9744_s5 = inlined_call_operand.hbm [shape: f32[1,12], index: 5, kind: input, shape index: {}]   ;;  %s9745_s6 = inlined_call_operand.hbm [shape: f32[2,12], index: 6, kind: output, shape index: {}]  }
   0x1   :  { %12 = vsyncpa [#allocation6], 0 }
   0x2   :  { %13 = vsyncpa [#allocation9], 0 }
   0x3   :  { %14 = vsyncpa [#allocation4], 0  ;;  %s7169_s21 = smov [#allocation5]   ;;  %s7170_s23 = smov [#allocation2]  }
   0x4   :  { %s35_s22 = sshll.u32 %s7169_s21, 4  ;;  %s22_s24 = sshll.u32 %s7170_s23, 4  ;;  %s36_s22 = int_to_ptr.vmem [resolvable:$true] %s35_s22  ;;  %s7212_s24 = int_to_ptr.vmem [resolvable:$true] %s22_s24 }
   0x5   :  { %s7051_s27 = scalar_lea.hbm %s9741_s2, 256 }
   0x6   :  { %p7052_p0 = scmp.ne.s32.totalorder %s9741_s2, %s7051_s27  ;;  %p7055_p1 = scmp.lt.u32.totalorder %s7051_s27, %s9741_s2 }
   0x8   :  { %p7057_p2 = pnand %p7055_p1, %p7052_p0 }
   0xa   :  { %7060 = shalt.err (!%p7057_p2)
}
   0xb   :  { %s7061_s8 = scalar_lea.vmem %s36_s22, 256  ;;  %p7066_p4 = scmp.lt.s32.totalorder %s36_s22, %s36_s22 }
   0xc   :  { %p7062_p3 = scmp.ne.s32.totalorder %s36_s22, %s7061_s8  ;;  %p7067_p5 = scmp.lt.s32.totalorder %s7061_s8, %s7061_s8 }
   0xe   :  { %p7068_p6 = por %p7067_p5, %p7066_p4 }
  0x10   :  { %p7069_p7 = pnand %p7068_p6, %p7062_p3 }
  0x12   :  { %7072 = shalt.err (!%p7069_p7)
}
  0x13   :  { %38 = dma.hbm_to_vmem [thread:$0]  %s9741_s2, 256, %s36_s22, [#allocation6]  }
  0x14   :  { %s7073_s13 = scalar_lea.hbm %s9740_s1, 8192 }
  0x15   :  { %p7074_p8 = scmp.ne.s32.totalorder %s9740_s1, %s7073_s13  ;;  %p7077_p9 = scmp.lt.u32.totalorder %s7073_s13, %s9740_s1 }
  0x17   :  { %p7079_p10 = pnand %p7077_p9, %p7074_p8 }
  0x19   :  { %7082 = shalt.err (!%p7079_p10)
}
  0x1a   :  { %s7083_s18 = scalar_lea.vmem %s7212_s24, 8192  ;;  %p7088_p12 = scmp.lt.s32.totalorder %s7212_s24, %s7212_s24 }
  0x1b   :  { %p7084_p11 = scmp.ne.s32.totalorder %s7212_s24, %s7083_s18  ;;  %p7089_p13 = scmp.lt.s32.totalorder %s7083_s18, %s7083_s18 }
  0x1d   :  { %p7090_p0 = por %p7089_p13, %p7088_p12 }
  0x1f   :  { %p7091_p1 = pnand %p7090_p0, %p7084_p11 }
  0x21   :  { %7094 = shalt.err (!%p7091_p1)
}
  0x22   :  { %s7171_s2 = smov 1024   ;;  %s7172_s19 = smov 64  }
  0x23   :  { %28 = dma.hbm_to_vmem [thread:$0]  %s9740_s1, 8192, %s7212_s24, [#allocation3], %s7171_s2, %s7171_s2, %s7172_s19  }
  0x24   :  { %s7173_s22 = smov [#allocation7]   ;;  %s7174_s25 = smov [#allocation8]  }
  0x25   :  { %s44_s23 = sshll.u32 %s7173_s22, 4  ;;  %s59_s26 = sshll.u32 %s7174_s25, 4  ;;  %s45_s23 = int_to_ptr.vmem [resolvable:$true] %s44_s23  ;;  %s60_s26 = int_to_ptr.vmem [resolvable:$true] %s59_s26 }
  0x26   :  { %s7095_s29 = scalar_lea.hbm %s9742_s3, 65536 }
  0x27   :  { %p7096_p2 = scmp.ne.s32.totalorder %s9742_s3, %s7095_s29  ;;  %p7099_p3 = scmp.lt.u32.totalorder %s7095_s29, %s9742_s3 }
  0x29   :  { %p7101_p4 = pnand %p7099_p3, %p7096_p2 }
  0x2b   :  { %7104 = shalt.err (!%p7101_p4)
}
  0x2c   :  { %s7105_s1 = scalar_lea.vmem %s45_s23, 65536  ;;  %p7110_p6 = scmp.lt.s32.totalorder %s45_s23, %s45_s23 }
  0x2d   :  { %p7106_p5 = scmp.ne.s32.totalorder %s45_s23, %s7105_s1  ;;  %p7111_p7 = scmp.lt.s32.totalorder %s7105_s1, %s7105_s1 }
  0x2f   :  { %p7112_p8 = por %p7111_p7, %p7110_p6 }
  0x31   :  { %p7113_p9 = pnand %p7112_p8, %p7106_p5 }
  0x33   :  { %7116 = shalt.err (!%p7113_p9)
}
  0x34   :  { %50 = dma.hbm_to_vmem [thread:$0]  %s9742_s3, 65536, %s45_s23, [#allocation6], %s7171_s2, %s7171_s2, %s7172_s19  }
  0x35   :  { %s7117_s13 = scalar_lea.hbm %s9744_s5, 16 }
  0x36   :  { %p7118_p10 = scmp.ne.s32.totalorder %s9744_s5, %s7117_s13  ;;  %p7121_p11 = scmp.lt.u32.totalorder %s7117_s13, %s9744_s5 }
  0x38   :  { %p7123_p12 = pnand %p7121_p11, %p7118_p10 }
  0x3a   :  { %7126 = shalt.err (!%p7123_p12)
}
  0x3b   :  { %s7127_s18 = scalar_lea.vmem %s60_s26, 16  ;;  %s7131_s20 = scalar_lea.vmem %s60_s26, 32 }
  0x3c   :  { %p7128_p13 = scmp.ne.s32.totalorder %s60_s26, %s7127_s18  ;;  %p7132_p0 = scmp.lt.s32.totalorder %s60_s26, %s60_s26 }
  0x3d   :  { %p7133_p1 = scmp.lt.s32.totalorder %s7131_s20, %s7127_s18 }
  0x3f   :  { %p7134_p2 = por %p7133_p1, %p7132_p0 }
  0x41   :  { %p7135_p3 = pnand %p7134_p2, %p7128_p13 }
  0x43   :  { %7138 = shalt.err (!%p7135_p3)
}
  0x44   :  { %62 = dma.hbm_to_vmem [thread:$0]  %s9744_s5, 16, %s60_s26, [#allocation9]  }
  0x45   :  { %7161 = dma.done.wait [#allocation3], 8192  }
  0x46   :  { %7162 = vsyncadd [#allocation3], 4294959104 }
  0x47   :  { %7163 = dma.done.wait [#allocation6], 65792  }
  0x48   :  { %7164 = vsyncadd [#allocation6], 4294901504 }
  0x49   :  { %7165 = dma.done.wait [#allocation9], 16  }
  0x4a   :  { %7166 = vsyncadd [#allocation9], 4294967280  ;;  %v7175_v0 = vmov 0   ;;  %v77_v1 = vld [vmem:[#allocation2] sm:$0xff]  ;;  %v78_v12 = vld [vmem:[#allocation2 + $0x8] sm:$0xff]  ;;  %vm545_vm0 = vcmask 523264  }
  0x4b   :  { %581 = vmatprep.mubr.bf16.mxu0 %v7175_v0  ;;  %622 = vmatprep.mubr.bf16.mxu1 %v7175_v0  ;;  %v85_v2 = vld [vmem:[#allocation2 + $0x40] sm:$0xff]  ;;  %v86_v15 = vld [vmem:[#allocation2 + $0x48] sm:$0xff]  ;;  %v79_v25 = vld [vmem:[#allocation2 + $0x10] sm:$0xff]  ;;  %vm6054_vm1 = vcmask 91136  }
  0x4c   :  { %v93_v3 = vld [vmem:[#allocation2 + $0x80] sm:$0xff]  ;;  %v6074_v4 = vcombine.high %v77_v1, %v85_v2  ;;  %v6073_v5 = vcombine.low %v77_v1, %v85_v2  ;;  %v6076_v16 = vcombine.high %v78_v12, %v86_v15  ;;  %v6075_v17 = vcombine.low %v78_v12, %v86_v15  ;;  %v94_v18 = vld [vmem:[#allocation2 + $0x88] sm:$0xff]  ;;  %v87_v26 = vld [vmem:[#allocation2 + $0x50] sm:$0xff] }
  0x4d   :  { %v101_v6 = vld [vmem:[#allocation2 + $0xc0] sm:$0xff]  ;;  %v102_v19 = vld [vmem:[#allocation2 + $0xc8] sm:$0xff]  ;;  %v6078_v32 = vcombine.high %v79_v25, %v87_v26  ;;  %v95_v33 = vld [vmem:[#allocation2 + $0x90] sm:$0xff]  ;;  %v6077_v38 = vcombine.low %v79_v25, %v87_v26 }
  0x4e   :  { %v6090_v7 = vcombine.high %v93_v3, %v101_v6  ;;  %v109_v8 = vld [vmem:[#allocation2 + $0x100] sm:$0xff]  ;;  %549 = vmatprep.subr.bf16.mxu0 %v6074_v4  ;;  %v6089_v10 = vcombine.low %v93_v3, %v101_v6  ;;  %v6092_v21 = vcombine.high %v94_v18, %v102_v19  ;;  %v110_v22 = vld [vmem:[#allocation2 + $0x108] sm:$0xff]  ;;  %590 = vmatprep.subr.bf16.mxu1 %v6076_v16  ;;  %v103_v34 = vld [vmem:[#allocation2 + $0xd0] sm:$0xff] }
  0x4f   :  { %v117_v9 = vld [vmem:[#allocation2 + $0x140] sm:$0xff]  ;;  %550 = vmatpush1.bf16.msra.mxu0 %v6073_v5  ;;  %v118_v23 = vld [vmem:[#allocation2 + $0x148] sm:$0xff]  ;;  %591 = vmatpush1.bf16.msra.mxu1 %v6075_v17  ;;  %v6091_v27 = vcombine.low %v94_v18, %v102_v19  ;;  %v80_v39 = vld [vmem:[#allocation2 + $0x18] sm:$0xff]  ;;  %v6094_v41 = vcombine.high %v95_v33, %v103_v34  ;;  %v6093_v46 = vcombine.low %v95_v33, %v103_v34 }
  0x50   :  { %551 = vmatprep.subr.bf16.mxu0 %v6090_v7  ;;  %v6106_v11 = vcombine.high %v109_v8, %v117_v9  ;;  %v125_v13 = vld [vmem:[#allocation2 + $0x180] sm:$0xff]  ;;  %v6105_v20 = vcombine.low %v109_v8, %v117_v9  ;;  %592 = vmatprep.subr.bf16.mxu1 %v6092_v21  ;;  %v6108_v28 = vcombine.high %v110_v22, %v118_v23  ;;  %v126_v30 = vld [vmem:[#allocation2 + $0x188] sm:$0xff]  ;;  %v88_v40 = vld [vmem:[#allocation2 + $0x58] sm:$0xff] }
  0x51   :  { %v133_v14 = vld [vmem:[#allocation2 + $0x1c0] sm:$0xff]  ;;  %v134_v31 = vld [vmem:[#allocation2 + $0x1c8] sm:$0xff]  ;;  %v6107_v35 = vcombine.low %v110_v22, %v118_v23  ;;  %v111_v42 = vld [vmem:[#allocation2 + $0x110] sm:$0xff]  ;;  %v6080_v45 = vcombine.high %v80_v39, %v88_v40  ;;  %v6079_v52 = vcombine.low %v80_v39, %v88_v40 }
  0x52   :  { %v6122_v24 = vcombine.high %v125_v13, %v133_v14  ;;  %v6121_v29 = vcombine.low %v125_v13, %v133_v14  ;;  %v6124_v36 = vcombine.high %v126_v30, %v134_v31  ;;  %v7272_v37 = vld [vmem:[%s9739_s0] sm:$0x7]  ;;  %v119_v43 = vld [vmem:[#allocation2 + $0x150] sm:$0xff]  ;;  %v6123_v44 = vcombine.low %v126_v30, %v134_v31  ;;  %v96_v47 = vld [vmem:[#allocation2 + $0x98] sm:$0xff] }
  0x53   :  { %552 = vmatpush1.bf16.msra.mxu0 %v6089_v10  ;;  %593 = vmatpush1.bf16.msra.mxu1 %v6091_v27  ;;  %v104_v48 = vld [vmem:[#allocation2 + $0xd8] sm:$0xff]  ;;  %v6110_v49 = vcombine.high %v111_v42, %v119_v43  ;;  %v127_v50 = vld [vmem:[#allocation2 + $0x190] sm:$0xff]  ;;  %v6109_v56 = vcombine.low %v111_v42, %v119_v43  ;;  %v81_v57 = vld [vmem:[#allocation2 + $0x20] sm:$0xff] }
  0x54   :  { %553 = vmatprep.subr.bf16.mxu0 %v6106_v11  ;;  %594 = vmatprep.subr.bf16.mxu1 %v6108_v28  ;;  %v135_v51 = vld [vmem:[#allocation2 + $0x1d0] sm:$0xff]  ;;  %v112_v53 = vld [vmem:[#allocation2 + $0x118] sm:$0xff]  ;;  %v6096_v55 = vcombine.high %v96_v47, %v104_v48  ;;  %v89_v58 = vld [vmem:[#allocation2 + $0x60] sm:$0xff]  ;;  %v6095_v60 = vcombine.low %v96_v47, %v104_v48 }
  0x55   :  { %v120_v54 = vld [vmem:[#allocation2 + $0x158] sm:$0xff]  ;;  %v6126_v59 = vcombine.high %v127_v50, %v135_v51  ;;  %v6125_v1 = vcombine.low %v127_v50, %v135_v51  ;;  %v97_v2 = vld [vmem:[#allocation2 + $0xa0] sm:$0xff]  ;;  %v6082_v4 = vcombine.high %v81_v57, %v89_v58  ;;  %v82_v6 = vld [vmem:[#allocation2 + $0x28] sm:$0xff]  ;;  %v6081_v9 = vcombine.low %v81_v57, %v89_v58 }
  0x56   :  { %v128_v61 = vld [vmem:[#allocation2 + $0x198] sm:$0xff]  ;;  %v6112_v63 = vcombine.high %v112_v53, %v120_v54  ;;  %v105_v3 = vld [vmem:[#allocation2 + $0xe0] sm:$0xff]  ;;  %v6111_v5 = vcombine.low %v112_v53, %v120_v54  ;;  %v90_v7 = vld [vmem:[#allocation2 + $0x68] sm:$0xff] }
  0x57   :  { %554 = vmatpush1.bf16.msra.mxu0 %v6105_v20  ;;  %595 = vmatpush1.bf16.msra.mxu1 %v6107_v35  ;;  %v136_v62 = vld [vmem:[#allocation2 + $0x1d8] sm:$0xff]  ;;  %v113_v10 = vld [vmem:[#allocation2 + $0x120] sm:$0xff]  ;;  %v6098_v12 = vcombine.high %v97_v2, %v105_v3  ;;  %v98_v14 = vld [vmem:[#allocation2 + $0xa8] sm:$0xff]  ;;  %v6084_v16 = vcombine.high %v82_v6, %v90_v7  ;;  %v6097_v17 = vcombine.low %v97_v2, %v105_v3 }
  0x58   :  { %555 = vmatprep.subr.bf16.mxu0 %v6122_v24  ;;  %596 = vmatprep.subr.bf16.mxu1 %v6124_v36  ;;  %v6128_v8 = vcombine.high %v128_v61, %v136_v62  ;;  %v121_v11 = vld [vmem:[#allocation2 + $0x160] sm:$0xff]  ;;  %v6127_v13 = vcombine.low %v128_v61, %v136_v62  ;;  %v106_v15 = vld [vmem:[#allocation2 + $0xe8] sm:$0xff]  ;;  %v6083_v21 = vcombine.low %v82_v6, %v90_v7  ;;  %v83_v26 = vld [vmem:[#allocation2 + $0x30] sm:$0xff] }
  0x59   :  { %v129_v18 = vld [vmem:[#allocation2 + $0x1a0] sm:$0xff]  ;;  %v6114_v20 = vcombine.high %v113_v10, %v121_v11  ;;  %v114_v22 = vld [vmem:[#allocation2 + $0x128] sm:$0xff]  ;;  %v6100_v24 = vcombine.high %v98_v14, %v106_v15  ;;  %v6113_v25 = vcombine.low %v113_v10, %v121_v11  ;;  %v91_v27 = vld [vmem:[#allocation2 + $0x70] sm:$0xff] }
  0x5a   :  { %v137_v19 = vld [vmem:[#allocation2 + $0x1e0] sm:$0xff]  ;;  %v122_v23 = vld [vmem:[#allocation2 + $0x168] sm:$0xff]  ;;  %v6086_v34 = vcombine.high %v83_v26, %v91_v27  ;;  %v99_v35 = vld [vmem:[#allocation2 + $0xb0] sm:$0xff]  ;;  %v6085_v40 = vcombine.low %v83_v26, %v91_v27 }
  0x5b   :  { %556 = vmatpush1.bf16.msra.mxu0 %v6121_v29  ;;  %597 = vmatpush1.bf16.msra.mxu1 %v6123_v44  ;;  %v6130_v28 = vcombine.high %v129_v18, %v137_v19  ;;  %v6099_v29 = vcombine.low %v98_v14, %v106_v15  ;;  %v6116_v30 = vcombine.high %v114_v22, %v122_v23  ;;  %v138_v33 = vld [vmem:[#allocation2 + $0x1e8] sm:$0xff]  ;;  %v107_v36 = vld [vmem:[#allocation2 + $0xf0] sm:$0xff]  ;;  %v92_v42 = vld [vmem:[#allocation2 + $0x78] sm:$0xff] }
  0x5c   :  { %631 = vmatprep.subr.bf16.mxu0 %v6078_v32  ;;  %672 = vmatprep.subr.bf16.mxu1 %v6080_v45  ;;  %v6129_v31 = vcombine.low %v129_v18, %v137_v19  ;;  %v130_v32 = vld [vmem:[#allocation2 + $0x1a8] sm:$0xff]  ;;  %v6102_v43 = vcombine.high %v99_v35, %v107_v36  ;;  %v115_v44 = vld [vmem:[#allocation2 + $0x130] sm:$0xff]  ;;  %v6101_v48 = vcombine.low %v99_v35, %v107_v36  ;;  %v108_v50 = vld [vmem:[#allocation2 + $0xf8] sm:$0xff] }
  0x5d   :  { %v6132_v39 = vcombine.high %v130_v32, %v138_v33  ;;  %v123_v45 = vld [vmem:[#allocation2 + $0x170] sm:$0xff]  ;;  %v116_v57 = vld [vmem:[#allocation2 + $0x138] sm:$0xff] }
  0x5e   :  { %6137 = vmatmul.mubr.msk.bf16.vlgmr.msra.gmra.mrb[0].mxu0 %vm545_vm0, %v7272_v37  ;;  %6138 = vmatmul.mubr.msk.bf16.vlgmr.msra.gmra.mrb[0].mxu1 %vm545_vm0, %v7272_v37  ;;  %v6118_v51 = vcombine.high %v115_v44, %v123_v45  ;;  %v139_v53 = vld [vmem:[#allocation2 + $0x1f0] sm:$0xff]  ;;  %v124_v58 = vld [vmem:[#allocation2 + $0x178] sm:$0xff] }
  0x5f   :  { %632 = vmatpush1.bf16.msra.mxu0 %v6077_v38  ;;  %663 = vmatprep.mubr.bf16.mxu0 %v7175_v0  ;;  %v6115_v38 = vcombine.low %v114_v22, %v122_v23  ;;  %v6120_v61 = vcombine.high %v116_v57, %v124_v58  ;;  %v6119_v2 = vcombine.low %v116_v57, %v124_v58  ;;  %v946_v6 = vld [vmem:[#allocation7 + $0x8] sm:$0xff]  ;;  %v977_v19 = vld [vmem:[#allocation7 + $0x100] sm:$0xff] }
  0x60   :  { %633 = vmatprep.subr.bf16.mxu0 %v6094_v41  ;;  %673 = vmatpush1.bf16.msra.mxu1 %v6079_v52  ;;  %v84_v41 = vld [vmem:[#allocation2 + $0x38] sm:$0xff]  ;;  %v131_v52 = vld [vmem:[#allocation2 + $0x1b0] sm:$0xff] }
  0x61   :  { %704 = vmatprep.mubr.bf16.mxu1 %v7175_v0  ;;  %674 = vmatprep.subr.bf16.mxu1 %v6096_v55  ;;  %v6088_v47 = vcombine.high %v84_v41, %v92_v42  ;;  %v6087_v54 = vcombine.low %v84_v41, %v92_v42  ;;  %v6133_v62 = vcombine.low %v131_v52, %v139_v53  ;;  %v970_v15 = vld [vmem:[#allocation7 + $0xc8] sm:$0xff]  ;;  %v1009_v35 = vld [vmem:[#allocation7 + $0x200] sm:$0xff] }
  0x62   :  { %v986_v23 = vld [vmem:[#allocation7 + $0x148] sm:$0xff]  ;;  %v1017_v36 = vld [vmem:[#allocation7 + $0x240] sm:$0xff] }
  0x63   :  { %634 = vmatpush1.bf16.msra.mxu0 %v6093_v46  ;;  %v6131_v46 = vcombine.low %v130_v32, %v138_v33  ;;  %v7346_v41 = vcombine.low %v1009_v35, %v1017_v36 }
  0x64   :  { %635 = vmatprep.subr.bf16.mxu0 %v6110_v49  ;;  %675 = vmatpush1.bf16.msra.mxu1 %v6095_v60  ;;  %v100_v49 = vld [vmem:[#allocation2 + $0xb8] sm:$0xff] }
  0x65   :  { %676 = vmatprep.subr.bf16.mxu1 %v6112_v63  ;;  %v6104_v55 = vcombine.high %v100_v49, %v108_v50  ;;  %v6103_v60 = vcombine.low %v100_v49, %v108_v50  ;;  %v132_v63 = vld [vmem:[#allocation2 + $0x1b8] sm:$0xff] }
  0x67   :  { %636 = vmatpush1.bf16.msra.mxu0 %v6109_v56  ;;  %v6117_v56 = vcombine.low %v115_v44, %v123_v45  ;;  %v1025_v44 = vld [vmem:[#allocation7 + $0x280] sm:$0xff] }
  0x68   :  { %637 = vmatprep.subr.bf16.mxu0 %v6126_v59  ;;  %677 = vmatpush1.bf16.msra.mxu1 %v6111_v5  ;;  %v6134_v59 = vcombine.high %v131_v52, %v139_v53  ;;  %v953_v5 = vld [vmem:[#allocation7 + $0x40] sm:$0xff] }
  0x69   :  { %678 = vmatprep.subr.bf16.mxu1 %v6128_v8  ;;  %v954_v8 = vld [vmem:[#allocation7 + $0x48] sm:$0xff]  ;;  %v1033_v45 = vld [vmem:[#allocation7 + $0x2c0] sm:$0xff] }
  0x6a   :  { %v7300_v10 = vcombine.low %v946_v6, %v954_v8  ;;  %v7302_v11 = vcombine.high %v946_v6, %v954_v8  ;;  %v7358_v49 = vcombine.low %v1025_v44, %v1033_v45  ;;  %v1041_v52 = vld [vmem:[#allocation7 + $0x300] sm:$0xff]  ;;  %v1074_v6 = vld [vmem:[#allocation7 + $0x408] sm:$0xff] }
  0x6b   :  { %638 = vmatpush1.bf16.msra.mxu0 %v6125_v1  ;;  %v140_v1 = vld [vmem:[#allocation2 + $0x1f8] sm:$0xff]  ;;  %v1049_v53 = vld [vmem:[#allocation7 + $0x340] sm:$0xff] }
  0x6c   :  { %713 = vmatprep.subr.bf16.mxu0 %v6082_v4  ;;  %679 = vmatpush1.bf16.msra.mxu1 %v6127_v13  ;;  %v6136_v3 = vcombine.high %v132_v63, %v140_v1  ;;  %v6135_v4 = vcombine.low %v132_v63, %v140_v1  ;;  %v962_v13 = vld [vmem:[#allocation7 + $0x88] sm:$0xff]  ;;  %v7370_v57 = vcombine.low %v1041_v52, %v1049_v53 }
  0x6d   :  { %754 = vmatprep.subr.bf16.mxu1 %v6084_v16  ;;  %v7314_v18 = vcombine.high %v962_v13, %v970_v15  ;;  %v1066_v1 = vld [vmem:[#allocation7 + $0x3c8] sm:$0xff] }
  0x6e   :  { %6139 = vmatmul.mubr.msk.bf16.vlgmr.msra.gmra.mrb[4].mxu0 %vm545_vm0, %v7272_v37 }
  0x6f   :  { %714 = vmatpush1.bf16.msra.mxu0 %v6081_v9  ;;  %745 = vmatprep.mubr.bf16.mxu0 %v7175_v0 }
  0x70   :  { %715 = vmatprep.subr.bf16.mxu0 %v6098_v12  ;;  %6140 = vmatmul.mubr.msk.bf16.vlgmr.msra.gmra.mrb[4].mxu1 %vm545_vm0, %v7272_v37  ;;  %v961_v12 = vld [vmem:[#allocation7 + $0x80] sm:$0xff] }
  0x71   :  { %755 = vmatpush1.bf16.msra.mxu1 %v6083_v21  ;;  %786 = vmatprep.mubr.bf16.mxu1 %v7175_v0  ;;  %v978_v21 = vld [vmem:[#allocation7 + $0x108] sm:$0xff] }
  0x72   :  { %756 = vmatprep.subr.bf16.mxu1 %v6100_v24  ;;  %v993_v24 = vld [vmem:[#allocation7 + $0x180] sm:$0xff]  ;;  %v7323_v27 = vcombine.high %v978_v21, %v986_v23 }
  0x73   :  { %716 = vmatpush1.bf16.msra.mxu0 %v6097_v17  ;;  %v7312_v17 = vcombine.low %v962_v13, %v970_v15 }
  0x74   :  { %717 = vmatprep.subr.bf16.mxu0 %v6114_v20  ;;  %v985_v20 = vld [vmem:[#allocation7 + $0x140] sm:$0xff] }
  0x75   :  { %757 = vmatpush1.bf16.msra.mxu1 %v6099_v29  ;;  %v7317_v22 = vcombine.high %v977_v19, %v985_v20  ;;  %v7321_v26 = vcombine.low %v977_v19, %v985_v20  ;;  %v1002_v29 = vld [vmem:[#allocation7 + $0x1c8] sm:$0xff]  ;;  %v1089_v19 = vld [vmem:[#allocation7 + $0x480] sm:$0xff] }
  0x76   :  { %758 = vmatprep.subr.bf16.mxu1 %v6116_v30  ;;  %v7327_v30 = vcombine.low %v978_v21, %v986_v23  ;;  %v1097_v20 = vld [vmem:[#allocation7 + $0x4c0] sm:$0xff]  ;;  %v1090_v21 = vld [vmem:[#allocation7 + $0x488] sm:$0xff] }
  0x77   :  { %718 = vmatpush1.bf16.msra.mxu0 %v6113_v25  ;;  %v1001_v25 = vld [vmem:[#allocation7 + $0x1c0] sm:$0xff]  ;;  %v7404_v23 = vcombine.high %v1089_v19, %v1097_v20 }
  0x78   :  { %719 = vmatprep.subr.bf16.mxu0 %v6130_v28  ;;  %v994_v28 = vld [vmem:[#allocation7 + $0x188] sm:$0xff]  ;;  %v7335_v33 = vcombine.low %v993_v24, %v1001_v25 }
  0x79   :  { %759 = vmatpush1.bf16.msra.mxu1 %v6115_v38  ;;  %v7332_v32 = vcombine.high %v994_v28, %v1002_v29  ;;  %v1010_v38 = vld [vmem:[#allocation7 + $0x208] sm:$0xff]  ;;  %10247 = vst [vmem:[#allocation22_spill] sm:$0xff] %v7404_v23 }
  0x7a   :  { %760 = vmatprep.subr.bf16.mxu1 %v6132_v39  ;;  %v7344_v39 = vcombine.high %v1009_v35, %v1017_v36  ;;  %v1105_v35 = vld [vmem:[#allocation7 + $0x500] sm:$0xff] }
  0x7b   :  { %720 = vmatpush1.bf16.msra.mxu0 %v6129_v31  ;;  %v7329_v31 = vcombine.high %v993_v24, %v1001_v25  ;;  %v1098_v24 = vld [vmem:[#allocation7 + $0x4c8] sm:$0xff]  ;;  %v7406_v25 = vcombine.low %v1089_v19, %v1097_v20  ;;  %v1113_v36 = vld [vmem:[#allocation7 + $0x540] sm:$0xff] }
  0x7c   :  { %795 = vmatprep.subr.bf16.mxu0 %v6086_v34  ;;  %v7339_v34 = vcombine.low %v994_v28, %v1002_v29  ;;  %v7408_v28 = vcombine.low %v1090_v21, %v1098_v24  ;;  %v7410_v29 = vcombine.high %v1090_v21, %v1098_v24  ;;  %v1146_v19 = vld [vmem:[#allocation7 + $0x648] sm:$0xff] }
  0x7d   :  { %761 = vmatpush1.bf16.msra.mxu1 %v6131_v46  ;;  %v1026_v46 = vld [vmem:[#allocation7 + $0x288] sm:$0xff]  ;;  %10248 = vst [vmem:[#allocation23_spill] sm:$0xff] %v7406_v25 }
  0x7e   :  { %6141 = vmatmul.mubr.msk.bf16.vlgmr.msra.gmra.mrb[8].mxu0 %vm545_vm0, %v7272_v37  ;;  %836 = vmatprep.subr.bf16.mxu1 %v6088_v47  ;;  %v7356_v47 = vcombine.high %v1025_v44, %v1033_v45  ;;  %10249 = vst [vmem:[#allocation24_spill] sm:$0xff] %v7408_v28  ;;  %10250 = vst [vmem:[#allocation25_spill] sm:$0xff] %v7410_v29  ;;  %v1114_v44 = vld [vmem:[#allocation7 + $0x548] sm:$0xff]  ;;  %v7418_v45 = vcombine.low %v1105_v35, %v1113_v36 }
  0x7f   :  { %796 = vmatpush1.bf16.msra.mxu0 %v6085_v40  ;;  %827 = vmatprep.mubr.bf16.mxu0 %v7175_v0  ;;  %v1018_v40 = vld [vmem:[#allocation7 + $0x248] sm:$0xff] }
  0x80   :  { %797 = vmatprep.subr.bf16.mxu0 %v6102_v43  ;;  %6142 = vmatmul.mubr.msk.bf16.vlgmr.msra.gmra.mrb[8].mxu1 %vm545_vm0, %v7272_v37  ;;  %v7348_v42 = vcombine.low %v1010_v38, %v1018_v40  ;;  %v7350_v43 = vcombine.high %v1010_v38, %v1018_v40  ;;  %v1106_v38 = vld [vmem:[#allocation7 + $0x508] sm:$0xff]  ;;  %v7416_v40 = vcombine.high %v1105_v35, %v1113_v36  ;;  %v1153_v35 = vld [vmem:[#allocation7 + $0x680] sm:$0xff] }
  0x81   :  { %837 = vmatpush1.bf16.msra.mxu1 %v6087_v54  ;;  %868 = vmatprep.mubr.bf16.mxu1 %v7175_v0  ;;  %v945_v0 = vld [vmem:[#allocation7] sm:$0xff]  ;;  %v1042_v54 = vld [vmem:[#allocation7 + $0x308] sm:$0xff]  ;;  %10252 = vst [vmem:[#allocation27_spill] sm:$0xff] %v7418_v45 }
  0x82   :  { %838 = vmatprep.subr.bf16.mxu1 %v6104_v55  ;;  %v7296_v7 = vcombine.high %v945_v0, %v953_v5  ;;  %v7298_v9 = vcombine.low %v945_v0, %v953_v5  ;;  %v7368_v55 = vcombine.high %v1041_v52, %v1049_v53  ;;  %v1073_v0 = vld [vmem:[#allocation7 + $0x400] sm:$0xff]  ;;  %10251 = vst [vmem:[#allocation26_spill] sm:$0xff] %v7416_v40 }
  0x83   :  { %798 = vmatpush1.bf16.msra.mxu0 %v6101_v48  ;;  %v1034_v48 = vld [vmem:[#allocation7 + $0x2c8] sm:$0xff]  ;;  %v1081_v5 = vld [vmem:[#allocation7 + $0x440] sm:$0xff] }
  0x84   :  { %799 = vmatprep.subr.bf16.mxu0 %v6118_v51  ;;  %v7360_v50 = vcombine.low %v1026_v46, %v1034_v48  ;;  %v7362_v51 = vcombine.high %v1026_v46, %v1034_v48  ;;  %v7392_v8 = vcombine.high %v1073_v0, %v1081_v5  ;;  %v7420_v46 = vcombine.low %v1106_v38, %v1114_v44  ;;  %v1121_v52 = vld [vmem:[#allocation7 + $0x580] sm:$0xff] }
  0x85   :  { %839 = vmatpush1.bf16.msra.mxu1 %v6103_v60  ;;  %v1057_v60 = vld [vmem:[#allocation7 + $0x380] sm:$0xff]  ;;  %v7422_v48 = vcombine.high %v1106_v38, %v1114_v44  ;;  %v1154_v38 = vld [vmem:[#allocation7 + $0x688] sm:$0xff] }
  0x86   :  { %840 = vmatprep.subr.bf16.mxu1 %v6120_v61  ;;  %v1065_v61 = vld [vmem:[#allocation7 + $0x3c0] sm:$0xff]  ;;  %10243 = vst [vmem:[#allocation18_spill] sm:$0xff] %v7392_v8  ;;  %10253 = vst [vmem:[#allocation28_spill] sm:$0xff] %v7420_v46 }
  0x87   :  { %800 = vmatpush1.bf16.msra.mxu0 %v6117_v56  ;;  %v1050_v56 = vld [vmem:[#allocation7 + $0x348] sm:$0xff]  ;;  %v7380_v63 = vcombine.high %v1057_v60, %v1065_v61  ;;  %10254 = vst [vmem:[#allocation29_spill] sm:$0xff] %v7422_v48  ;;  %v1129_v53 = vld [vmem:[#allocation7 + $0x5c0] sm:$0xff] }
  0x88   :  { %801 = vmatprep.subr.bf16.mxu0 %v6134_v59  ;;  %v7372_v58 = vcombine.low %v1042_v54, %v1050_v56  ;;  %v7374_v59 = vcombine.high %v1042_v54, %v1050_v56  ;;  %v1122_v54 = vld [vmem:[#allocation7 + $0x588] sm:$0xff]  ;;  %v7428_v56 = vcombine.high %v1121_v52, %v1129_v53  ;;  %v1161_v36 = vld [vmem:[#allocation7 + $0x6c0] sm:$0xff] }
  0x89   :  { %841 = vmatpush1.bf16.msra.mxu1 %v6119_v2  ;;  %v7382_v2 = vcombine.low %v1057_v60, %v1065_v61  ;;  %v1130_v60 = vld [vmem:[#allocation7 + $0x5c8] sm:$0xff]  ;;  %v7430_v61 = vcombine.low %v1121_v52, %v1129_v53  ;;  %v7452_v44 = vcombine.high %v1153_v35, %v1161_v36  ;;  %v7454_v53 = vcombine.low %v1153_v35, %v1161_v36 }
  0x8a   :  { %842 = vmatprep.subr.bf16.mxu1 %v6136_v3  ;;  %10255 = vst [vmem:[#allocation30_spill] sm:$0xff] %v7428_v56  ;;  %v1162_v52 = vld [vmem:[#allocation7 + $0x6c8] sm:$0xff] }
  0x8b   :  { %802 = vmatpush1.bf16.msra.mxu0 %v6133_v62  ;;  %v1058_v62 = vld [vmem:[#allocation7 + $0x388] sm:$0xff]  ;;  %10240 = vst [vmem:[#allocation15_spill] sm:$0xff] %v7382_v2  ;;  %10256 = vst [vmem:[#allocation31_spill] sm:$0xff] %v7430_v61 }
  0x8c   :  { %4017 = vmatprep.subr.bf16.mxu0 %v7296_v7  ;;  %v7384_v3 = vcombine.low %v1058_v62, %v1066_v1  ;;  %10263 = vst [vmem:[#allocation38_spill] sm:$0xff] %v7452_v44  ;;  %10264 = vst [vmem:[#allocation39_spill] sm:$0xff] %v7454_v53 }
  0x8d   :  { %843 = vmatpush1.bf16.msra.mxu1 %v6135_v4  ;;  %v7386_v4 = vcombine.high %v1058_v62, %v1066_v1  ;;  %v7432_v62 = vcombine.low %v1122_v54, %v1130_v60  ;;  %v7434_v1 = vcombine.high %v1122_v54, %v1130_v60  ;;  %v7456_v54 = vcombine.low %v1154_v38, %v1162_v52 }
  0x8e   :  { %6143 = vmatmul.mubr.msk.bf16.vlgmr.msra.gmra.mrb[12].mxu0 %vm545_vm0, %v7272_v37  ;;  %4099 = vmatprep.subr.bf16.mxu1 %v7302_v11  ;;  %10241 = vst [vmem:[#allocation16_spill] sm:$0xff] %v7384_v3  ;;  %v7458_v60 = vcombine.high %v1154_v38, %v1162_v52  ;;  %v1185_v52 = vld [vmem:[#allocation7 + $0x780] sm:$0xff] }
  0x8f   :  { %4018 = vmatpush1.bf16.msra.mxu0 %v7298_v9  ;;  %10242 = vst [vmem:[#allocation17_spill] sm:$0xff] %v7386_v4  ;;  %10257 = vst [vmem:[#allocation32_spill] sm:$0xff] %v7432_v62 }
  0x90   :  { %6144 = vmatmul.mubr.msk.bf16.vlgmr.msra.gmra.mrb[12].mxu1 %vm545_vm0, %v7272_v37  ;;  %v969_v37 = vld [vmem:[#allocation7 + $0xc0] sm:$0xff]  ;;  %10258 = vst [vmem:[#allocation33_spill] sm:$0xff] %v7434_v1  ;;  %10265 = vst [vmem:[#allocation40_spill] sm:$0xff] %v7456_v54 }
  0x91   :  { %4100 = vmatpush1.bf16.msra.mxu1 %v7300_v10  ;;  %v7308_v14 = vcombine.high %v961_v12, %v969_v37  ;;  %v7310_v16 = vcombine.low %v961_v12, %v969_v37  ;;  %v1082_v12 = vld [vmem:[#allocation7 + $0x448] sm:$0xff]  ;;  %v7394_v37 = vcombine.low %v1073_v0, %v1081_v5  ;;  %v1137_v0 = vld [vmem:[#allocation7 + $0x600] sm:$0xff]  ;;  %10266 = vst [vmem:[#allocation41_spill] sm:$0xff] %v7458_v60 }
  0x92   :  { %4101 = vmatprep.subr.bf16.mxu1 %v7314_v18  ;;  %v7396_v13 = vcombine.low %v1074_v6, %v1082_v12  ;;  %v7398_v15 = vcombine.high %v1074_v6, %v1082_v12  ;;  %v1145_v5 = vld [vmem:[#allocation7 + $0x640] sm:$0xff]  ;;  %v1138_v6 = vld [vmem:[#allocation7 + $0x608] sm:$0xff] }
  0x93   :  { %4019 = vmatprep.subr.bf16.mxu0 %v7308_v14  ;;  %10244 = vst [vmem:[#allocation19_spill] sm:$0xff] %v7394_v37  ;;  %v7440_v12 = vcombine.high %v1137_v0, %v1145_v5  ;;  %v7442_v20 = vcombine.low %v1137_v0, %v1145_v5  ;;  %v7444_v21 = vcombine.low %v1138_v6, %v1146_v19  ;;  %v1169_v0 = vld [vmem:[#allocation7 + $0x700] sm:$0xff] }
  0x94   :  { %4020 = vmatpush1.bf16.msra.mxu0 %v7310_v16  ;;  %10245 = vst [vmem:[#allocation20_spill] sm:$0xff] %v7396_v13  ;;  %10246 = vst [vmem:[#allocation21_spill] sm:$0xff] %v7398_v15  ;;  %v7446_v24 = vcombine.high %v1138_v6, %v1146_v19  ;;  %v1177_v5 = vld [vmem:[#allocation7 + $0x740] sm:$0xff]  ;;  %v1170_v6 = vld [vmem:[#allocation7 + $0x708] sm:$0xff] }
  0x95   :  { %4102 = vmatpush1.bf16.msra.mxu1 %v7312_v17  ;;  %4021 = vmatprep.subr.bf16.mxu0 %v7317_v22  ;;  %10259 = vst [vmem:[#allocation34_spill] sm:$0xff] %v7440_v12  ;;  %10260 = vst [vmem:[#allocation35_spill] sm:$0xff] %v7442_v20  ;;  %v7464_v19 = vcombine.high %v1169_v0, %v1177_v5  ;;  %v7466_v35 = vcombine.low %v1169_v0, %v1177_v5 }
  0x96   :  { %4103 = vmatprep.subr.bf16.mxu1 %v7323_v27  ;;  %10261 = vst [vmem:[#allocation36_spill] sm:$0xff] %v7444_v21  ;;  %10262 = vst [vmem:[#allocation37_spill] sm:$0xff] %v7446_v24 }
  0x97   :  { %10267 = vst [vmem:[#allocation42_spill] sm:$0xff] %v7464_v19  ;;  %10268 = vst [vmem:[#allocation43_spill] sm:$0xff] %v7466_v35 }
  0x98   :  { %4022 = vmatpush1.bf16.msra.mxu0 %v7321_v26 }
  0x99   :  { %4104 = vmatpush1.bf16.msra.mxu1 %v7327_v30  ;;  %4023 = vmatprep.subr.bf16.mxu0 %v7329_v31 }
  0x9a   :  { %4105 = vmatprep.subr.bf16.mxu1 %v7332_v32 }
  0x9c   :  { %4024 = vmatpush1.bf16.msra.mxu0 %v7335_v33 }
  0x9d   :  { %4106 = vmatpush1.bf16.msra.mxu1 %v7339_v34  ;;  %4025 = vmatprep.subr.bf16.mxu0 %v7344_v39 }
  0x9e   :  { %4107 = vmatprep.subr.bf16.mxu1 %v7350_v43 }
  0xa0   :  { %4026 = vmatpush1.bf16.msra.mxu0 %v7346_v41 }
  0xa1   :  { %4108 = vmatpush1.bf16.msra.mxu1 %v7348_v42  ;;  %4027 = vmatprep.subr.bf16.mxu0 %v7356_v47 }
  0xa2   :  { %4109 = vmatprep.subr.bf16.mxu1 %v7362_v51 }
  0xa4   :  { %4028 = vmatpush1.bf16.msra.mxu0 %v7358_v49 }
  0xa5   :  { %4110 = vmatpush1.bf16.msra.mxu1 %v7360_v50  ;;  %4029 = vmatprep.subr.bf16.mxu0 %v7368_v55 }
  0xa6   :  { %4111 = vmatprep.subr.bf16.mxu1 %v7374_v59 }
  0xa8   :  { %4030 = vmatpush1.bf16.msra.mxu0 %v7370_v57 }
  0xa9   :  { %4112 = vmatpush1.bf16.msra.mxu1 %v7372_v58  ;;  %4031 = vmatprep.subr.bf16.mxu0 %v7380_v63 }
  0xaa   :  { %4113 = vmatprep.subr.bf16.mxu1 %v7386_v4 }
  0xac   :  { %4032 = vmatpush1.bf16.msra.mxu0 %v7382_v2  ;;  %v1338_v2 = vld [vmem:[#allocation7 + $0xc48] sm:$0xff] }
  0xad   :  { %4114 = vmatpush1.bf16.msra.mxu1 %v7384_v3  ;;  %4033 = vmatprep.subr.bf16.mxu0 %v7392_v8 }
  0xae   :  { %4115 = vmatprep.subr.bf16.mxu1 %v7398_v15  ;;  %v142_v15 = vld [vmem:[#allocation5 + $0x8] sm:$0xff] }
  0xb0   :  { %4034 = vmatpush1.bf16.msra.mxu0 %v7394_v37 }
  0xb1   :  { %4116 = vmatpush1.bf16.msra.mxu1 %v7396_v13  ;;  %4035 = vmatprep.subr.bf16.mxu0 %v7404_v23 }
  0xb2   :  { %4117 = vmatprep.subr.bf16.mxu1 %v7410_v29 }
  0xb4   :  { %4036 = vmatpush1.bf16.msra.mxu0 %v7406_v25 }
  0xb5   :  { %4118 = vmatpush1.bf16.msra.mxu1 %v7408_v28  ;;  %4037 = vmatprep.subr.bf16.mxu0 %v7416_v40 }
  0xb6   :  { %4119 = vmatprep.subr.bf16.mxu1 %v7422_v48 }
  0xb8   :  { %4038 = vmatpush1.bf16.msra.mxu0 %v7418_v45 }
  0xb9   :  { %4120 = vmatpush1.bf16.msra.mxu1 %v7420_v46  ;;  %4039 = vmatprep.subr.bf16.mxu0 %v7428_v56 }
  0xba   :  { %4121 = vmatprep.subr.bf16.mxu1 %v7434_v1 }
  0xbc   :  { %4040 = vmatpush1.bf16.msra.mxu0 %v7430_v61 }
  0xbd   :  { %4122 = vmatpush1.bf16.msra.mxu1 %v7432_v62  ;;  %4041 = vmatprep.subr.bf16.mxu0 %v7440_v12 }
  0xbe   :  { %4123 = vmatprep.subr.bf16.mxu1 %v7446_v24 }
  0xc0   :  { %4042 = vmatpush1.bf16.msra.mxu0 %v7442_v20 }
  0xc1   :  { %4124 = vmatpush1.bf16.msra.mxu1 %v7444_v21  ;;  %4043 = vmatprep.subr.bf16.mxu0 %v7452_v44  ;;  %v1178_v21 = vld [vmem:[#allocation7 + $0x748] sm:$0xff] }
  0xc2   :  { %4125 = vmatprep.subr.bf16.mxu1 %v7458_v60  ;;  %v7468_v36 = vcombine.low %v1170_v6, %v1178_v21  ;;  %v7470_v38 = vcombine.high %v1170_v6, %v1178_v21  ;;  %v1186_v60 = vld [vmem:[#allocation7 + $0x788] sm:$0xff]  ;;  %v1201_v6 = vld [vmem:[#allocation7 + $0x800] sm:$0xff] }
  0xc3   :  { %v1194_v44 = vld [vmem:[#allocation7 + $0x7c8] sm:$0xff] }
  0xc4   :  { %4044 = vmatpush1.bf16.msra.mxu0 %v7454_v53  ;;  %10269 = vst [vmem:[#allocation44_spill] sm:$0xff] %v7468_v36  ;;  %10270 = vst [vmem:[#allocation45_spill] sm:$0xff] %v7470_v38  ;;  %v1193_v53 = vld [vmem:[#allocation7 + $0x7c0] sm:$0xff]  ;;  %v7480_v5 = vcombine.low %v1186_v60, %v1194_v44  ;;  %v7482_v21 = vcombine.high %v1186_v60, %v1194_v44 }
  0xc5   :  { %4126 = vmatpush1.bf16.msra.mxu1 %v7456_v54  ;;  %4045 = vmatprep.subr.bf16.mxu0 %v7464_v19  ;;  %v7476_v54 = vcombine.high %v1185_v52, %v1193_v53  ;;  %v7478_v0 = vcombine.low %v1185_v52, %v1193_v53  ;;  %v1210_v19 = vld [vmem:[#allocation7 + $0x848] sm:$0xff] }
  0xc6   :  { %4127 = vmatprep.subr.bf16.mxu1 %v7470_v38  ;;  %10273 = vst [vmem:[#allocation48_spill] sm:$0xff] %v7480_v5  ;;  %10274 = vst [vmem:[#allocation49_spill] sm:$0xff] %v7482_v21  ;;  %v1202_v38 = vld [vmem:[#allocation7 + $0x808] sm:$0xff] }
  0xc7   :  { %10271 = vst [vmem:[#allocation46_spill] sm:$0xff] %v7476_v54  ;;  %10272 = vst [vmem:[#allocation47_spill] sm:$0xff] %v7478_v0  ;;  %v7493_v44 = vcombine.low %v1202_v38, %v1210_v19  ;;  %v7495_v60 = vcombine.high %v1202_v38, %v1210_v19  ;;  %v7504_v19 = vld [vmem:[#allocation5] sm:$0xff] }
  0xc8   :  { %4046 = vmatpush1.bf16.msra.mxu0 %v7466_v35  ;;  %v1209_v35 = vld [vmem:[#allocation7 + $0x840] sm:$0xff] }
  0xc9   :  { %4128 = vmatpush1.bf16.msra.mxu1 %v7468_v36  ;;  %4047 = vmatprep.subr.bf16.mxu0 %v7476_v54  ;;  %v7488_v36 = vcombine.high %v1201_v6, %v1209_v35  ;;  %v7490_v53 = vcombine.low %v1201_v6, %v1209_v35  ;;  %10277 = vst [vmem:[#allocation52_spill] sm:$0xff] %v7493_v44  ;;  %10278 = vst [vmem:[#allocation53_spill] sm:$0xff] %v7495_v60  ;;  %v145_v54 = vlaneseq }
  0xca   :  { %4129 = vmatprep.subr.bf16.mxu1 %v7482_v21 }
  0xcb   :  { %10275 = vst [vmem:[#allocation50_spill] sm:$0xff] %v7488_v36  ;;  %10276 = vst [vmem:[#allocation51_spill] sm:$0xff] %v7490_v53 }
  0xcc   :  { %4048 = vmatpush1.bf16.msra.mxu0 %v7478_v0 }
  0xcd   :  { %4130 = vmatpush1.bf16.msra.mxu1 %v7480_v5  ;;  %4058 = vmatprep.subr.bf16.mxu0 %v7488_v36  ;;  %v7500_v5 = vshrl.u32 %v145_v54, 7 }
  0xce   :  { %4140 = vmatprep.subr.bf16.mxu1 %v7495_v60 }
  0xcf   :  { %v163_v6 = vsub.s32 4, %v7500_v5  ;;  %v167_v62 = vsub.s32 5, %v7500_v5  ;;  %v9778_v54 = vsub.s32 7, %v7500_v5 }
  0xd1   :  { %v164_v38 = vrot.slane %v7504_v19, %v163_v6  ;;  %v168_v60 = vrot.slane %v7504_v19, %v167_v62  ;;  %v176_v28 = vrot.slane %v7504_v19, %v9778_v54 }
 0x131   :  { %v583_v52 = vpop.f32.mrb[0].mxu0  ;;  %v7498_v24 = vpop.f32.mrb[0].mxu1 }
 0x132   :  { %v585_v0 = vpop.f32.mrb[1].mxu0  ;;  %v626_v12 = vpop.f32.mrb[1].mxu1 }
 0x133   :  { %v587_v21 = vpop.f32.mrb[2].mxu0  ;;  %v628_v35 = vpop.f32.mrb[2].mxu1 }
 0x134   :  { %v588_v20 = vpop.f32.mrb[3].mxu0  ;;  %v629_v36 = vpop.f32.mrb[3].mxu1  ;;  %v9775_v21 = vsub.s32 6, %v7500_v5  ;;  %v151_v35 = vsub.s32 1, %v7500_v5 }
 0x135   :  { %v147_v20 = vsub.s32 0, %v7500_v5 }
 0x136   :  { %v172_v48 = vrot.slane %v7504_v19, %v9775_v21  ;;  %v152_v25 = vrot.slane %v7504_v19, %v151_v35 }
 0x137   :  { %v148_v40 = vrot.slane %v7504_v19, %v147_v20 }
 0x138   :  { %v7531_v21 = vadd.f32 %v585_v0, %v152_v25  ;;  %v184_v25 = vrot.slane %v142_v15, %v151_v35 }
 0x13a   :  { %10280 = vst [vmem:[#allocation55_spill] sm:$0xff] %v7531_v21  ;;  %v6146_v37 = vmul.f32 -1.442695, %v7531_v21 }
 0x141   :  { %v665_v61 = vpop.f32.mrb[4].mxu0 }
 0x142   :  { %v7512_v1 = vadd.f32 %v665_v61, %v164_v38  ;;  %v667_v36 = vpop.f32.mrb[5].mxu0 }
 0x143   :  { %v7514_v56 = vadd.f32 %v667_v36, %v168_v60  ;;  %v669_v46 = vpop.f32.mrb[6].mxu0  ;;  %v706_v29 = vpop.f32.mrb[4].mxu1  ;;  %v7526_v60 = vadd.f32 %v583_v52, %v148_v40  ;;  %v180_v52 = vrot.slane %v142_v15, %v147_v20 }
 0x144   :  { %v670_v45 = vpop.f32.mrb[7].mxu0  ;;  %v7524_v61 = vadd.f32 %v706_v29, %v172_v48  ;;  %v708_v38 = vpop.f32.mrb[5].mxu1 }
 0x145   :  { %10279 = vst [vmem:[#allocation54_spill] sm:$0xff] %v7526_v60  ;;  %v159_v45 = vsub.s32 3, %v7500_v5  ;;  %v7529_v46 = vadd.f32 %v708_v38, %v176_v28  ;;  %v710_v36 = vpop.f32.mrb[6].mxu1  ;;  %v6145_v13 = vmul.f32 -1.442695, %v7526_v60  ;;  %v9786_v28 = vsub.s32 2, %v7500_v5 }
 0x146   :  { %v711_v23 = vpop.f32.mrb[7].mxu1 }
 0x147   :  { %v160_v54 = vrot.slane %v7504_v19, %v159_v45  ;;  %6871 = vpow2.f32 %v6145_v13  ;;  %v188_v23 = vrot.slane %v142_v15, %v9786_v28 }
 0x148   :  { %6873 = vpow2.f32 %v6146_v37  ;;  %v192_v37 = vrot.slane %v142_v15, %v159_v45 }
 0x149   :  { %v7536_v48 = vadd.f32 %v626_v12, %v160_v54 }
 0x14b   :  { %10281 = vst [vmem:[#allocation56_spill] sm:$0xff] %v7536_v48  ;;  %v6148_v36 = vmul.f32 -1.442695, %v7536_v48 }
 0x14d   :  { %6875 = vpow2.f32 %v6148_v36 }
 0x151   :  { %v747_v29 = vpop.f32.mrb[8].mxu0 }
 0x152   :  { %v749_v40 = vpop.f32.mrb[9].mxu0  ;;  %v7542_v60 = vadd.f32 %v747_v29, %v180_v52  ;;  %v196_v52 = vrot.slane %v142_v15, %v163_v6  ;;  %v10288_v6 = vsub.s32 6, %v7500_v5 }
 0x153   :  { %v751_v38 = vpop.f32.mrb[10].mxu0  ;;  %v788_v21 = vpop.f32.mrb[8].mxu1  ;;  %v7544_v13 = vadd.f32 %v749_v40, %v184_v25  ;;  %v200_v40 = vrot.slane %v142_v15, %v167_v62  ;;  %v10289_v62 = vsub.s32 7, %v7500_v5 }
 0x154   :  { %v752_v0 = vpop.f32.mrb[11].mxu0  ;;  %10282 = vst [vmem:[#allocation57_spill] sm:$0xff] %v7542_v60  ;;  %v7546_v12 = vadd.f32 %v788_v21, %v188_v23  ;;  %v790_v54 = vpop.f32.mrb[9].mxu1  ;;  %v6149_v35 = vmul.f32 -1.442695, %v7542_v60 }
 0x155   :  { %10283 = vst [vmem:[#allocation58_spill] sm:$0xff] %v7544_v13  ;;  %v792_v8 = vpop.f32.mrb[10].mxu1  ;;  %v6872_v38 = vpop.eup %6871  ;;  %v6150_v28 = vmul.f32 -1.442695, %v7544_v13  ;;  %v7550_v3 = vadd.f32 %v790_v54, %v192_v37  ;;  %v204_v54 = vrot.slane %v142_v15, %v10288_v6  ;;  %v1233_v13 = vld [vmem:[#allocation7 + $0x900] sm:$0xff] }
 0x156   :  { %10284 = vst [vmem:[#allocation59_spill] sm:$0xff] %v7546_v12  ;;  %v793_v20 = vpop.f32.mrb[11].mxu1  ;;  %v6874_v0 = vpop.eup %6873  ;;  %v901_v29 = vadd.f32 1.0, %v6872_v38  ;;  %6877 = vpow2.f32 %v6149_v35 }
 0x157   :  { %10285 = vst [vmem:[#allocation60_spill] sm:$0xff] %v7550_v3  ;;  %v902_v48 = vadd.f32 1.0, %v6874_v0  ;;  %6879 = vpow2.f32 %v6150_v28  ;;  %v6152_v21 = vmul.f32 -1.442695, %v7550_v3  ;;  %v6876_v23 = vpop.eup %6875  ;;  %v208_v28 = vrot.slane %v142_v15, %v10289_v62 }
 0x158   :  { %6881 = vrcp.f32 %v901_v29  ;;  %v904_v38 = vadd.f32 1.0, %v6876_v23 }
 0x159   :  { %6883 = vrcp.f32 %v902_v48 }
 0x15a   :  { %6885 = vpow2.f32 %v6152_v21 }
 0x160   :  { %v6878_v29 = vpop.eup %6877 }
 0x161   :  { %v829_v45 = vpop.f32.mrb[12].mxu0  ;;  %v6880_v21 = vpop.eup %6879 }
 0x162   :  { %v7553_v8 = vadd.f32 %v829_v45, %v196_v52  ;;  %v831_v25 = vpop.f32.mrb[13].mxu0  ;;  %v906_v15 = vadd.f32 1.0, %v6880_v21 }
 0x163   :  { %v7555_v36 = vadd.f32 %v831_v25, %v200_v40  ;;  %v833_v20 = vpop.f32.mrb[14].mxu0  ;;  %v870_v35 = vpop.f32.mrb[12].mxu1 }
 0x164   :  { %10286 = vst [vmem:[#allocation61_spill] sm:$0xff] %v7553_v8  ;;  %v834_v37 = vpop.f32.mrb[15].mxu0  ;;  %6887 = vtanh.f32 %v7553_v8  ;;  %v7563_v0 = vadd.f32 %v870_v35, %v204_v54  ;;  %v872_v48 = vpop.f32.mrb[13].mxu1  ;;  %v905_v20 = vadd.f32 1.0, %v6878_v29 }
 0x165   :  { %10287 = vst [vmem:[#allocation62_spill] sm:$0xff] %v7555_v36  ;;  %6889 = vtanh.f32 %v7555_v36  ;;  %v7565_v52 = vadd.f32 %v872_v48, %v208_v28  ;;  %v874_v40 = vpop.f32.mrb[14].mxu1  ;;  %v6882_v25 = vpop.eup %6881 }
 0x166   :  { %10290 = vst [vmem:[#allocation63_spill] sm:$0xff] %v7563_v0  ;;  %6891 = vrcp.f32 %v904_v38  ;;  %v875_v45 = vpop.f32.mrb[15].mxu1  ;;  %v6884_v37 = vpop.eup %6883 }
 0x167   :  { %10291 = vst [vmem:[#allocation64_spill] sm:$0xff] %v7565_v52  ;;  %6893 = vtanh.f32 %v7565_v52  ;;  %v6886_v6 = vpop.eup %6885  ;;  %v1226_v52 = vld [vmem:[#allocation7 + $0x8c8] sm:$0xff] }
 0x168   :  { %6895 = vrcp.f32 %v905_v20  ;;  %v908_v28 = vadd.f32 1.0, %v6886_v6  ;;  %v10292_v6 = vsub.s32 2, %v7500_v5 }
 0x169   :  { %6897 = vrcp.f32 %v906_v15  ;;  %v1217_v15 = vld [vmem:[#allocation7 + $0x880] sm:$0xff] }
 0x16e   :  { %v6888_v62 = vpop.eup %6887 }
 0x16f   :  { %v6890_v23 = vpop.eup %6889  ;;  %v7568_v54 = vmul.f32 %v6888_v62, %v6882_v25  ;;  %v1225_v62 = vld [vmem:[#allocation7 + $0x8c0] sm:$0xff] }
 0x170   :  { %v7570_v35 = vmul.f32 %v6890_v23, %v6884_v37  ;;  %v6892_v38 = vpop.eup %6891  ;;  %v1218_v23 = vld [vmem:[#allocation7 + $0x888] sm:$0xff]  ;;  %v7584_v8 = vcombine.high %v1217_v15, %v1225_v62  ;;  %v7592_v5 = vcombine.low %v1217_v15, %v1225_v62  ;;  %v1249_v15 = vld [vmem:[#allocation7 + $0x980] sm:$0xff] }
 0x171   :  { %6899 = vtanh.f32 %v7568_v54  ;;  %v6894_v48 = vpop.eup %6893  ;;  %v7586_v3 = vcombine.high %v1218_v23, %v1226_v52 }
 0x172   :  { %6901 = vtanh.f32 %v7570_v35  ;;  %v7574_v29 = vmul.f32 %v6894_v48, %v6892_v38  ;;  %v6896_v40 = vpop.eup %6895  ;;  %10293 = vst [vmem:[#allocation65_spill] sm:$0xff] %v7584_v8  ;;  %10295 = vst [vmem:[#allocation67_spill] sm:$0xff] %v7592_v5 }
 0x173   :  { %6903 = vrcp.f32 %v908_v28  ;;  %v6898_v21 = vpop.eup %6897  ;;  %v156_v28 = vrot.slane %v7504_v19, %v10292_v6  ;;  %10294 = vst [vmem:[#allocation66_spill] sm:$0xff] %v7586_v3 }
 0x174   :  { %6905 = vtanh.f32 %v7574_v29 }
 0x175   :  { %v7595_v19 = vadd.f32 %v7498_v24, %v156_v28  ;;  %v1257_v24 = vld [vmem:[#allocation7 + $0x9c0] sm:$0xff]  ;;  %v1250_v28 = vld [vmem:[#allocation7 + $0x988] sm:$0xff] }
 0x177   :  { %10296 = vst [vmem:[#allocation68_spill] sm:$0xff] %v7595_v19 }
 0x17b   :  { %v6900_v45 = vpop.eup %6899 }
 0x17c   :  { %v6902_v25 = vpop.eup %6901  ;;  %v937_v20 = vmul.f32 %v6900_v45, %v6896_v40  ;;  %v1241_v40 = vld [vmem:[#allocation7 + $0x940] sm:$0xff]  ;;  %v1242_v45 = vld [vmem:[#allocation7 + $0x948] sm:$0xff] }
 0x17d   :  { %v938_v37 = vmul.f32 %v6902_v25, %v6898_v21  ;;  %v6904_v38 = vpop.eup %6903  ;;  %v1234_v21 = vld [vmem:[#allocation7 + $0x908] sm:$0xff]  ;;  %v7603_v6 = vcombine.high %v1233_v13, %v1241_v40 }
 0x17e   :  { %v7582_v48 = vpack.c.bf16 %v937_v20, %v937_v20  ;;  %v6906_v25 = vpop.eup %6905  ;;  %v7605_v60 = vcombine.high %v1234_v21, %v1242_v45 }
 0x17f   :  { %v7577_v36 = vpack.c.bf16 %v938_v37, %v938_v37  ;;  %v940_v20 = vmul.f32 %v6906_v25, %v6904_v38  ;;  %v7599_v37 = vcombine.low %v1218_v23, %v1226_v52  ;;  %10298 = vst [vmem:[#allocation70_spill] sm:$0xff] %v7603_v6  ;;  %v1258_v38 = vld [vmem:[#allocation7 + $0x9c8] sm:$0xff]  ;;  %v6147_v25 = vmul.f32 -1.442695, %v7595_v19 }
 0x180   :  { %10299 = vst [vmem:[#allocation71_spill] sm:$0xff] %v7605_v60  ;;  %v7612_v52 = vcombine.low %v1233_v13, %v1241_v40  ;;  %v7614_v23 = vcombine.low %v1234_v21, %v1242_v45  ;;  %v1274_v19 = vld [vmem:[#allocation7 + $0xa48] sm:$0xff]  ;;  %v7626_v13 = vcombine.low %v1249_v15, %v1257_v24  ;;  %v7628_v40 = vcombine.low %v1250_v28, %v1258_v38 }
 0x181   :  { %4049 = vmatprep.mubr.bf16.mxu0 %v7577_v36  ;;  %4131 = vmatprep.mubr.bf16.mxu1 %v7577_v36  ;;  %10297 = vst [vmem:[#allocation69_spill] sm:$0xff] %v7599_v37  ;;  %v7607_v62 = vpack.c.bf16 %v940_v20, %v940_v20  ;;  %v7620_v20 = vcombine.high %v1250_v28, %v1258_v38  ;;  %6907 = vpow2.f32 %v6147_v25  ;;  %v1290_v25 = vld [vmem:[#allocation7 + $0xac8] sm:$0xff] }
 0x182   :  { %4050 = vmatmul.mubr.bf16.vlgmr.msra.gmra.mrb[16].mxu0 %v7582_v48  ;;  %4132 = vmatmul.mubr.bf16.vlgmr.msra.gmra.mrb[16].mxu1 %v7582_v48  ;;  %10300 = vst [vmem:[#allocation72_spill] sm:$0xff] %v7612_v52  ;;  %10301 = vst [vmem:[#allocation73_spill] sm:$0xff] %v7614_v23 }
 0x183   :  { %4059 = vmatpush1.bf16.msra.mxu0 %v7490_v53  ;;  %4141 = vmatpush1.bf16.msra.mxu1 %v7493_v44  ;;  %10303 = vst [vmem:[#allocation75_spill] sm:$0xff] %v7620_v20  ;;  %v1273_v44 = vld [vmem:[#allocation7 + $0xa40] sm:$0xff]  ;;  %v1266_v53 = vld [vmem:[#allocation7 + $0xa08] sm:$0xff]  ;;  %10304 = vst [vmem:[#allocation76_spill] sm:$0xff] %v7626_v13 }
 0x184   :  { %4060 = vmatprep.subr.bf16.mxu0 %v7584_v8  ;;  %4142 = vmatprep.subr.bf16.mxu1 %v7586_v3  ;;  %v7618_v3 = vcombine.high %v1249_v15, %v1257_v24  ;;  %v1265_v8 = vld [vmem:[#allocation7 + $0xa00] sm:$0xff]  ;;  %10305 = vst [vmem:[#allocation77_spill] sm:$0xff] %v7628_v40  ;;  %v7634_v45 = vcombine.high %v1266_v53, %v1274_v19 }
 0x185   :  { %4090 = vmatprep.mubr.bf16.mxu0 %v7607_v62  ;;  %4172 = vmatprep.mubr.bf16.mxu1 %v7607_v62  ;;  %v7632_v21 = vcombine.high %v1265_v8, %v1273_v44  ;;  %v7638_v15 = vcombine.low %v1265_v8, %v1273_v44  ;;  %v7640_v24 = vcombine.low %v1266_v53, %v1274_v19 }
 0x186   :  { %10302 = vst [vmem:[#allocation74_spill] sm:$0xff] %v7618_v3  ;;  %10307 = vst [vmem:[#allocation79_spill] sm:$0xff] %v7634_v45 }
 0x187   :  { %4061 = vmatpush1.bf16.msra.mxu0 %v7592_v5  ;;  %4143 = vmatpush1.bf16.msra.mxu1 %v7599_v37  ;;  %10306 = vst [vmem:[#allocation78_spill] sm:$0xff] %v7632_v21  ;;  %v1282_v37 = vld [vmem:[#allocation7 + $0xa88] sm:$0xff]  ;;  %10308 = vst [vmem:[#allocation80_spill] sm:$0xff] %v7638_v15 }
 0x188   :  { %4062 = vmatprep.subr.bf16.mxu0 %v7603_v6  ;;  %4144 = vmatprep.subr.bf16.mxu1 %v7605_v60  ;;  %v1281_v60 = vld [vmem:[#allocation7 + $0xa80] sm:$0xff]  ;;  %10309 = vst [vmem:[#allocation81_spill] sm:$0xff] %v7640_v24  ;;  %v7646_v38 = vcombine.high %v1282_v37, %v1290_v25  ;;  %v7652_v53 = vcombine.low %v1282_v37, %v1290_v25  ;;  %v1322_v5 = vld [vmem:[#allocation7 + $0xbc8] sm:$0xff] }
 0x189   :  { %v1289_v6 = vld [vmem:[#allocation7 + $0xac0] sm:$0xff] }
 0x18a   :  { %v7644_v28 = vcombine.high %v1281_v60, %v1289_v6  ;;  %10311 = vst [vmem:[#allocation83_spill] sm:$0xff] %v7646_v38  ;;  %v7650_v44 = vcombine.low %v1281_v60, %v1289_v6  ;;  %10313 = vst [vmem:[#allocation85_spill] sm:$0xff] %v7652_v53 }
 0x18b   :  { %4063 = vmatpush1.bf16.msra.mxu0 %v7612_v52  ;;  %4145 = vmatpush1.bf16.msra.mxu1 %v7614_v23  ;;  %v1298_v23 = vld [vmem:[#allocation7 + $0xb08] sm:$0xff] }
 0x18c   :  { %4064 = vmatprep.subr.bf16.mxu0 %v7618_v3  ;;  %4146 = vmatprep.subr.bf16.mxu1 %v7620_v20  ;;  %10310 = vst [vmem:[#allocation82_spill] sm:$0xff] %v7644_v28  ;;  %v1297_v20 = vld [vmem:[#allocation7 + $0xb00] sm:$0xff]  ;;  %v1306_v52 = vld [vmem:[#allocation7 + $0xb48] sm:$0xff]  ;;  %10312 = vst [vmem:[#allocation84_spill] sm:$0xff] %v7650_v44 }
 0x18d   :  { %v1305_v3 = vld [vmem:[#allocation7 + $0xb40] sm:$0xff]  ;;  %v7658_v19 = vcombine.high %v1298_v23, %v1306_v52  ;;  %v7664_v37 = vcombine.low %v1298_v23, %v1306_v52 }
 0x18e   :  { %v7656_v8 = vcombine.high %v1297_v20, %v1305_v3  ;;  %v7662_v60 = vcombine.low %v1297_v20, %v1305_v3 }
 0x18f   :  { %4065 = vmatpush1.bf16.msra.mxu0 %v7626_v13  ;;  %4147 = vmatpush1.bf16.msra.mxu1 %v7628_v40  ;;  %10315 = vst [vmem:[#allocation87_spill] sm:$0xff] %v7658_v19  ;;  %v1321_v40 = vld [vmem:[#allocation7 + $0xbc0] sm:$0xff]  ;;  %v1314_v13 = vld [vmem:[#allocation7 + $0xb88] sm:$0xff]  ;;  %10317 = vst [vmem:[#allocation89_spill] sm:$0xff] %v7664_v37 }
 0x190   :  { %4066 = vmatprep.subr.bf16.mxu0 %v7632_v21  ;;  %4148 = vmatprep.subr.bf16.mxu1 %v7634_v45  ;;  %10314 = vst [vmem:[#allocation86_spill] sm:$0xff] %v7656_v8  ;;  %v1313_v45 = vld [vmem:[#allocation7 + $0xb80] sm:$0xff]  ;;  %v6908_v21 = vpop.eup %6907  ;;  %10316 = vst [vmem:[#allocation88_spill] sm:$0xff] %v7662_v60  ;;  %v7677_v52 = vcombine.low %v1314_v13, %v1322_v5 }
 0x191   :  { %v903_v6 = vadd.f32 1.0, %v6908_v21  ;;  %v7668_v25 = vcombine.high %v1313_v45, %v1321_v40  ;;  %v7675_v3 = vcombine.low %v1313_v45, %v1321_v40  ;;  %v1345_v21 = vld [vmem:[#allocation7 + $0xc80] sm:$0xff] }
 0x192   :  { %10321 = vst [vmem:[#allocation93_spill] sm:$0xff] %v7677_v52 }
 0x193   :  { %4067 = vmatpush1.bf16.msra.mxu0 %v7638_v15  ;;  %4149 = vmatpush1.bf16.msra.mxu1 %v7640_v24  ;;  %10318 = vst [vmem:[#allocation90_spill] sm:$0xff] %v7668_v25  ;;  %v6151_v24 = vmul.f32 -1.442695, %v7546_v12  ;;  %v1337_v15 = vld [vmem:[#allocation7 + $0xc40] sm:$0xff]  ;;  %10320 = vst [vmem:[#allocation92_spill] sm:$0xff] %v7675_v3  ;;  %6909 = vrcp.f32 %v903_v6 }
 0x194   :  { %4068 = vmatprep.subr.bf16.mxu0 %v7644_v28  ;;  %4150 = vmatprep.subr.bf16.mxu1 %v7646_v38  ;;  %v7670_v38 = vcombine.high %v1314_v13, %v1322_v5  ;;  %v1329_v28 = vld [vmem:[#allocation7 + $0xc00] sm:$0xff] }
 0x195   :  { %v7681_v23 = vcombine.high %v1329_v28, %v1337_v15  ;;  %6911 = vpow2.f32 %v6151_v24  ;;  %v7688_v5 = vcombine.low %v1329_v28, %v1337_v15  ;;  %v1361_v24 = vld [vmem:[#allocation7 + $0xd00] sm:$0xff] }
 0x196   :  { %10319 = vst [vmem:[#allocation91_spill] sm:$0xff] %v7670_v38  ;;  %6913 = vtanh.f32 %v7563_v0  ;;  %v1369_v6 = vld [vmem:[#allocation7 + $0xd40] sm:$0xff]  ;;  %v1402_v0 = vld [vmem:[#allocation7 + $0xe48] sm:$0xff] }
 0x197   :  { %4069 = vmatpush1.bf16.msra.mxu0 %v7650_v44  ;;  %4151 = vmatpush1.bf16.msra.mxu1 %v7652_v53  ;;  %v1330_v44 = vld [vmem:[#allocation7 + $0xc08] sm:$0xff]  ;;  %10322 = vst [vmem:[#allocation94_spill] sm:$0xff] %v7681_v23  ;;  %10324 = vst [vmem:[#allocation96_spill] sm:$0xff] %v7688_v5  ;;  %v7706_v28 = vcombine.high %v1361_v24, %v1369_v6 }
 0x198   :  { %4070 = vmatprep.subr.bf16.mxu0 %v7656_v8  ;;  %4152 = vmatprep.subr.bf16.mxu1 %v7658_v19  ;;  %v7683_v20 = vcombine.high %v1330_v44, %v1338_v2  ;;  %v1353_v19 = vld [vmem:[#allocation7 + $0xcc0] sm:$0xff]  ;;  %v1346_v8 = vld [vmem:[#allocation7 + $0xc88] sm:$0xff]  ;;  %v7690_v13 = vcombine.low %v1330_v44, %v1338_v2 }
 0x199   :  { %v7694_v40 = vcombine.high %v1345_v21, %v1353_v19  ;;  %v7700_v15 = vcombine.low %v1345_v21, %v1353_v19  ;;  %10330 = vst [vmem:[#allocation102_spill] sm:$0xff] %v7706_v28  ;;  %v1394_v53 = vld [vmem:[#allocation7 + $0xe08] sm:$0xff] }
 0x19a   :  { %10323 = vst [vmem:[#allocation95_spill] sm:$0xff] %v7683_v20  ;;  %10325 = vst [vmem:[#allocation97_spill] sm:$0xff] %v7690_v13 }
 0x19b   :  { %4071 = vmatpush1.bf16.msra.mxu0 %v7662_v60  ;;  %4153 = vmatpush1.bf16.msra.mxu1 %v7664_v37  ;;  %v1354_v60 = vld [vmem:[#allocation7 + $0xcc8] sm:$0xff]  ;;  %10326 = vst [vmem:[#allocation98_spill] sm:$0xff] %v7694_v40  ;;  %10328 = vst [vmem:[#allocation100_spill] sm:$0xff] %v7700_v15 }
 0x19c   :  { %4072 = vmatprep.subr.bf16.mxu0 %v7668_v25  ;;  %4154 = vmatprep.subr.bf16.mxu1 %v7670_v38  ;;  %v7696_v45 = vcombine.high %v1346_v8, %v1354_v60  ;;  %v1362_v38 = vld [vmem:[#allocation7 + $0xd08] sm:$0xff]  ;;  %v7702_v2 = vcombine.low %v1346_v8, %v1354_v60  ;;  %v7712_v8 = vcombine.low %v1361_v24, %v1369_v6 }
 0x19d   :  { %v1370_v25 = vld [vmem:[#allocation7 + $0xd48] sm:$0xff]  ;;  %v6910_v37 = vpop.eup %6909  ;;  %v7734_v6 = vcombine.high %v1394_v53, %v1402_v0 }
 0x19e   :  { %10327 = vst [vmem:[#allocation99_spill] sm:$0xff] %v7696_v45  ;;  %10329 = vst [vmem:[#allocation101_spill] sm:$0xff] %v7702_v2  ;;  %v7708_v44 = vcombine.high %v1362_v38, %v1370_v25  ;;  %v7714_v19 = vcombine.low %v1362_v38, %v1370_v25 }
 0x19f   :  { %4073 = vmatpush1.bf16.msra.mxu0 %v7675_v3  ;;  %4155 = vmatpush1.bf16.msra.mxu1 %v7677_v52  ;;  %v1378_v52 = vld [vmem:[#allocation7 + $0xd88] sm:$0xff]  ;;  %10332 = vst [vmem:[#allocation104_spill] sm:$0xff] %v7712_v8  ;;  %10339 = vst [vmem:[#allocation111_spill] sm:$0xff] %v7734_v6 }
 0x1a0   :  { %4074 = vmatprep.subr.bf16.mxu0 %v7681_v23  ;;  %4156 = vmatprep.subr.bf16.mxu1 %v7683_v20  ;;  %10331 = vst [vmem:[#allocation103_spill] sm:$0xff] %v7708_v44  ;;  %v1377_v20 = vld [vmem:[#allocation7 + $0xd80] sm:$0xff]  ;;  %v1386_v3 = vld [vmem:[#allocation7 + $0xdc8] sm:$0xff]  ;;  %10333 = vst [vmem:[#allocation105_spill] sm:$0xff] %v7714_v19 }
 0x1a1   :  { %v1385_v23 = vld [vmem:[#allocation7 + $0xdc0] sm:$0xff]  ;;  %v7728_v25 = vcombine.low %v1378_v52, %v1386_v3 }
 0x1a2   :  { %v7718_v21 = vcombine.high %v1377_v20, %v1385_v23  ;;  %v7726_v38 = vcombine.low %v1377_v20, %v1385_v23 }
 0x1a3   :  { %4075 = vmatpush1.bf16.msra.mxu0 %v7688_v5  ;;  %4157 = vmatpush1.bf16.msra.mxu1 %v7690_v13  ;;  %v6912_v5 = vpop.eup %6911  ;;  %v1401_v13 = vld [vmem:[#allocation7 + $0xe40] sm:$0xff]  ;;  %10337 = vst [vmem:[#allocation109_spill] sm:$0xff] %v7728_v25 }
 0x1a4   :  { %4076 = vmatprep.subr.bf16.mxu0 %v7694_v40  ;;  %4158 = vmatprep.subr.bf16.mxu1 %v7696_v45  ;;  %v6914_v60 = vpop.eup %6913  ;;  %10334 = vst [vmem:[#allocation106_spill] sm:$0xff] %v7718_v21  ;;  %v7720_v45 = vcombine.high %v1378_v52, %v1386_v3  ;;  %v1393_v40 = vld [vmem:[#allocation7 + $0xe00] sm:$0xff]  ;;  %10336 = vst [vmem:[#allocation108_spill] sm:$0xff] %v7726_v38  ;;  %v7741_v52 = vcombine.low %v1394_v53, %v1402_v0 }
 0x1a5   :  { %v7722_v12 = vmul.f32 %v6914_v60, %v6910_v37  ;;  %v7732_v24 = vcombine.high %v1393_v40, %v1401_v13  ;;  %v1410_v37 = vld [vmem:[#allocation7 + $0xe88] sm:$0xff]  ;;  %v7739_v3 = vcombine.low %v1393_v40, %v1401_v13 }
 0x1a6   :  { %10335 = vst [vmem:[#allocation107_spill] sm:$0xff] %v7720_v45  ;;  %v1418_v60 = vld [vmem:[#allocation7 + $0xec8] sm:$0xff]  ;;  %10341 = vst [vmem:[#allocation113_spill] sm:$0xff] %v7741_v52 }
 0x1a7   :  { %4077 = vmatpush1.bf16.msra.mxu0 %v7700_v15  ;;  %4159 = vmatpush1.bf16.msra.mxu1 %v7702_v2  ;;  %v907_v15 = vadd.f32 1.0, %v6912_v5  ;;  %10338 = vst [vmem:[#allocation110_spill] sm:$0xff] %v7732_v24  ;;  %v1417_v5 = vld [vmem:[#allocation7 + $0xec0] sm:$0xff]  ;;  %10340 = vst [vmem:[#allocation112_spill] sm:$0xff] %v7739_v3  ;;  %v7747_v20 = vcombine.high %v1410_v37, %v1418_v60  ;;  %v7753_v0 = vcombine.low %v1410_v37, %v1418_v60  ;;  %v972_v2 = vld [vmem:[#allocation7 + $0xd8] sm:$0xff] }
 0x1a8   :  { %4078 = vmatprep.subr.bf16.mxu0 %v7706_v28  ;;  %4160 = vmatprep.subr.bf16.mxu1 %v7708_v44  ;;  %v1409_v44 = vld [vmem:[#allocation7 + $0xe80] sm:$0xff]  ;;  %v964_v28 = vld [vmem:[#allocation7 + $0x98] sm:$0xff] }
 0x1a9   :  { %6915 = vrcp.f32 %v907_v15  ;;  %v7745_v23 = vcombine.high %v1409_v44, %v1417_v5  ;;  %10343 = vst [vmem:[#allocation115_spill] sm:$0xff] %v7747_v20  ;;  %v1433_v15 = vld [vmem:[#allocation7 + $0xf40] sm:$0xff]  ;;  %v7751_v13 = vcombine.low %v1409_v44, %v1417_v5  ;;  %10345 = vst [vmem:[#allocation117_spill] sm:$0xff] %v7753_v0 }
 0x1aa   :  { %6917 = vtanh.f32 %v7722_v12 }
 0x1ab   :  { %4079 = vmatpush1.bf16.msra.mxu0 %v7712_v8  ;;  %4161 = vmatpush1.bf16.msra.mxu1 %v7714_v19  ;;  %10342 = vst [vmem:[#allocation114_spill] sm:$0xff] %v7745_v23  ;;  %v1434_v19 = vld [vmem:[#allocation7 + $0xf48] sm:$0xff]  ;;  %10344 = vst [vmem:[#allocation116_spill] sm:$0xff] %v7751_v13  ;;  %v948_v8 = vld [vmem:[#allocation7 + $0x18] sm:$0xff] }
 0x1ac   :  { %4080 = vmatprep.subr.bf16.mxu0 %v7718_v21  ;;  %4162 = vmatprep.subr.bf16.mxu1 %v7720_v45  ;;  %v1425_v45 = vld [vmem:[#allocation7 + $0xf00] sm:$0xff]  ;;  %v1426_v21 = vld [vmem:[#allocation7 + $0xf08] sm:$0xff] }
 0x1ad   :  { %v7757_v53 = vcombine.high %v1425_v45, %v1433_v15  ;;  %v7759_v40 = vcombine.high %v1426_v21, %v1434_v19  ;;  %v7763_v44 = vcombine.low %v1425_v45, %v1433_v15  ;;  %v7765_v5 = vcombine.low %v1426_v21, %v1434_v19 }
 0x1af   :  { %4081 = vmatpush1.bf16.msra.mxu0 %v7726_v38  ;;  %4163 = vmatpush1.bf16.msra.mxu1 %v7728_v25  ;;  %10346 = vst [vmem:[#allocation118_spill] sm:$0xff] %v7757_v53  ;;  %10347 = vst [vmem:[#allocation119_spill] sm:$0xff] %v7759_v40  ;;  %v1442_v25 = vld [vmem:[#allocation7 + $0xf88] sm:$0xff] }
 0x1b0   :  { %4082 = vmatprep.subr.bf16.mxu0 %v7732_v24  ;;  %4164 = vmatprep.subr.bf16.mxu1 %v7734_v6  ;;  %v1441_v6 = vld [vmem:[#allocation7 + $0xf80] sm:$0xff]  ;;  %v1450_v38 = vld [vmem:[#allocation7 + $0xfc8] sm:$0xff]  ;;  %10348 = vst [vmem:[#allocation120_spill] sm:$0xff] %v7763_v44  ;;  %10349 = vst [vmem:[#allocation121_spill] sm:$0xff] %v7765_v5 }
 0x1b1   :  { %v1449_v24 = vld [vmem:[#allocation7 + $0xfc0] sm:$0xff]  ;;  %v7777_v19 = vcombine.low %v1442_v25, %v1450_v38 }
 0x1b2   :  { %v7769_v60 = vcombine.high %v1441_v6, %v1449_v24  ;;  %v7775_v45 = vcombine.low %v1441_v6, %v1449_v24 }
 0x1b3   :  { %4083 = vmatpush1.bf16.msra.mxu0 %v7739_v3  ;;  %4165 = vmatpush1.bf16.msra.mxu1 %v7741_v52  ;;  %v6916_v37 = vpop.eup %6915  ;;  %v955_v3 = vld [vmem:[#allocation7 + $0x50] sm:$0xff]  ;;  %10353 = vst [vmem:[#allocation125_spill] sm:$0xff] %v7777_v19 }
 0x1b4   :  { %4084 = vmatprep.subr.bf16.mxu0 %v7745_v23  ;;  %4166 = vmatprep.subr.bf16.mxu1 %v7747_v20  ;;  %10350 = vst [vmem:[#allocation122_spill] sm:$0xff] %v7769_v60  ;;  %v7771_v20 = vcombine.high %v1442_v25, %v1450_v38  ;;  %v947_v23 = vld [vmem:[#allocation7 + $0x10] sm:$0xff]  ;;  %v6918_v52 = vpop.eup %6917  ;;  %10352 = vst [vmem:[#allocation124_spill] sm:$0xff] %v7775_v45 }
 0x1b5   :  { %v939_v21 = vmul.f32 %v6918_v52, %v6916_v37  ;;  %v7781_v15 = vcombine.high %v947_v23, %v955_v3  ;;  %v7787_v24 = vcombine.low %v947_v23, %v955_v3  ;;  %v7797_v52 = vcombine.high %v964_v28, %v972_v2  ;;  %v979_v37 = vld [vmem:[#allocation7 + $0x110] sm:$0xff]  ;;  %v980_v3 = vld [vmem:[#allocation7 + $0x118] sm:$0xff] }
 0x1b6   :  { %10351 = vst [vmem:[#allocation123_spill] sm:$0xff] %v7771_v20  ;;  %v988_v23 = vld [vmem:[#allocation7 + $0x158] sm:$0xff] }
 0x1b7   :  { %4085 = vmatpush1.bf16.msra.mxu0 %v7751_v13  ;;  %4167 = vmatpush1.bf16.msra.mxu1 %v7753_v0  ;;  %v956_v13 = vld [vmem:[#allocation7 + $0x58] sm:$0xff]  ;;  %10354 = vst [vmem:[#allocation126_spill] sm:$0xff] %v7781_v15  ;;  %v971_v0 = vld [vmem:[#allocation7 + $0xd0] sm:$0xff]  ;;  %10356 = vst [vmem:[#allocation128_spill] sm:$0xff] %v7787_v24  ;;  %v7789_v38 = vpack.c.bf16 %v939_v21, %v939_v21 }
 0x1b8   :  { %4086 = vmatprep.subr.bf16.mxu0 %v7757_v53  ;;  %4168 = vmatprep.subr.bf16.mxu1 %v7759_v40  ;;  %v7783_v40 = vcombine.high %v948_v8, %v956_v13  ;;  %v963_v53 = vld [vmem:[#allocation7 + $0x90] sm:$0xff]  ;;  %v7792_v25 = vcombine.low %v948_v8, %v956_v13  ;;  %10359 = vst [vmem:[#allocation131_spill] sm:$0xff] %v7797_v52 }
 0x1b9   :  { %v7795_v6 = vcombine.high %v963_v53, %v971_v0  ;;  %v7803_v8 = vcombine.low %v963_v53, %v971_v0  ;;  %v7807_v13 = vcombine.low %v964_v28, %v972_v2  ;;  %v7820_v2 = vcombine.low %v980_v3, %v988_v23 }
 0x1ba   :  { %10355 = vst [vmem:[#allocation127_spill] sm:$0xff] %v7783_v40  ;;  %10357 = vst [vmem:[#allocation129_spill] sm:$0xff] %v7792_v25 }
 0x1bb   :  { %4087 = vmatpush1.bf16.msra.mxu0 %v7763_v44  ;;  %4169 = vmatpush1.bf16.msra.mxu1 %v7765_v5  ;;  %10358 = vst [vmem:[#allocation130_spill] sm:$0xff] %v7795_v6  ;;  %10360 = vst [vmem:[#allocation132_spill] sm:$0xff] %v7803_v8 }
 0x1bc   :  { %4088 = vmatprep.subr.bf16.mxu0 %v7769_v60  ;;  %4170 = vmatprep.subr.bf16.mxu1 %v7771_v20  ;;  %v987_v20 = vld [vmem:[#allocation7 + $0x150] sm:$0xff]  ;;  %10361 = vst [vmem:[#allocation133_spill] sm:$0xff] %v7807_v13  ;;  %10365 = vst [vmem:[#allocation137_spill] sm:$0xff] %v7820_v2  ;;  %v1020_v60 = vld [vmem:[#allocation7 + $0x258] sm:$0xff] }
 0x1bd   :  { %v7809_v21 = vcombine.high %v979_v37, %v987_v20  ;;  %v7816_v0 = vcombine.low %v979_v37, %v987_v20 }
 0x1bf   :  { %4089 = vmatpush1.bf16.msra.mxu0 %v7775_v45  ;;  %4171 = vmatpush1.bf16.msra.mxu1 %v7777_v19  ;;  %10362 = vst [vmem:[#allocation134_spill] sm:$0xff] %v7809_v21  ;;  %v996_v19 = vld [vmem:[#allocation7 + $0x198] sm:$0xff]  ;;  %10364 = vst [vmem:[#allocation136_spill] sm:$0xff] %v7816_v0 }
 0x1c0   :  { %4181 = vmatprep.subr.bf16.mxu0 %v7781_v15  ;;  %4263 = vmatprep.subr.bf16.mxu1 %v7783_v40  ;;  %v7813_v40 = vcombine.high %v980_v3, %v988_v23  ;;  %v995_v15 = vld [vmem:[#allocation7 + $0x190] sm:$0xff]  ;;  %v1004_v45 = vld [vmem:[#allocation7 + $0x1d8] sm:$0xff] }
 0x1c1   :  { %v7825_v53 = vcombine.high %v996_v19, %v1004_v45  ;;  %v7832_v37 = vcombine.low %v996_v19, %v1004_v45 }
 0x1c2   :  { %4091 = vmatmul.mubr.bf16.vlgmr.msra.gmra.mrb[16].mxu0 %v7789_v38  ;;  %4173 = vmatmul.mubr.bf16.vlgmr.msra.gmra.mrb[16].mxu1 %v7789_v38  ;;  %10363 = vst [vmem:[#allocation135_spill] sm:$0xff] %v7813_v40 }
 0x1c3   :  { %4182 = vmatpush1.bf16.msra.mxu0 %v7787_v24  ;;  %4213 = vmatprep.mubr.bf16.mxu0 %v7577_v36  ;;  %v1003_v24 = vld [vmem:[#allocation7 + $0x1d0] sm:$0xff]  ;;  %10367 = vst [vmem:[#allocation139_spill] sm:$0xff] %v7825_v53  ;;  %10369 = vst [vmem:[#allocation141_spill] sm:$0xff] %v7832_v37 }
 0x1c4   :  { %4264 = vmatpush1.bf16.msra.mxu1 %v7792_v25  ;;  %4295 = vmatprep.mubr.bf16.mxu1 %v7577_v36  ;;  %v7822_v28 = vcombine.high %v995_v15, %v1003_v24  ;;  %v1012_v25 = vld [vmem:[#allocation7 + $0x218] sm:$0xff]  ;;  %v7828_v20 = vcombine.low %v995_v15, %v1003_v24 }
 0x1c5   :  { %4183 = vmatprep.subr.bf16.mxu0 %v7795_v6  ;;  %4265 = vmatprep.subr.bf16.mxu1 %v7797_v52  ;;  %v1011_v52 = vld [vmem:[#allocation7 + $0x210] sm:$0xff]  ;;  %v7837_v23 = vcombine.high %v1012_v25, %v1020_v60  ;;  %v7844_v45 = vcombine.low %v1012_v25, %v1020_v60 }
 0x1c6   :  { %10366 = vst [vmem:[#allocation138_spill] sm:$0xff] %v7822_v28  ;;  %v1019_v6 = vld [vmem:[#allocation7 + $0x250] sm:$0xff]  ;;  %10368 = vst [vmem:[#allocation140_spill] sm:$0xff] %v7828_v20 }
 0x1c7   :  { %4184 = vmatpush1.bf16.msra.mxu0 %v7803_v8  ;;  %v7834_v3 = vcombine.high %v1011_v52, %v1019_v6  ;;  %10371 = vst [vmem:[#allocation143_spill] sm:$0xff] %v7837_v23  ;;  %v1036_v8 = vld [vmem:[#allocation7 + $0x2d8] sm:$0xff]  ;;  %v7840_v15 = vcombine.low %v1011_v52, %v1019_v6  ;;  %10373 = vst [vmem:[#allocation145_spill] sm:$0xff] %v7844_v45 }
 0x1c8   :  { %4266 = vmatpush1.bf16.msra.mxu1 %v7807_v13  ;;  %4185 = vmatprep.subr.bf16.mxu0 %v7809_v21  ;;  %v1035_v21 = vld [vmem:[#allocation7 + $0x2d0] sm:$0xff]  ;;  %v1028_v13 = vld [vmem:[#allocation7 + $0x298] sm:$0xff] }
 0x1c9   :  { %4267 = vmatprep.subr.bf16.mxu1 %v7813_v40  ;;  %10370 = vst [vmem:[#allocation142_spill] sm:$0xff] %v7834_v3  ;;  %v1027_v40 = vld [vmem:[#allocation7 + $0x290] sm:$0xff]  ;;  %10372 = vst [vmem:[#allocation144_spill] sm:$0xff] %v7840_v15  ;;  %v7849_v24 = vcombine.high %v1028_v13, %v1036_v8  ;;  %v7856_v60 = vcombine.low %v1028_v13, %v1036_v8 }
 0x1ca   :  { %v7846_v19 = vcombine.high %v1027_v40, %v1035_v21  ;;  %v7852_v6 = vcombine.low %v1027_v40, %v1035_v21 }
 0x1cb   :  { %4186 = vmatpush1.bf16.msra.mxu0 %v7816_v0  ;;  %10375 = vst [vmem:[#allocation147_spill] sm:$0xff] %v7849_v24  ;;  %v1052_v0 = vld [vmem:[#allocation7 + $0x358] sm:$0xff]  ;;  %10377 = vst [vmem:[#allocation149_spill] sm:$0xff] %v7856_v60 }
 0x1cc   :  { %4268 = vmatpush1.bf16.msra.mxu1 %v7820_v2  ;;  %4187 = vmatprep.subr.bf16.mxu0 %v7822_v28  ;;  %10374 = vst [vmem:[#allocation146_spill] sm:$0xff] %v7846_v19  ;;  %v1051_v28 = vld [vmem:[#allocation7 + $0x350] sm:$0xff]  ;;  %v1044_v2 = vld [vmem:[#allocation7 + $0x318] sm:$0xff]  ;;  %10376 = vst [vmem:[#allocation148_spill] sm:$0xff] %v7852_v6 }
 0x1cd   :  { %4269 = vmatprep.subr.bf16.mxu1 %v7825_v53  ;;  %v1043_v53 = vld [vmem:[#allocation7 + $0x310] sm:$0xff]  ;;  %v7861_v52 = vcombine.high %v1044_v2, %v1052_v0  ;;  %v7868_v8 = vcombine.low %v1044_v2, %v1052_v0 }
 0x1ce   :  { %v7858_v25 = vcombine.high %v1043_v53, %v1051_v28  ;;  %v7864_v40 = vcombine.low %v1043_v53, %v1051_v28 }
 0x1cf   :  { %4188 = vmatpush1.bf16.msra.mxu0 %v7828_v20  ;;  %10379 = vst [vmem:[#allocation151_spill] sm:$0xff] %v7861_v52  ;;  %v1068_v20 = vld [vmem:[#allocation7 + $0x3d8] sm:$0xff]  ;;  %10381 = vst [vmem:[#allocation153_spill] sm:$0xff] %v7868_v8 }
 0x1d0   :  { %4270 = vmatpush1.bf16.msra.mxu1 %v7832_v37  ;;  %4189 = vmatprep.subr.bf16.mxu0 %v7834_v3  ;;  %10378 = vst [vmem:[#allocation150_spill] sm:$0xff] %v7858_v25  ;;  %v1067_v3 = vld [vmem:[#allocation7 + $0x3d0] sm:$0xff]  ;;  %v1060_v37 = vld [vmem:[#allocation7 + $0x398] sm:$0xff]  ;;  %10380 = vst [vmem:[#allocation152_spill] sm:$0xff] %v7864_v40 }
 0x1d1   :  { %4271 = vmatprep.subr.bf16.mxu1 %v7837_v23  ;;  %v1059_v23 = vld [vmem:[#allocation7 + $0x390] sm:$0xff]  ;;  %v7873_v21 = vcombine.high %v1060_v37, %v1068_v20  ;;  %v7880_v0 = vcombine.low %v1060_v37, %v1068_v20 }
 0x1d2   :  { %v7870_v13 = vcombine.high %v1059_v23, %v1067_v3  ;;  %v7876_v28 = vcombine.low %v1059_v23, %v1067_v3 }
 0x1d3   :  { %4190 = vmatpush1.bf16.msra.mxu0 %v7840_v15  ;;  %10383 = vst [vmem:[#allocation155_spill] sm:$0xff] %v7873_v21  ;;  %v1084_v15 = vld [vmem:[#allocation7 + $0x458] sm:$0xff]  ;;  %10385 = vst [vmem:[#allocation157_spill] sm:$0xff] %v7880_v0 }
 0x1d4   :  { %4272 = vmatpush1.bf16.msra.mxu1 %v7844_v45  ;;  %4191 = vmatprep.subr.bf16.mxu0 %v7846_v19  ;;  %10382 = vst [vmem:[#allocation154_spill] sm:$0xff] %v7870_v13  ;;  %v1083_v19 = vld [vmem:[#allocation7 + $0x450] sm:$0xff]  ;;  %v1076_v45 = vld [vmem:[#allocation7 + $0x418] sm:$0xff]  ;;  %10384 = vst [vmem:[#allocation156_spill] sm:$0xff] %v7876_v28 }
 0x1d5   :  { %4273 = vmatprep.subr.bf16.mxu1 %v7849_v24  ;;  %v1075_v24 = vld [vmem:[#allocation7 + $0x410] sm:$0xff]  ;;  %v7885_v53 = vcombine.high %v1076_v45, %v1084_v15  ;;  %v7892_v20 = vcombine.low %v1076_v45, %v1084_v15 }
 0x1d6   :  { %v7882_v2 = vcombine.high %v1075_v24, %v1083_v19  ;;  %v7888_v3 = vcombine.low %v1075_v24, %v1083_v19 }
 0x1d7   :  { %4192 = vmatpush1.bf16.msra.mxu0 %v7852_v6  ;;  %10387 = vst [vmem:[#allocation159_spill] sm:$0xff] %v7885_v53  ;;  %v1100_v6 = vld [vmem:[#allocation7 + $0x4d8] sm:$0xff]  ;;  %10389 = vst [vmem:[#allocation161_spill] sm:$0xff] %v7892_v20 }
 0x1d8   :  { %4274 = vmatpush1.bf16.msra.mxu1 %v7856_v60  ;;  %4193 = vmatprep.subr.bf16.mxu0 %v7858_v25  ;;  %10386 = vst [vmem:[#allocation158_spill] sm:$0xff] %v7882_v2  ;;  %v1099_v25 = vld [vmem:[#allocation7 + $0x4d0] sm:$0xff]  ;;  %v1092_v60 = vld [vmem:[#allocation7 + $0x498] sm:$0xff]  ;;  %10388 = vst [vmem:[#allocation160_spill] sm:$0xff] %v7888_v3 }
 0x1d9   :  { %4275 = vmatprep.subr.bf16.mxu1 %v7861_v52  ;;  %v1091_v52 = vld [vmem:[#allocation7 + $0x490] sm:$0xff]  ;;  %v7897_v23 = vcombine.high %v1092_v60, %v1100_v6  ;;  %v7904_v15 = vcombine.low %v1092_v60, %v1100_v6 }
 0x1da   :  { %v7894_v37 = vcombine.high %v1091_v52, %v1099_v25  ;;  %v7900_v19 = vcombine.low %v1091_v52, %v1099_v25 }
 0x1db   :  { %4194 = vmatpush1.bf16.msra.mxu0 %v7864_v40  ;;  %10391 = vst [vmem:[#allocation163_spill] sm:$0xff] %v7897_v23  ;;  %v1116_v40 = vld [vmem:[#allocation7 + $0x558] sm:$0xff]  ;;  %10393 = vst [vmem:[#allocation165_spill] sm:$0xff] %v7904_v15 }
 0x1dc   :  { %4276 = vmatpush1.bf16.msra.mxu1 %v7868_v8  ;;  %4195 = vmatprep.subr.bf16.mxu0 %v7870_v13  ;;  %10390 = vst [vmem:[#allocation162_spill] sm:$0xff] %v7894_v37  ;;  %v1115_v13 = vld [vmem:[#allocation7 + $0x550] sm:$0xff]  ;;  %v1108_v8 = vld [vmem:[#allocation7 + $0x518] sm:$0xff]  ;;  %10392 = vst [vmem:[#allocation164_spill] sm:$0xff] %v7900_v19 }
 0x1dd   :  { %4277 = vmatprep.subr.bf16.mxu1 %v7873_v21  ;;  %v1107_v21 = vld [vmem:[#allocation7 + $0x510] sm:$0xff]  ;;  %v7909_v24 = vcombine.high %v1108_v8, %v1116_v40  ;;  %v7916_v6 = vcombine.low %v1108_v8, %v1116_v40 }
 0x1de   :  { %v7906_v45 = vcombine.high %v1107_v21, %v1115_v13  ;;  %v7912_v25 = vcombine.low %v1107_v21, %v1115_v13 }
 0x1df   :  { %4196 = vmatpush1.bf16.msra.mxu0 %v7876_v28  ;;  %10395 = vst [vmem:[#allocation167_spill] sm:$0xff] %v7909_v24  ;;  %v1132_v28 = vld [vmem:[#allocation7 + $0x5d8] sm:$0xff]  ;;  %10397 = vst [vmem:[#allocation169_spill] sm:$0xff] %v7916_v6 }
 0x1e0   :  { %4278 = vmatpush1.bf16.msra.mxu1 %v7880_v0  ;;  %4197 = vmatprep.subr.bf16.mxu0 %v7882_v2  ;;  %10394 = vst [vmem:[#allocation166_spill] sm:$0xff] %v7906_v45  ;;  %v1131_v2 = vld [vmem:[#allocation7 + $0x5d0] sm:$0xff]  ;;  %v1124_v0 = vld [vmem:[#allocation7 + $0x598] sm:$0xff]  ;;  %10396 = vst [vmem:[#allocation168_spill] sm:$0xff] %v7912_v25 }
 0x1e1   :  { %4279 = vmatprep.subr.bf16.mxu1 %v7885_v53  ;;  %v1123_v53 = vld [vmem:[#allocation7 + $0x590] sm:$0xff]  ;;  %v7921_v52 = vcombine.high %v1124_v0, %v1132_v28  ;;  %v7928_v40 = vcombine.low %v1124_v0, %v1132_v28 }
 0x1e2   :  { %v7918_v60 = vcombine.high %v1123_v53, %v1131_v2  ;;  %v7924_v13 = vcombine.low %v1123_v53, %v1131_v2 }
 0x1e3   :  { %4198 = vmatpush1.bf16.msra.mxu0 %v7888_v3  ;;  %10399 = vst [vmem:[#allocation171_spill] sm:$0xff] %v7921_v52  ;;  %v1148_v3 = vld [vmem:[#allocation7 + $0x658] sm:$0xff]  ;;  %10401 = vst [vmem:[#allocation173_spill] sm:$0xff] %v7928_v40 }
 0x1e4   :  { %4280 = vmatpush1.bf16.msra.mxu1 %v7892_v20  ;;  %4199 = vmatprep.subr.bf16.mxu0 %v7894_v37  ;;  %10398 = vst [vmem:[#allocation170_spill] sm:$0xff] %v7918_v60  ;;  %v1147_v37 = vld [vmem:[#allocation7 + $0x650] sm:$0xff]  ;;  %v1140_v20 = vld [vmem:[#allocation7 + $0x618] sm:$0xff]  ;;  %10400 = vst [vmem:[#allocation172_spill] sm:$0xff] %v7924_v13 }
 0x1e5   :  { %4281 = vmatprep.subr.bf16.mxu1 %v7897_v23  ;;  %v1139_v23 = vld [vmem:[#allocation7 + $0x610] sm:$0xff]  ;;  %v7933_v21 = vcombine.high %v1140_v20, %v1148_v3  ;;  %v7940_v28 = vcombine.low %v1140_v20, %v1148_v3 }
 0x1e6   :  { %v7930_v8 = vcombine.high %v1139_v23, %v1147_v37  ;;  %v7936_v2 = vcombine.low %v1139_v23, %v1147_v37 }
 0x1e7   :  { %4200 = vmatpush1.bf16.msra.mxu0 %v7900_v19  ;;  %10403 = vst [vmem:[#allocation175_spill] sm:$0xff] %v7933_v21  ;;  %v1164_v19 = vld [vmem:[#allocation7 + $0x6d8] sm:$0xff]  ;;  %10405 = vst [vmem:[#allocation177_spill] sm:$0xff] %v7940_v28 }
 0x1e8   :  { %4282 = vmatpush1.bf16.msra.mxu1 %v7904_v15  ;;  %4201 = vmatprep.subr.bf16.mxu0 %v7906_v45  ;;  %10402 = vst [vmem:[#allocation174_spill] sm:$0xff] %v7930_v8  ;;  %v1163_v45 = vld [vmem:[#allocation7 + $0x6d0] sm:$0xff]  ;;  %v1156_v15 = vld [vmem:[#allocation7 + $0x698] sm:$0xff]  ;;  %10404 = vst [vmem:[#allocation176_spill] sm:$0xff] %v7936_v2 }
 0x1e9   :  { %4283 = vmatprep.subr.bf16.mxu1 %v7909_v24  ;;  %v1155_v24 = vld [vmem:[#allocation7 + $0x690] sm:$0xff]  ;;  %v7945_v53 = vcombine.high %v1156_v15, %v1164_v19  ;;  %v7952_v3 = vcombine.low %v1156_v15, %v1164_v19 }
 0x1ea   :  { %v7942_v0 = vcombine.high %v1155_v24, %v1163_v45  ;;  %v7948_v37 = vcombine.low %v1155_v24, %v1163_v45 }
 0x1eb   :  { %4202 = vmatpush1.bf16.msra.mxu0 %v7912_v25  ;;  %10407 = vst [vmem:[#allocation179_spill] sm:$0xff] %v7945_v53  ;;  %v1180_v25 = vld [vmem:[#allocation7 + $0x758] sm:$0xff]  ;;  %10409 = vst [vmem:[#allocation181_spill] sm:$0xff] %v7952_v3 }
 0x1ec   :  { %4284 = vmatpush1.bf16.msra.mxu1 %v7916_v6  ;;  %4203 = vmatprep.subr.bf16.mxu0 %v7918_v60  ;;  %10406 = vst [vmem:[#allocation178_spill] sm:$0xff] %v7942_v0  ;;  %v1179_v60 = vld [vmem:[#allocation7 + $0x750] sm:$0xff]  ;;  %v1172_v6 = vld [vmem:[#allocation7 + $0x718] sm:$0xff]  ;;  %10408 = vst [vmem:[#allocation180_spill] sm:$0xff] %v7948_v37 }
 0x1ed   :  { %4285 = vmatprep.subr.bf16.mxu1 %v7921_v52  ;;  %v1171_v52 = vld [vmem:[#allocation7 + $0x710] sm:$0xff]  ;;  %v7957_v23 = vcombine.high %v1172_v6, %v1180_v25  ;;  %v7964_v19 = vcombine.low %v1172_v6, %v1180_v25 }
 0x1ee   :  { %v7954_v20 = vcombine.high %v1171_v52, %v1179_v60  ;;  %v7960_v45 = vcombine.low %v1171_v52, %v1179_v60 }
 0x1ef   :  { %4204 = vmatpush1.bf16.msra.mxu0 %v7924_v13  ;;  %10411 = vst [vmem:[#allocation183_spill] sm:$0xff] %v7957_v23  ;;  %v1196_v13 = vld [vmem:[#allocation7 + $0x7d8] sm:$0xff]  ;;  %10413 = vst [vmem:[#allocation185_spill] sm:$0xff] %v7964_v19 }
 0x1f0   :  { %4286 = vmatpush1.bf16.msra.mxu1 %v7928_v40  ;;  %4205 = vmatprep.subr.bf16.mxu0 %v7930_v8  ;;  %10410 = vst [vmem:[#allocation182_spill] sm:$0xff] %v7954_v20  ;;  %v1195_v8 = vld [vmem:[#allocation7 + $0x7d0] sm:$0xff]  ;;  %v1188_v40 = vld [vmem:[#allocation7 + $0x798] sm:$0xff]  ;;  %10412 = vst [vmem:[#allocation184_spill] sm:$0xff] %v7960_v45 }
 0x1f1   :  { %4287 = vmatprep.subr.bf16.mxu1 %v7933_v21  ;;  %v1187_v21 = vld [vmem:[#allocation7 + $0x790] sm:$0xff]  ;;  %v7969_v24 = vcombine.high %v1188_v40, %v1196_v13  ;;  %v7976_v25 = vcombine.low %v1188_v40, %v1196_v13 }
 0x1f2   :  { %v7966_v15 = vcombine.high %v1187_v21, %v1195_v8  ;;  %v7972_v60 = vcombine.low %v1187_v21, %v1195_v8  ;;  %v1220_v8 = vld [vmem:[#allocation7 + $0x898] sm:$0xff] }
 0x1f3   :  { %4206 = vmatpush1.bf16.msra.mxu0 %v7936_v2  ;;  %10415 = vst [vmem:[#allocation187_spill] sm:$0xff] %v7969_v24  ;;  %v1212_v2 = vld [vmem:[#allocation7 + $0x858] sm:$0xff]  ;;  %10417 = vst [vmem:[#allocation189_spill] sm:$0xff] %v7976_v25 }
 0x1f4   :  { %4288 = vmatpush1.bf16.msra.mxu1 %v7940_v28  ;;  %4207 = vmatprep.subr.bf16.mxu0 %v7942_v0  ;;  %10414 = vst [vmem:[#allocation186_spill] sm:$0xff] %v7966_v15  ;;  %v1211_v0 = vld [vmem:[#allocation7 + $0x850] sm:$0xff]  ;;  %v1204_v28 = vld [vmem:[#allocation7 + $0x818] sm:$0xff]  ;;  %10416 = vst [vmem:[#allocation188_spill] sm:$0xff] %v7972_v60 }
 0x1f5   :  { %4289 = vmatprep.subr.bf16.mxu1 %v7945_v53  ;;  %v1203_v53 = vld [vmem:[#allocation7 + $0x810] sm:$0xff]  ;;  %v7981_v52 = vcombine.high %v1204_v28, %v1212_v2  ;;  %v1228_v21 = vld [vmem:[#allocation7 + $0x8d8] sm:$0xff]  ;;  %v7988_v13 = vcombine.low %v1204_v28, %v1212_v2 }
 0x1f6   :  { %v7978_v6 = vcombine.high %v1203_v53, %v1211_v0  ;;  %v8002_v2 = vcombine.low %v1220_v8, %v1228_v21 }
 0x1f7   :  { %4208 = vmatpush1.bf16.msra.mxu0 %v7948_v37  ;;  %10419 = vst [vmem:[#allocation191_spill] sm:$0xff] %v7981_v52  ;;  %10421 = vst [vmem:[#allocation193_spill] sm:$0xff] %v7988_v13  ;;  %v1276_v37 = vld [vmem:[#allocation7 + $0xa58] sm:$0xff] }
 0x1f8   :  { %4290 = vmatpush1.bf16.msra.mxu1 %v7952_v3  ;;  %4209 = vmatprep.subr.bf16.mxu0 %v7954_v20  ;;  %10418 = vst [vmem:[#allocation190_spill] sm:$0xff] %v7978_v6  ;;  %v1227_v20 = vld [vmem:[#allocation7 + $0x8d0] sm:$0xff]  ;;  %v7984_v3 = vcombine.low %v1203_v53, %v1211_v0  ;;  %v1236_v0 = vld [vmem:[#allocation7 + $0x918] sm:$0xff]  ;;  %10425 = vst [vmem:[#allocation197_spill] sm:$0xff] %v8002_v2 }
 0x1f9   :  { %4291 = vmatprep.subr.bf16.mxu1 %v7957_v23  ;;  %v1219_v23 = vld [vmem:[#allocation7 + $0x890] sm:$0xff]  ;;  %v1244_v53 = vld [vmem:[#allocation7 + $0x958] sm:$0xff] }
 0x1fa   :  { %10420 = vst [vmem:[#allocation192_spill] sm:$0xff] %v7984_v3  ;;  %v7991_v40 = vcombine.high %v1219_v23, %v1227_v20 }
 0x1fb   :  { %4210 = vmatpush1.bf16.msra.mxu0 %v7960_v45  ;;  %v1268_v45 = vld [vmem:[#allocation7 + $0xa18] sm:$0xff] }
 0x1fc   :  { %4292 = vmatpush1.bf16.msra.mxu1 %v7964_v19  ;;  %4211 = vmatprep.subr.bf16.mxu0 %v7966_v15  ;;  %10422 = vst [vmem:[#allocation194_spill] sm:$0xff] %v7991_v40  ;;  %v1243_v15 = vld [vmem:[#allocation7 + $0x950] sm:$0xff]  ;;  %v7994_v19 = vcombine.high %v1220_v8, %v1228_v21  ;;  %v8016_v8 = vcombine.low %v1236_v0, %v1244_v53 }
 0x1fd   :  { %4293 = vmatprep.subr.bf16.mxu1 %v7969_v24  ;;  %v1235_v24 = vld [vmem:[#allocation7 + $0x910] sm:$0xff] }
 0x1fe   :  { %10423 = vst [vmem:[#allocation195_spill] sm:$0xff] %v7994_v19  ;;  %v8004_v28 = vcombine.high %v1235_v24, %v1243_v15  ;;  %10429 = vst [vmem:[#allocation201_spill] sm:$0xff] %v8016_v8 }
 0x1ff   :  { %4212 = vmatpush1.bf16.msra.mxu0 %v7972_v60  ;;  %v1259_v60 = vld [vmem:[#allocation7 + $0x9d0] sm:$0xff] }
 0x200   :  { %4294 = vmatpush1.bf16.msra.mxu1 %v7976_v25  ;;  %4222 = vmatprep.subr.bf16.mxu0 %v7978_v6  ;;  %v7998_v25 = vcombine.low %v1219_v23, %v1227_v20  ;;  %10426 = vst [vmem:[#allocation198_spill] sm:$0xff] %v8004_v28  ;;  %v1251_v6 = vld [vmem:[#allocation7 + $0x990] sm:$0xff]  ;;  %v1252_v20 = vld [vmem:[#allocation7 + $0x998] sm:$0xff] }
 0x201   :  { %4304 = vmatprep.subr.bf16.mxu1 %v7981_v52  ;;  %v8008_v52 = vcombine.high %v1236_v0, %v1244_v53  ;;  %v1260_v23 = vld [vmem:[#allocation7 + $0x9d8] sm:$0xff]  ;;  %v8018_v21 = vcombine.high %v1251_v6, %v1259_v60  ;;  %v8033_v53 = vcombine.high %v1268_v45, %v1276_v37 }
 0x202   :  { %4214 = vmatmul.mubr.bf16.vlgmr.msra.gmra.mrb[20].mxu0 %v7582_v48  ;;  %10424 = vst [vmem:[#allocation196_spill] sm:$0xff] %v7998_v25 }
 0x203   :  { %4296 = vmatmul.mubr.bf16.vlgmr.msra.gmra.mrb[20].mxu1 %v7582_v48  ;;  %4223 = vmatpush1.bf16.msra.mxu0 %v7984_v3  ;;  %10427 = vst [vmem:[#allocation199_spill] sm:$0xff] %v8008_v52  ;;  %v8012_v3 = vcombine.low %v1235_v24, %v1243_v15  ;;  %10430 = vst [vmem:[#allocation202_spill] sm:$0xff] %v8018_v21  ;;  %v8024_v15 = vcombine.low %v1251_v6, %v1259_v60 }
 0x204   :  { %4254 = vmatprep.mubr.bf16.mxu0 %v7607_v62  ;;  %4305 = vmatpush1.bf16.msra.mxu1 %v7988_v13  ;;  %v1267_v13 = vld [vmem:[#allocation7 + $0xa10] sm:$0xff]  ;;  %v8028_v24 = vcombine.low %v1252_v20, %v1260_v23  ;;  %10435 = vst [vmem:[#allocation207_spill] sm:$0xff] %v8033_v53  ;;  %v8040_v6 = vcombine.low %v1268_v45, %v1276_v37 }
 0x205   :  { %4336 = vmatprep.mubr.bf16.mxu1 %v7607_v62  ;;  %4224 = vmatprep.subr.bf16.mxu0 %v7991_v40  ;;  %10428 = vst [vmem:[#allocation200_spill] sm:$0xff] %v8012_v3  ;;  %v8021_v40 = vcombine.high %v1252_v20, %v1260_v23  ;;  %10432 = vst [vmem:[#allocation204_spill] sm:$0xff] %v8024_v15 }
 0x206   :  { %4306 = vmatprep.subr.bf16.mxu1 %v7994_v19  ;;  %v1275_v19 = vld [vmem:[#allocation7 + $0xa50] sm:$0xff]  ;;  %10433 = vst [vmem:[#allocation205_spill] sm:$0xff] %v8028_v24  ;;  %10437 = vst [vmem:[#allocation209_spill] sm:$0xff] %v8040_v6 }
 0x207   :  { %4225 = vmatpush1.bf16.msra.mxu0 %v7998_v25  ;;  %10431 = vst [vmem:[#allocation203_spill] sm:$0xff] %v8021_v40  ;;  %v8030_v0 = vcombine.high %v1267_v13, %v1275_v19  ;;  %v1292_v25 = vld [vmem:[#allocation7 + $0xad8] sm:$0xff]  ;;  %v8036_v60 = vcombine.low %v1267_v13, %v1275_v19 }
 0x208   :  { %4307 = vmatpush1.bf16.msra.mxu1 %v8002_v2  ;;  %4226 = vmatprep.subr.bf16.mxu0 %v8004_v28  ;;  %v1291_v28 = vld [vmem:[#allocation7 + $0xad0] sm:$0xff]  ;;  %v1284_v2 = vld [vmem:[#allocation7 + $0xa98] sm:$0xff] }
 0x209   :  { %4308 = vmatprep.subr.bf16.mxu1 %v8008_v52  ;;  %10434 = vst [vmem:[#allocation206_spill] sm:$0xff] %v8030_v0  ;;  %v1283_v52 = vld [vmem:[#allocation7 + $0xa90] sm:$0xff]  ;;  %10436 = vst [vmem:[#allocation208_spill] sm:$0xff] %v8036_v60  ;;  %v8045_v23 = vcombine.high %v1284_v2, %v1292_v25  ;;  %v8052_v37 = vcombine.low %v1284_v2, %v1292_v25 }
 0x20a   :  { %v8042_v20 = vcombine.high %v1283_v52, %v1291_v28  ;;  %v8048_v19 = vcombine.low %v1283_v52, %v1291_v28 }
 0x20b   :  { %4227 = vmatpush1.bf16.msra.mxu0 %v8012_v3  ;;  %10439 = vst [vmem:[#allocation211_spill] sm:$0xff] %v8045_v23  ;;  %v1308_v3 = vld [vmem:[#allocation7 + $0xb58] sm:$0xff]  ;;  %10441 = vst [vmem:[#allocation213_spill] sm:$0xff] %v8052_v37 }
 0x20c   :  { %4309 = vmatpush1.bf16.msra.mxu1 %v8016_v8  ;;  %4228 = vmatprep.subr.bf16.mxu0 %v8018_v21  ;;  %10438 = vst [vmem:[#allocation210_spill] sm:$0xff] %v8042_v20  ;;  %v1307_v21 = vld [vmem:[#allocation7 + $0xb50] sm:$0xff]  ;;  %v1300_v8 = vld [vmem:[#allocation7 + $0xb18] sm:$0xff]  ;;  %10440 = vst [vmem:[#allocation212_spill] sm:$0xff] %v8048_v19 }
 0x20d   :  { %4310 = vmatprep.subr.bf16.mxu1 %v8021_v40  ;;  %v1299_v40 = vld [vmem:[#allocation7 + $0xb10] sm:$0xff]  ;;  %v8057_v13 = vcombine.high %v1300_v8, %v1308_v3  ;;  %v8064_v25 = vcombine.low %v1300_v8, %v1308_v3 }
 0x20e   :  { %v8054_v45 = vcombine.high %v1299_v40, %v1307_v21  ;;  %v8060_v52 = vcombine.low %v1299_v40, %v1307_v21 }
 0x20f   :  { %4229 = vmatpush1.bf16.msra.mxu0 %v8024_v15  ;;  %10443 = vst [vmem:[#allocation215_spill] sm:$0xff] %v8057_v13  ;;  %v1324_v15 = vld [vmem:[#allocation7 + $0xbd8] sm:$0xff]  ;;  %10445 = vst [vmem:[#allocation217_spill] sm:$0xff] %v8064_v25 }
 0x210   :  { %4311 = vmatpush1.bf16.msra.mxu1 %v8028_v24  ;;  %4230 = vmatprep.subr.bf16.mxu0 %v8030_v0  ;;  %10442 = vst [vmem:[#allocation214_spill] sm:$0xff] %v8054_v45  ;;  %v1323_v0 = vld [vmem:[#allocation7 + $0xbd0] sm:$0xff]  ;;  %v1316_v24 = vld [vmem:[#allocation7 + $0xb98] sm:$0xff]  ;;  %10444 = vst [vmem:[#allocation216_spill] sm:$0xff] %v8060_v52 }
 0x211   :  { %4312 = vmatprep.subr.bf16.mxu1 %v8033_v53  ;;  %v1315_v53 = vld [vmem:[#allocation7 + $0xb90] sm:$0xff]  ;;  %v8069_v28 = vcombine.high %v1316_v24, %v1324_v15  ;;  %v8076_v3 = vcombine.low %v1316_v24, %v1324_v15 }
 0x212   :  { %v8066_v2 = vcombine.high %v1315_v53, %v1323_v0  ;;  %v8072_v40 = vcombine.low %v1315_v53, %v1323_v0 }
 0x213   :  { %4231 = vmatpush1.bf16.msra.mxu0 %v8036_v60  ;;  %10447 = vst [vmem:[#allocation219_spill] sm:$0xff] %v8069_v28  ;;  %v1340_v60 = vld [vmem:[#allocation7 + $0xc58] sm:$0xff]  ;;  %10449 = vst [vmem:[#allocation221_spill] sm:$0xff] %v8076_v3 }
 0x214   :  { %4313 = vmatpush1.bf16.msra.mxu1 %v8040_v6  ;;  %4232 = vmatprep.subr.bf16.mxu0 %v8042_v20  ;;  %10446 = vst [vmem:[#allocation218_spill] sm:$0xff] %v8066_v2  ;;  %v1339_v20 = vld [vmem:[#allocation7 + $0xc50] sm:$0xff]  ;;  %v1332_v6 = vld [vmem:[#allocation7 + $0xc18] sm:$0xff]  ;;  %10448 = vst [vmem:[#allocation220_spill] sm:$0xff] %v8072_v40 }
 0x215   :  { %4314 = vmatprep.subr.bf16.mxu1 %v8045_v23  ;;  %v1331_v23 = vld [vmem:[#allocation7 + $0xc10] sm:$0xff]  ;;  %v8081_v21 = vcombine.high %v1332_v6, %v1340_v60  ;;  %v8088_v15 = vcombine.low %v1332_v6, %v1340_v60 }
 0x216   :  { %v8078_v8 = vcombine.high %v1331_v23, %v1339_v20  ;;  %v8084_v0 = vcombine.low %v1331_v23, %v1339_v20 }
 0x217   :  { %4233 = vmatpush1.bf16.msra.mxu0 %v8048_v19  ;;  %10451 = vst [vmem:[#allocation223_spill] sm:$0xff] %v8081_v21  ;;  %v1356_v19 = vld [vmem:[#allocation7 + $0xcd8] sm:$0xff]  ;;  %10453 = vst [vmem:[#allocation225_spill] sm:$0xff] %v8088_v15 }
 0x218   :  { %4315 = vmatpush1.bf16.msra.mxu1 %v8052_v37  ;;  %4234 = vmatprep.subr.bf16.mxu0 %v8054_v45  ;;  %10450 = vst [vmem:[#allocation222_spill] sm:$0xff] %v8078_v8  ;;  %v1355_v45 = vld [vmem:[#allocation7 + $0xcd0] sm:$0xff]  ;;  %v1348_v37 = vld [vmem:[#allocation7 + $0xc98] sm:$0xff]  ;;  %10452 = vst [vmem:[#allocation224_spill] sm:$0xff] %v8084_v0 }
 0x219   :  { %4316 = vmatprep.subr.bf16.mxu1 %v8057_v13  ;;  %v1347_v13 = vld [vmem:[#allocation7 + $0xc90] sm:$0xff]  ;;  %v8093_v53 = vcombine.high %v1348_v37, %v1356_v19  ;;  %v8100_v60 = vcombine.low %v1348_v37, %v1356_v19 }
 0x21a   :  { %v8090_v24 = vcombine.high %v1347_v13, %v1355_v45  ;;  %v8096_v20 = vcombine.low %v1347_v13, %v1355_v45 }
 0x21b   :  { %4235 = vmatpush1.bf16.msra.mxu0 %v8060_v52  ;;  %10455 = vst [vmem:[#allocation227_spill] sm:$0xff] %v8093_v53  ;;  %v1372_v52 = vld [vmem:[#allocation7 + $0xd58] sm:$0xff]  ;;  %10457 = vst [vmem:[#allocation229_spill] sm:$0xff] %v8100_v60 }
 0x21c   :  { %4317 = vmatpush1.bf16.msra.mxu1 %v8064_v25  ;;  %4236 = vmatprep.subr.bf16.mxu0 %v8066_v2  ;;  %10454 = vst [vmem:[#allocation226_spill] sm:$0xff] %v8090_v24  ;;  %v1371_v2 = vld [vmem:[#allocation7 + $0xd50] sm:$0xff]  ;;  %v1364_v25 = vld [vmem:[#allocation7 + $0xd18] sm:$0xff]  ;;  %10456 = vst [vmem:[#allocation228_spill] sm:$0xff] %v8096_v20 }
 0x21d   :  { %4318 = vmatprep.subr.bf16.mxu1 %v8069_v28  ;;  %v1363_v28 = vld [vmem:[#allocation7 + $0xd10] sm:$0xff]  ;;  %v8105_v23 = vcombine.high %v1364_v25, %v1372_v52  ;;  %v8112_v19 = vcombine.low %v1364_v25, %v1372_v52 }
 0x21e   :  { %v8102_v6 = vcombine.high %v1363_v28, %v1371_v2  ;;  %v8108_v45 = vcombine.low %v1363_v28, %v1371_v2 }
 0x21f   :  { %4237 = vmatpush1.bf16.msra.mxu0 %v8072_v40  ;;  %10459 = vst [vmem:[#allocation231_spill] sm:$0xff] %v8105_v23  ;;  %v1388_v40 = vld [vmem:[#allocation7 + $0xdd8] sm:$0xff]  ;;  %10461 = vst [vmem:[#allocation233_spill] sm:$0xff] %v8112_v19 }
 0x220   :  { %4319 = vmatpush1.bf16.msra.mxu1 %v8076_v3  ;;  %4238 = vmatprep.subr.bf16.mxu0 %v8078_v8  ;;  %10458 = vst [vmem:[#allocation230_spill] sm:$0xff] %v8102_v6  ;;  %v1387_v8 = vld [vmem:[#allocation7 + $0xdd0] sm:$0xff]  ;;  %v1380_v3 = vld [vmem:[#allocation7 + $0xd98] sm:$0xff]  ;;  %10460 = vst [vmem:[#allocation232_spill] sm:$0xff] %v8108_v45 }
 0x221   :  { %4320 = vmatprep.subr.bf16.mxu1 %v8081_v21  ;;  %v1379_v21 = vld [vmem:[#allocation7 + $0xd90] sm:$0xff]  ;;  %v8117_v13 = vcombine.high %v1380_v3, %v1388_v40  ;;  %v8124_v52 = vcombine.low %v1380_v3, %v1388_v40 }
 0x222   :  { %v8114_v37 = vcombine.high %v1379_v21, %v1387_v8  ;;  %v8120_v2 = vcombine.low %v1379_v21, %v1387_v8 }
 0x223   :  { %4239 = vmatpush1.bf16.msra.mxu0 %v8084_v0  ;;  %10463 = vst [vmem:[#allocation235_spill] sm:$0xff] %v8117_v13  ;;  %v1404_v0 = vld [vmem:[#allocation7 + $0xe58] sm:$0xff]  ;;  %10465 = vst [vmem:[#allocation237_spill] sm:$0xff] %v8124_v52 }
 0x224   :  { %4321 = vmatpush1.bf16.msra.mxu1 %v8088_v15  ;;  %4240 = vmatprep.subr.bf16.mxu0 %v8090_v24  ;;  %10462 = vst [vmem:[#allocation234_spill] sm:$0xff] %v8114_v37  ;;  %v1403_v24 = vld [vmem:[#allocation7 + $0xe50] sm:$0xff]  ;;  %v1396_v15 = vld [vmem:[#allocation7 + $0xe18] sm:$0xff]  ;;  %10464 = vst [vmem:[#allocation236_spill] sm:$0xff] %v8120_v2 }
 0x225   :  { %4322 = vmatprep.subr.bf16.mxu1 %v8093_v53  ;;  %v1395_v53 = vld [vmem:[#allocation7 + $0xe10] sm:$0xff]  ;;  %v8129_v28 = vcombine.high %v1396_v15, %v1404_v0  ;;  %v8136_v40 = vcombine.low %v1396_v15, %v1404_v0 }
 0x226   :  { %v8126_v25 = vcombine.high %v1395_v53, %v1403_v24  ;;  %v8132_v8 = vcombine.low %v1395_v53, %v1403_v24 }
 0x227   :  { %4241 = vmatpush1.bf16.msra.mxu0 %v8096_v20  ;;  %10467 = vst [vmem:[#allocation239_spill] sm:$0xff] %v8129_v28  ;;  %v1420_v20 = vld [vmem:[#allocation7 + $0xed8] sm:$0xff]  ;;  %10469 = vst [vmem:[#allocation241_spill] sm:$0xff] %v8136_v40 }
 0x228   :  { %4323 = vmatpush1.bf16.msra.mxu1 %v8100_v60  ;;  %4242 = vmatprep.subr.bf16.mxu0 %v8102_v6  ;;  %10466 = vst [vmem:[#allocation238_spill] sm:$0xff] %v8126_v25  ;;  %v1419_v6 = vld [vmem:[#allocation7 + $0xed0] sm:$0xff]  ;;  %v1412_v60 = vld [vmem:[#allocation7 + $0xe98] sm:$0xff]  ;;  %10468 = vst [vmem:[#allocation240_spill] sm:$0xff] %v8132_v8 }
 0x229   :  { %4324 = vmatprep.subr.bf16.mxu1 %v8105_v23  ;;  %v1411_v23 = vld [vmem:[#allocation7 + $0xe90] sm:$0xff]  ;;  %v8141_v21 = vcombine.high %v1412_v60, %v1420_v20  ;;  %v8148_v0 = vcombine.low %v1412_v60, %v1420_v20 }
 0x22a   :  { %v8138_v3 = vcombine.high %v1411_v23, %v1419_v6  ;;  %v8144_v24 = vcombine.low %v1411_v23, %v1419_v6 }
 0x22b   :  { %4243 = vmatpush1.bf16.msra.mxu0 %v8108_v45  ;;  %10471 = vst [vmem:[#allocation243_spill] sm:$0xff] %v8141_v21  ;;  %v1436_v45 = vld [vmem:[#allocation7 + $0xf58] sm:$0xff]  ;;  %10473 = vst [vmem:[#allocation245_spill] sm:$0xff] %v8148_v0 }
 0x22c   :  { %4325 = vmatpush1.bf16.msra.mxu1 %v8112_v19  ;;  %4244 = vmatprep.subr.bf16.mxu0 %v8114_v37  ;;  %10470 = vst [vmem:[#allocation242_spill] sm:$0xff] %v8138_v3  ;;  %v1435_v37 = vld [vmem:[#allocation7 + $0xf50] sm:$0xff]  ;;  %v1428_v19 = vld [vmem:[#allocation7 + $0xf18] sm:$0xff]  ;;  %10472 = vst [vmem:[#allocation244_spill] sm:$0xff] %v8144_v24 }
 0x22d   :  { %4326 = vmatprep.subr.bf16.mxu1 %v8117_v13  ;;  %v1427_v13 = vld [vmem:[#allocation7 + $0xf10] sm:$0xff]  ;;  %v8153_v53 = vcombine.high %v1428_v19, %v1436_v45  ;;  %v8160_v20 = vcombine.low %v1428_v19, %v1436_v45 }
 0x22e   :  { %v8150_v15 = vcombine.high %v1427_v13, %v1435_v37  ;;  %v8156_v6 = vcombine.low %v1427_v13, %v1435_v37 }
 0x22f   :  { %4245 = vmatpush1.bf16.msra.mxu0 %v8120_v2  ;;  %10475 = vst [vmem:[#allocation247_spill] sm:$0xff] %v8153_v53  ;;  %v1452_v2 = vld [vmem:[#allocation7 + $0xfd8] sm:$0xff]  ;;  %10477 = vst [vmem:[#allocation249_spill] sm:$0xff] %v8160_v20 }
 0x230   :  { %4327 = vmatpush1.bf16.msra.mxu1 %v8124_v52  ;;  %4246 = vmatprep.subr.bf16.mxu0 %v8126_v25  ;;  %10474 = vst [vmem:[#allocation246_spill] sm:$0xff] %v8150_v15  ;;  %v1451_v25 = vld [vmem:[#allocation7 + $0xfd0] sm:$0xff]  ;;  %v1444_v52 = vld [vmem:[#allocation7 + $0xf98] sm:$0xff]  ;;  %10476 = vst [vmem:[#allocation248_spill] sm:$0xff] %v8156_v6 }
 0x231   :  { %4328 = vmatprep.subr.bf16.mxu1 %v8129_v28  ;;  %v1443_v28 = vld [vmem:[#allocation7 + $0xf90] sm:$0xff]  ;;  %v8165_v23 = vcombine.high %v1444_v52, %v1452_v2  ;;  %v8172_v45 = vcombine.low %v1444_v52, %v1452_v2 }
 0x232   :  { %v8162_v60 = vcombine.high %v1443_v28, %v1451_v25  ;;  %v8168_v37 = vcombine.low %v1443_v28, %v1451_v25  ;;  %v966_v25 = vld [vmem:[#allocation7 + $0xa8] sm:$0xff] }
 0x233   :  { %4247 = vmatpush1.bf16.msra.mxu0 %v8132_v8  ;;  %10479 = vst [vmem:[#allocation251_spill] sm:$0xff] %v8165_v23  ;;  %v958_v8 = vld [vmem:[#allocation7 + $0x68] sm:$0xff]  ;;  %10481 = vst [vmem:[#allocation253_spill] sm:$0xff] %v8172_v45 }
 0x234   :  { %4329 = vmatpush1.bf16.msra.mxu1 %v8136_v40  ;;  %4248 = vmatprep.subr.bf16.mxu0 %v8138_v3  ;;  %10478 = vst [vmem:[#allocation250_spill] sm:$0xff] %v8162_v60  ;;  %v957_v3 = vld [vmem:[#allocation7 + $0x60] sm:$0xff]  ;;  %v950_v40 = vld [vmem:[#allocation7 + $0x28] sm:$0xff]  ;;  %10480 = vst [vmem:[#allocation252_spill] sm:$0xff] %v8168_v37 }
 0x235   :  { %4330 = vmatprep.subr.bf16.mxu1 %v8141_v21  ;;  %v949_v21 = vld [vmem:[#allocation7 + $0x20] sm:$0xff]  ;;  %v8177_v13 = vcombine.high %v950_v40, %v958_v8  ;;  %v974_v28 = vld [vmem:[#allocation7 + $0xe8] sm:$0xff]  ;;  %v8184_v2 = vcombine.low %v950_v40, %v958_v8 }
 0x236   :  { %v8174_v19 = vcombine.high %v949_v21, %v957_v3  ;;  %v8198_v8 = vcombine.low %v966_v25, %v974_v28 }
 0x237   :  { %4249 = vmatpush1.bf16.msra.mxu0 %v8144_v24  ;;  %10483 = vst [vmem:[#allocation255_spill] sm:$0xff] %v8177_v13  ;;  %10485 = vst [vmem:[#allocation257_spill] sm:$0xff] %v8184_v2  ;;  %v1022_v24 = vld [vmem:[#allocation7 + $0x268] sm:$0xff] }
 0x238   :  { %4331 = vmatpush1.bf16.msra.mxu1 %v8148_v0  ;;  %4250 = vmatprep.subr.bf16.mxu0 %v8150_v15  ;;  %10482 = vst [vmem:[#allocation254_spill] sm:$0xff] %v8174_v19  ;;  %v973_v15 = vld [vmem:[#allocation7 + $0xe0] sm:$0xff]  ;;  %v8180_v0 = vcombine.low %v949_v21, %v957_v3  ;;  %v982_v3 = vld [vmem:[#allocation7 + $0x128] sm:$0xff]  ;;  %10489 = vst [vmem:[#allocation261_spill] sm:$0xff] %v8198_v8 }
 0x239   :  { %4332 = vmatprep.subr.bf16.mxu1 %v8153_v53  ;;  %v965_v53 = vld [vmem:[#allocation7 + $0xa0] sm:$0xff]  ;;  %v990_v21 = vld [vmem:[#allocation7 + $0x168] sm:$0xff] }
 0x23a   :  { %10484 = vst [vmem:[#allocation256_spill] sm:$0xff] %v8180_v0  ;;  %v8187_v52 = vcombine.high %v965_v53, %v973_v15 }
 0x23b   :  { %4251 = vmatpush1.bf16.msra.mxu0 %v8156_v6  ;;  %v1014_v6 = vld [vmem:[#allocation7 + $0x228] sm:$0xff] }
 0x23c   :  { %4333 = vmatpush1.bf16.msra.mxu1 %v8160_v20  ;;  %4252 = vmatprep.subr.bf16.mxu0 %v8162_v60  ;;  %10486 = vst [vmem:[#allocation258_spill] sm:$0xff] %v8187_v52  ;;  %v989_v60 = vld [vmem:[#allocation7 + $0x160] sm:$0xff]  ;;  %v8190_v20 = vcombine.high %v966_v25, %v974_v28  ;;  %v8212_v25 = vcombine.low %v982_v3, %v990_v21 }
 0x23d   :  { %4334 = vmatprep.subr.bf16.mxu1 %v8165_v23  ;;  %v981_v23 = vld [vmem:[#allocation7 + $0x120] sm:$0xff] }
 0x23e   :  { %10487 = vst [vmem:[#allocation259_spill] sm:$0xff] %v8190_v20  ;;  %v8200_v40 = vcombine.high %v981_v23, %v989_v60  ;;  %10493 = vst [vmem:[#allocation265_spill] sm:$0xff] %v8212_v25 }
 0x23f   :  { %4253 = vmatpush1.bf16.msra.mxu0 %v8168_v37  ;;  %v1005_v37 = vld [vmem:[#allocation7 + $0x1e0] sm:$0xff] }
 0x240   :  { %4335 = vmatpush1.bf16.msra.mxu1 %v8172_v45  ;;  %4345 = vmatprep.subr.bf16.mxu0 %v8174_v19  ;;  %v8194_v45 = vcombine.low %v965_v53, %v973_v15  ;;  %10490 = vst [vmem:[#allocation262_spill] sm:$0xff] %v8200_v40  ;;  %v997_v19 = vld [vmem:[#allocation7 + $0x1a0] sm:$0xff]  ;;  %v998_v15 = vld [vmem:[#allocation7 + $0x1a8] sm:$0xff] }
 0x241   :  { %4427 = vmatprep.subr.bf16.mxu1 %v8177_v13  ;;  %v8204_v13 = vcombine.high %v982_v3, %v990_v21  ;;  %v1006_v53 = vld [vmem:[#allocation7 + $0x1e8] sm:$0xff]  ;;  %v8214_v28 = vcombine.high %v997_v19, %v1005_v37  ;;  %v8229_v21 = vcombine.high %v1014_v6, %v1022_v24 }
 0x242   :  { %4255 = vmatmul.mubr.bf16.vlgmr.msra.gmra.mrb[20].mxu0 %v7789_v38  ;;  %10488 = vst [vmem:[#allocation260_spill] sm:$0xff] %v8194_v45 }
 0x243   :  { %4337 = vmatmul.mubr.bf16.vlgmr.msra.gmra.mrb[20].mxu1 %v7789_v38  ;;  %4346 = vmatpush1.bf16.msra.mxu0 %v8180_v0  ;;  %10491 = vst [vmem:[#allocation263_spill] sm:$0xff] %v8204_v13  ;;  %v8208_v0 = vcombine.low %v981_v23, %v989_v60  ;;  %10494 = vst [vmem:[#allocation266_spill] sm:$0xff] %v8214_v28  ;;  %v8220_v60 = vcombine.low %v997_v19, %v1005_v37 }
 0x244   :  { %4377 = vmatprep.mubr.bf16.mxu0 %v7577_v36  ;;  %4428 = vmatpush1.bf16.msra.mxu1 %v8184_v2  ;;  %v1013_v2 = vld [vmem:[#allocation7 + $0x220] sm:$0xff]  ;;  %v8224_v23 = vcombine.low %v998_v15, %v1006_v53  ;;  %10499 = vst [vmem:[#allocation271_spill] sm:$0xff] %v8229_v21  ;;  %v8236_v19 = vcombine.low %v1014_v6, %v1022_v24 }
 0x245   :  { %4459 = vmatprep.mubr.bf16.mxu1 %v7577_v36  ;;  %4347 = vmatprep.subr.bf16.mxu0 %v8187_v52  ;;  %10492 = vst [vmem:[#allocation264_spill] sm:$0xff] %v8208_v0  ;;  %v8217_v52 = vcombine.high %v998_v15, %v1006_v53  ;;  %10496 = vst [vmem:[#allocation268_spill] sm:$0xff] %v8220_v60 }
 0x246   :  { %4429 = vmatprep.subr.bf16.mxu1 %v8190_v20  ;;  %v1021_v20 = vld [vmem:[#allocation7 + $0x260] sm:$0xff]  ;;  %10497 = vst [vmem:[#allocation269_spill] sm:$0xff] %v8224_v23  ;;  %10501 = vst [vmem:[#allocation273_spill] sm:$0xff] %v8236_v19 }
 0x247   :  { %4348 = vmatpush1.bf16.msra.mxu0 %v8194_v45  ;;  %10495 = vst [vmem:[#allocation267_spill] sm:$0xff] %v8217_v52  ;;  %v8226_v3 = vcombine.high %v1013_v2, %v1021_v20  ;;  %v1038_v45 = vld [vmem:[#allocation7 + $0x2e8] sm:$0xff]  ;;  %v8232_v37 = vcombine.low %v1013_v2, %v1021_v20 }
 0x248   :  { %4430 = vmatpush1.bf16.msra.mxu1 %v8198_v8  ;;  %4349 = vmatprep.subr.bf16.mxu0 %v8200_v40  ;;  %v1037_v40 = vld [vmem:[#allocation7 + $0x2e0] sm:$0xff]  ;;  %v1030_v8 = vld [vmem:[#allocation7 + $0x2a8] sm:$0xff] }
 0x249   :  { %4431 = vmatprep.subr.bf16.mxu1 %v8204_v13  ;;  %10498 = vst [vmem:[#allocation270_spill] sm:$0xff] %v8226_v3  ;;  %v1029_v13 = vld [vmem:[#allocation7 + $0x2a0] sm:$0xff]  ;;  %10500 = vst [vmem:[#allocation272_spill] sm:$0xff] %v8232_v37  ;;  %v8241_v53 = vcombine.high %v1030_v8, %v1038_v45  ;;  %v8248_v24 = vcombine.low %v1030_v8, %v1038_v45 }
 0x24a   :  { %v8238_v15 = vcombine.high %v1029_v13, %v1037_v40  ;;  %v8244_v20 = vcombine.low %v1029_v13, %v1037_v40 }
 0x24b   :  { %4350 = vmatpush1.bf16.msra.mxu0 %v8208_v0  ;;  %10503 = vst [vmem:[#allocation275_spill] sm:$0xff] %v8241_v53  ;;  %v1054_v0 = vld [vmem:[#allocation7 + $0x368] sm:$0xff]  ;;  %10505 = vst [vmem:[#allocation277_spill] sm:$0xff] %v8248_v24 }
 0x24c   :  { %4432 = vmatpush1.bf16.msra.mxu1 %v8212_v25  ;;  %4351 = vmatprep.subr.bf16.mxu0 %v8214_v28  ;;  %10502 = vst [vmem:[#allocation274_spill] sm:$0xff] %v8238_v15  ;;  %v1053_v28 = vld [vmem:[#allocation7 + $0x360] sm:$0xff]  ;;  %v1046_v25 = vld [vmem:[#allocation7 + $0x328] sm:$0xff]  ;;  %10504 = vst [vmem:[#allocation276_spill] sm:$0xff] %v8244_v20 }
 0x24d   :  { %4433 = vmatprep.subr.bf16.mxu1 %v8217_v52  ;;  %v1045_v52 = vld [vmem:[#allocation7 + $0x320] sm:$0xff]  ;;  %v8253_v2 = vcombine.high %v1046_v25, %v1054_v0  ;;  %v8260_v45 = vcombine.low %v1046_v25, %v1054_v0 }
 0x24e   :  { %v8250_v6 = vcombine.high %v1045_v52, %v1053_v28  ;;  %v8256_v13 = vcombine.low %v1045_v52, %v1053_v28 }
 0x24f   :  { %4352 = vmatpush1.bf16.msra.mxu0 %v8220_v60  ;;  %10507 = vst [vmem:[#allocation279_spill] sm:$0xff] %v8253_v2  ;;  %v1070_v60 = vld [vmem:[#allocation7 + $0x3e8] sm:$0xff]  ;;  %10509 = vst [vmem:[#allocation281_spill] sm:$0xff] %v8260_v45 }
 0x250   :  { %4434 = vmatpush1.bf16.msra.mxu1 %v8224_v23  ;;  %4353 = vmatprep.subr.bf16.mxu0 %v8226_v3  ;;  %10506 = vst [vmem:[#allocation278_spill] sm:$0xff] %v8250_v6  ;;  %v1069_v3 = vld [vmem:[#allocation7 + $0x3e0] sm:$0xff]  ;;  %v1062_v23 = vld [vmem:[#allocation7 + $0x3a8] sm:$0xff]  ;;  %10508 = vst [vmem:[#allocation280_spill] sm:$0xff] %v8256_v13 }
 0x251   :  { %4435 = vmatprep.subr.bf16.mxu1 %v8229_v21  ;;  %v1061_v21 = vld [vmem:[#allocation7 + $0x3a0] sm:$0xff]  ;;  %v8265_v40 = vcombine.high %v1062_v23, %v1070_v60  ;;  %v8272_v0 = vcombine.low %v1062_v23, %v1070_v60 }
 0x252   :  { %v8262_v8 = vcombine.high %v1061_v21, %v1069_v3  ;;  %v8268_v52 = vcombine.low %v1061_v21, %v1069_v3 }
 0x253   :  { %4354 = vmatpush1.bf16.msra.mxu0 %v8232_v37  ;;  %10511 = vst [vmem:[#allocation283_spill] sm:$0xff] %v8265_v40  ;;  %v1086_v37 = vld [vmem:[#allocation7 + $0x468] sm:$0xff]  ;;  %10513 = vst [vmem:[#allocation285_spill] sm:$0xff] %v8272_v0 }
 0x254   :  { %4436 = vmatpush1.bf16.msra.mxu1 %v8236_v19  ;;  %4355 = vmatprep.subr.bf16.mxu0 %v8238_v15  ;;  %10510 = vst [vmem:[#allocation282_spill] sm:$0xff] %v8262_v8  ;;  %v1085_v15 = vld [vmem:[#allocation7 + $0x460] sm:$0xff]  ;;  %v1078_v19 = vld [vmem:[#allocation7 + $0x428] sm:$0xff]  ;;  %10512 = vst [vmem:[#allocation284_spill] sm:$0xff] %v8268_v52 }
 0x255   :  { %4437 = vmatprep.subr.bf16.mxu1 %v8241_v53  ;;  %v1077_v53 = vld [vmem:[#allocation7 + $0x420] sm:$0xff]  ;;  %v8277_v28 = vcombine.high %v1078_v19, %v1086_v37  ;;  %v8284_v60 = vcombine.low %v1078_v19, %v1086_v37 }
 0x256   :  { %v8274_v25 = vcombine.high %v1077_v53, %v1085_v15  ;;  %v8280_v3 = vcombine.low %v1077_v53, %v1085_v15 }
 0x257   :  { %4356 = vmatpush1.bf16.msra.mxu0 %v8244_v20  ;;  %10515 = vst [vmem:[#allocation287_spill] sm:$0xff] %v8277_v28  ;;  %v1102_v20 = vld [vmem:[#allocation7 + $0x4e8] sm:$0xff]  ;;  %10517 = vst [vmem:[#allocation289_spill] sm:$0xff] %v8284_v60 }
 0x258   :  { %4438 = vmatpush1.bf16.msra.mxu1 %v8248_v24  ;;  %4357 = vmatprep.subr.bf16.mxu0 %v8250_v6  ;;  %10514 = vst [vmem:[#allocation286_spill] sm:$0xff] %v8274_v25  ;;  %v1101_v6 = vld [vmem:[#allocation7 + $0x4e0] sm:$0xff]  ;;  %v1094_v24 = vld [vmem:[#allocation7 + $0x4a8] sm:$0xff]  ;;  %10516 = vst [vmem:[#allocation288_spill] sm:$0xff] %v8280_v3 }
 0x259   :  { %4439 = vmatprep.subr.bf16.mxu1 %v8253_v2  ;;  %v1093_v2 = vld [vmem:[#allocation7 + $0x4a0] sm:$0xff]  ;;  %v8289_v21 = vcombine.high %v1094_v24, %v1102_v20  ;;  %v8296_v37 = vcombine.low %v1094_v24, %v1102_v20 }
 0x25a   :  { %v8286_v23 = vcombine.high %v1093_v2, %v1101_v6  ;;  %v8292_v15 = vcombine.low %v1093_v2, %v1101_v6 }
 0x25b   :  { %4358 = vmatpush1.bf16.msra.mxu0 %v8256_v13  ;;  %10519 = vst [vmem:[#allocation291_spill] sm:$0xff] %v8289_v21  ;;  %v1118_v13 = vld [vmem:[#allocation7 + $0x568] sm:$0xff]  ;;  %10521 = vst [vmem:[#allocation293_spill] sm:$0xff] %v8296_v37 }
 0x25c   :  { %4440 = vmatpush1.bf16.msra.mxu1 %v8260_v45  ;;  %4359 = vmatprep.subr.bf16.mxu0 %v8262_v8  ;;  %10518 = vst [vmem:[#allocation290_spill] sm:$0xff] %v8286_v23  ;;  %v1117_v8 = vld [vmem:[#allocation7 + $0x560] sm:$0xff]  ;;  %v1110_v45 = vld [vmem:[#allocation7 + $0x528] sm:$0xff]  ;;  %10520 = vst [vmem:[#allocation292_spill] sm:$0xff] %v8292_v15 }
 0x25d   :  { %4441 = vmatprep.subr.bf16.mxu1 %v8265_v40  ;;  %v1109_v40 = vld [vmem:[#allocation7 + $0x520] sm:$0xff]  ;;  %v8301_v53 = vcombine.high %v1110_v45, %v1118_v13  ;;  %v8308_v20 = vcombine.low %v1110_v45, %v1118_v13 }
 0x25e   :  { %v8298_v19 = vcombine.high %v1109_v40, %v1117_v8  ;;  %v8304_v6 = vcombine.low %v1109_v40, %v1117_v8 }
 0x25f   :  { %4360 = vmatpush1.bf16.msra.mxu0 %v8268_v52  ;;  %10523 = vst [vmem:[#allocation295_spill] sm:$0xff] %v8301_v53  ;;  %v1134_v52 = vld [vmem:[#allocation7 + $0x5e8] sm:$0xff]  ;;  %10525 = vst [vmem:[#allocation297_spill] sm:$0xff] %v8308_v20 }
 0x260   :  { %4442 = vmatpush1.bf16.msra.mxu1 %v8272_v0  ;;  %4361 = vmatprep.subr.bf16.mxu0 %v8274_v25  ;;  %10522 = vst [vmem:[#allocation294_spill] sm:$0xff] %v8298_v19  ;;  %v1133_v25 = vld [vmem:[#allocation7 + $0x5e0] sm:$0xff]  ;;  %v1126_v0 = vld [vmem:[#allocation7 + $0x5a8] sm:$0xff]  ;;  %10524 = vst [vmem:[#allocation296_spill] sm:$0xff] %v8304_v6 }
 0x261   :  { %4443 = vmatprep.subr.bf16.mxu1 %v8277_v28  ;;  %v1125_v28 = vld [vmem:[#allocation7 + $0x5a0] sm:$0xff]  ;;  %v8313_v2 = vcombine.high %v1126_v0, %v1134_v52  ;;  %v8320_v13 = vcombine.low %v1126_v0, %v1134_v52 }
 0x262   :  { %v8310_v24 = vcombine.high %v1125_v28, %v1133_v25  ;;  %v8316_v8 = vcombine.low %v1125_v28, %v1133_v25 }
 0x263   :  { %4362 = vmatpush1.bf16.msra.mxu0 %v8280_v3  ;;  %10527 = vst [vmem:[#allocation299_spill] sm:$0xff] %v8313_v2  ;;  %v1150_v3 = vld [vmem:[#allocation7 + $0x668] sm:$0xff]  ;;  %10529 = vst [vmem:[#allocation301_spill] sm:$0xff] %v8320_v13 }
 0x264   :  { %4444 = vmatpush1.bf16.msra.mxu1 %v8284_v60  ;;  %4363 = vmatprep.subr.bf16.mxu0 %v8286_v23  ;;  %10526 = vst [vmem:[#allocation298_spill] sm:$0xff] %v8310_v24  ;;  %v1149_v23 = vld [vmem:[#allocation7 + $0x660] sm:$0xff]  ;;  %v1142_v60 = vld [vmem:[#allocation7 + $0x628] sm:$0xff]  ;;  %10528 = vst [vmem:[#allocation300_spill] sm:$0xff] %v8316_v8 }
 0x265   :  { %4445 = vmatprep.subr.bf16.mxu1 %v8289_v21  ;;  %v1141_v21 = vld [vmem:[#allocation7 + $0x620] sm:$0xff]  ;;  %v8325_v40 = vcombine.high %v1142_v60, %v1150_v3  ;;  %v8332_v52 = vcombine.low %v1142_v60, %v1150_v3 }
 0x266   :  { %v8322_v45 = vcombine.high %v1141_v21, %v1149_v23  ;;  %v8328_v25 = vcombine.low %v1141_v21, %v1149_v23 }
 0x267   :  { %4364 = vmatpush1.bf16.msra.mxu0 %v8292_v15  ;;  %10531 = vst [vmem:[#allocation303_spill] sm:$0xff] %v8325_v40  ;;  %v1166_v15 = vld [vmem:[#allocation7 + $0x6e8] sm:$0xff]  ;;  %10533 = vst [vmem:[#allocation305_spill] sm:$0xff] %v8332_v52 }
 0x268   :  { %4446 = vmatpush1.bf16.msra.mxu1 %v8296_v37  ;;  %4365 = vmatprep.subr.bf16.mxu0 %v8298_v19  ;;  %10530 = vst [vmem:[#allocation302_spill] sm:$0xff] %v8322_v45  ;;  %v1165_v19 = vld [vmem:[#allocation7 + $0x6e0] sm:$0xff]  ;;  %v1158_v37 = vld [vmem:[#allocation7 + $0x6a8] sm:$0xff]  ;;  %10532 = vst [vmem:[#allocation304_spill] sm:$0xff] %v8328_v25 }
 0x269   :  { %4447 = vmatprep.subr.bf16.mxu1 %v8301_v53  ;;  %v1157_v53 = vld [vmem:[#allocation7 + $0x6a0] sm:$0xff]  ;;  %v8337_v28 = vcombine.high %v1158_v37, %v1166_v15  ;;  %v8344_v3 = vcombine.low %v1158_v37, %v1166_v15 }
 0x26a   :  { %v8334_v0 = vcombine.high %v1157_v53, %v1165_v19  ;;  %v8340_v23 = vcombine.low %v1157_v53, %v1165_v19 }
 0x26b   :  { %4366 = vmatpush1.bf16.msra.mxu0 %v8304_v6  ;;  %10535 = vst [vmem:[#allocation307_spill] sm:$0xff] %v8337_v28  ;;  %v1182_v6 = vld [vmem:[#allocation7 + $0x768] sm:$0xff]  ;;  %10537 = vst [vmem:[#allocation309_spill] sm:$0xff] %v8344_v3 }
 0x26c   :  { %4448 = vmatpush1.bf16.msra.mxu1 %v8308_v20  ;;  %4367 = vmatprep.subr.bf16.mxu0 %v8310_v24  ;;  %10534 = vst [vmem:[#allocation306_spill] sm:$0xff] %v8334_v0  ;;  %v1181_v24 = vld [vmem:[#allocation7 + $0x760] sm:$0xff]  ;;  %v1174_v20 = vld [vmem:[#allocation7 + $0x728] sm:$0xff]  ;;  %10536 = vst [vmem:[#allocation308_spill] sm:$0xff] %v8340_v23 }
 0x26d   :  { %4449 = vmatprep.subr.bf16.mxu1 %v8313_v2  ;;  %v1173_v2 = vld [vmem:[#allocation7 + $0x720] sm:$0xff]  ;;  %v8349_v21 = vcombine.high %v1174_v20, %v1182_v6  ;;  %v8356_v15 = vcombine.low %v1174_v20, %v1182_v6 }
 0x26e   :  { %v8346_v60 = vcombine.high %v1173_v2, %v1181_v24  ;;  %v8352_v19 = vcombine.low %v1173_v2, %v1181_v24 }
 0x26f   :  { %4368 = vmatpush1.bf16.msra.mxu0 %v8316_v8  ;;  %10539 = vst [vmem:[#allocation311_spill] sm:$0xff] %v8349_v21  ;;  %v1198_v8 = vld [vmem:[#allocation7 + $0x7e8] sm:$0xff]  ;;  %10541 = vst [vmem:[#allocation313_spill] sm:$0xff] %v8356_v15 }
 0x270   :  { %4450 = vmatpush1.bf16.msra.mxu1 %v8320_v13  ;;  %4369 = vmatprep.subr.bf16.mxu0 %v8322_v45  ;;  %10538 = vst [vmem:[#allocation310_spill] sm:$0xff] %v8346_v60  ;;  %v1197_v45 = vld [vmem:[#allocation7 + $0x7e0] sm:$0xff]  ;;  %v1190_v13 = vld [vmem:[#allocation7 + $0x7a8] sm:$0xff]  ;;  %10540 = vst [vmem:[#allocation312_spill] sm:$0xff] %v8352_v19 }
 0x271   :  { %4451 = vmatprep.subr.bf16.mxu1 %v8325_v40  ;;  %v1189_v40 = vld [vmem:[#allocation7 + $0x7a0] sm:$0xff]  ;;  %v8361_v53 = vcombine.high %v1190_v13, %v1198_v8  ;;  %v8368_v6 = vcombine.low %v1190_v13, %v1198_v8 }
 0x272   :  { %v8358_v37 = vcombine.high %v1189_v40, %v1197_v45  ;;  %v8364_v24 = vcombine.low %v1189_v40, %v1197_v45  ;;  %v1222_v45 = vld [vmem:[#allocation7 + $0x8a8] sm:$0xff] }
 0x273   :  { %4370 = vmatpush1.bf16.msra.mxu0 %v8328_v25  ;;  %10543 = vst [vmem:[#allocation315_spill] sm:$0xff] %v8361_v53  ;;  %v1214_v25 = vld [vmem:[#allocation7 + $0x868] sm:$0xff]  ;;  %10545 = vst [vmem:[#allocation317_spill] sm:$0xff] %v8368_v6 }
 0x274   :  { %4452 = vmatpush1.bf16.msra.mxu1 %v8332_v52  ;;  %4371 = vmatprep.subr.bf16.mxu0 %v8334_v0  ;;  %10542 = vst [vmem:[#allocation314_spill] sm:$0xff] %v8358_v37  ;;  %v1213_v0 = vld [vmem:[#allocation7 + $0x860] sm:$0xff]  ;;  %v1206_v52 = vld [vmem:[#allocation7 + $0x828] sm:$0xff]  ;;  %10544 = vst [vmem:[#allocation316_spill] sm:$0xff] %v8364_v24 }
 0x275   :  { %4453 = vmatprep.subr.bf16.mxu1 %v8337_v28  ;;  %v1205_v28 = vld [vmem:[#allocation7 + $0x820] sm:$0xff]  ;;  %v8373_v2 = vcombine.high %v1206_v52, %v1214_v25  ;;  %v1230_v40 = vld [vmem:[#allocation7 + $0x8e8] sm:$0xff]  ;;  %v8380_v8 = vcombine.low %v1206_v52, %v1214_v25 }
 0x276   :  { %v8370_v20 = vcombine.high %v1205_v28, %v1213_v0  ;;  %v8394_v25 = vcombine.low %v1222_v45, %v1230_v40 }
 0x277   :  { %4372 = vmatpush1.bf16.msra.mxu0 %v8340_v23  ;;  %10547 = vst [vmem:[#allocation319_spill] sm:$0xff] %v8373_v2  ;;  %10549 = vst [vmem:[#allocation321_spill] sm:$0xff] %v8380_v8  ;;  %v1278_v23 = vld [vmem:[#allocation7 + $0xa68] sm:$0xff] }
 0x278   :  { %4454 = vmatpush1.bf16.msra.mxu1 %v8344_v3  ;;  %4373 = vmatprep.subr.bf16.mxu0 %v8346_v60  ;;  %10546 = vst [vmem:[#allocation318_spill] sm:$0xff] %v8370_v20  ;;  %v1229_v60 = vld [vmem:[#allocation7 + $0x8e0] sm:$0xff]  ;;  %v8376_v3 = vcombine.low %v1205_v28, %v1213_v0  ;;  %v1238_v0 = vld [vmem:[#allocation7 + $0x928] sm:$0xff]  ;;  %10553 = vst [vmem:[#allocation325_spill] sm:$0xff] %v8394_v25 }
 0x279   :  { %4455 = vmatprep.subr.bf16.mxu1 %v8349_v21  ;;  %v1221_v21 = vld [vmem:[#allocation7 + $0x8a0] sm:$0xff]  ;;  %v1246_v28 = vld [vmem:[#allocation7 + $0x968] sm:$0xff] }
 0x27a   :  { %10548 = vst [vmem:[#allocation320_spill] sm:$0xff] %v8376_v3  ;;  %v8383_v13 = vcombine.high %v1221_v21, %v1229_v60 }
 0x27b   :  { %4374 = vmatpush1.bf16.msra.mxu0 %v8352_v19  ;;  %v1270_v19 = vld [vmem:[#allocation7 + $0xa28] sm:$0xff] }
 0x27c   :  { %4456 = vmatpush1.bf16.msra.mxu1 %v8356_v15  ;;  %4375 = vmatprep.subr.bf16.mxu0 %v8358_v37  ;;  %10550 = vst [vmem:[#allocation322_spill] sm:$0xff] %v8383_v13  ;;  %v1245_v37 = vld [vmem:[#allocation7 + $0x960] sm:$0xff]  ;;  %v8386_v15 = vcombine.high %v1222_v45, %v1230_v40  ;;  %v8408_v45 = vcombine.low %v1238_v0, %v1246_v28 }
 0x27d   :  { %4457 = vmatprep.subr.bf16.mxu1 %v8361_v53  ;;  %v1237_v53 = vld [vmem:[#allocation7 + $0x920] sm:$0xff] }
 0x27e   :  { %10551 = vst [vmem:[#allocation323_spill] sm:$0xff] %v8386_v15  ;;  %v8396_v52 = vcombine.high %v1237_v53, %v1245_v37  ;;  %10557 = vst [vmem:[#allocation329_spill] sm:$0xff] %v8408_v45 }
 0x27f   :  { %4376 = vmatpush1.bf16.msra.mxu0 %v8364_v24  ;;  %v1261_v24 = vld [vmem:[#allocation7 + $0x9e0] sm:$0xff] }
 0x280   :  { %4458 = vmatpush1.bf16.msra.mxu1 %v8368_v6  ;;  %4386 = vmatprep.subr.bf16.mxu0 %v8370_v20  ;;  %v8390_v6 = vcombine.low %v1221_v21, %v1229_v60  ;;  %10554 = vst [vmem:[#allocation326_spill] sm:$0xff] %v8396_v52  ;;  %v1253_v20 = vld [vmem:[#allocation7 + $0x9a0] sm:$0xff]  ;;  %v1254_v60 = vld [vmem:[#allocation7 + $0x9a8] sm:$0xff] }
 0x281   :  { %4468 = vmatprep.subr.bf16.mxu1 %v8373_v2  ;;  %v8400_v2 = vcombine.high %v1238_v0, %v1246_v28  ;;  %v1262_v21 = vld [vmem:[#allocation7 + $0x9e8] sm:$0xff]  ;;  %v8410_v40 = vcombine.high %v1253_v20, %v1261_v24  ;;  %v8425_v28 = vcombine.high %v1270_v19, %v1278_v23 }
 0x282   :  { %4378 = vmatmul.mubr.bf16.vlgmr.msra.gmra.mrb[24].mxu0 %v7582_v48  ;;  %10552 = vst [vmem:[#allocation324_spill] sm:$0xff] %v8390_v6 }
 0x283   :  { %4460 = vmatmul.mubr.bf16.vlgmr.msra.gmra.mrb[24].mxu1 %v7582_v48  ;;  %4387 = vmatpush1.bf16.msra.mxu0 %v8376_v3  ;;  %10555 = vst [vmem:[#allocation327_spill] sm:$0xff] %v8400_v2  ;;  %v8404_v3 = vcombine.low %v1237_v53, %v1245_v37  ;;  %10558 = vst [vmem:[#allocation330_spill] sm:$0xff] %v8410_v40  ;;  %v8416_v37 = vcombine.low %v1253_v20, %v1261_v24 }
 0x284   :  { %4418 = vmatprep.mubr.bf16.mxu0 %v7607_v62  ;;  %4469 = vmatpush1.bf16.msra.mxu1 %v8380_v8  ;;  %v1269_v8 = vld [vmem:[#allocation7 + $0xa20] sm:$0xff]  ;;  %v8420_v53 = vcombine.low %v1254_v60, %v1262_v21  ;;  %10563 = vst [vmem:[#allocation335_spill] sm:$0xff] %v8425_v28  ;;  %v8432_v20 = vcombine.low %v1270_v19, %v1278_v23 }
 0x285   :  { %4500 = vmatprep.mubr.bf16.mxu1 %v7607_v62  ;;  %4388 = vmatprep.subr.bf16.mxu0 %v8383_v13  ;;  %10556 = vst [vmem:[#allocation328_spill] sm:$0xff] %v8404_v3  ;;  %v8413_v13 = vcombine.high %v1254_v60, %v1262_v21  ;;  %10560 = vst [vmem:[#allocation332_spill] sm:$0xff] %v8416_v37 }
 0x286   :  { %4470 = vmatprep.subr.bf16.mxu1 %v8386_v15  ;;  %v1277_v15 = vld [vmem:[#allocation7 + $0xa60] sm:$0xff]  ;;  %10561 = vst [vmem:[#allocation333_spill] sm:$0xff] %v8420_v53  ;;  %10565 = vst [vmem:[#allocation337_spill] sm:$0xff] %v8432_v20 }
 0x287   :  { %4389 = vmatpush1.bf16.msra.mxu0 %v8390_v6  ;;  %10559 = vst [vmem:[#allocation331_spill] sm:$0xff] %v8413_v13  ;;  %v8422_v0 = vcombine.high %v1269_v8, %v1277_v15  ;;  %v1294_v6 = vld [vmem:[#allocation7 + $0xae8] sm:$0xff]  ;;  %v8428_v24 = vcombine.low %v1269_v8, %v1277_v15 }
 0x288   :  { %4471 = vmatpush1.bf16.msra.mxu1 %v8394_v25  ;;  %4390 = vmatprep.subr.bf16.mxu0 %v8396_v52  ;;  %v1293_v52 = vld [vmem:[#allocation7 + $0xae0] sm:$0xff]  ;;  %v1286_v25 = vld [vmem:[#allocation7 + $0xaa8] sm:$0xff] }
 0x289   :  { %4472 = vmatprep.subr.bf16.mxu1 %v8400_v2  ;;  %10562 = vst [vmem:[#allocation334_spill] sm:$0xff] %v8422_v0  ;;  %v1285_v2 = vld [vmem:[#allocation7 + $0xaa0] sm:$0xff]  ;;  %10564 = vst [vmem:[#allocation336_spill] sm:$0xff] %v8428_v24  ;;  %v8437_v21 = vcombine.high %v1286_v25, %v1294_v6  ;;  %v8444_v23 = vcombine.low %v1286_v25, %v1294_v6 }
 0x28a   :  { %v8434_v60 = vcombine.high %v1285_v2, %v1293_v52  ;;  %v8440_v15 = vcombine.low %v1285_v2, %v1293_v52 }
 0x28b   :  { %4391 = vmatpush1.bf16.msra.mxu0 %v8404_v3  ;;  %10567 = vst [vmem:[#allocation339_spill] sm:$0xff] %v8437_v21  ;;  %v1310_v3 = vld [vmem:[#allocation7 + $0xb68] sm:$0xff]  ;;  %10569 = vst [vmem:[#allocation341_spill] sm:$0xff] %v8444_v23 }
 0x28c   :  { %4473 = vmatpush1.bf16.msra.mxu1 %v8408_v45  ;;  %4392 = vmatprep.subr.bf16.mxu0 %v8410_v40  ;;  %10566 = vst [vmem:[#allocation338_spill] sm:$0xff] %v8434_v60  ;;  %v1309_v40 = vld [vmem:[#allocation7 + $0xb60] sm:$0xff]  ;;  %v1302_v45 = vld [vmem:[#allocation7 + $0xb28] sm:$0xff]  ;;  %10568 = vst [vmem:[#allocation340_spill] sm:$0xff] %v8440_v15 }
 0x28d   :  { %4474 = vmatprep.subr.bf16.mxu1 %v8413_v13  ;;  %v1301_v13 = vld [vmem:[#allocation7 + $0xb20] sm:$0xff]  ;;  %v8464_v44 = vcombine.low %v1302_v45, %v1310_v3 }
 0x28e   :  { %v8446_v19 = vcombine.high %v1301_v13, %v1309_v40 }
 0x28f   :  { %4393 = vmatpush1.bf16.msra.mxu0 %v8416_v37  ;;  %v8460_v37 = vcombine.low %v1301_v13, %v1309_v40  ;;  %10577 = vst [vmem:[#allocation349_spill] sm:$0xff] %v8464_v44  ;;  %v1349_v40 = vld [vmem:[#allocation7 + $0xca0] sm:$0xff] }
 0x290   :  { %4475 = vmatpush1.bf16.msra.mxu1 %v8420_v53  ;;  %4394 = vmatprep.subr.bf16.mxu0 %v8422_v0  ;;  %10570 = vst [vmem:[#allocation342_spill] sm:$0xff] %v8446_v19  ;;  %v8453_v0 = vcombine.high %v1302_v45, %v1310_v3  ;;  %v1317_v53 = vld [vmem:[#allocation7 + $0xba0] sm:$0xff] }
 0x291   :  { %4476 = vmatprep.subr.bf16.mxu1 %v8425_v28  ;;  %10576 = vst [vmem:[#allocation348_spill] sm:$0xff] %v8460_v37 }
 0x292   :  { %10573 = vst [vmem:[#allocation345_spill] sm:$0xff] %v8453_v0 }
 0x293   :  { %4395 = vmatpush1.bf16.msra.mxu0 %v8428_v24  ;;  %v1325_v24 = vld [vmem:[#allocation7 + $0xbe0] sm:$0xff] }
 0x294   :  { %4477 = vmatpush1.bf16.msra.mxu1 %v8432_v20  ;;  %4396 = vmatprep.subr.bf16.mxu0 %v8434_v60  ;;  %v1318_v20 = vld [vmem:[#allocation7 + $0xba8] sm:$0xff]  ;;  %v8472_v13 = vcombine.low %v1317_v53, %v1325_v24 }
 0x295   :  { %v8448_v8 = vpop.f32.mrb[16].mxu0  ;;  %v8450_v28 = vpop.f32.mrb[16].mxu1  ;;  %4478 = vmatprep.subr.bf16.mxu1 %v8437_v21  ;;  %v1326_v60 = vld [vmem:[#allocation7 + $0xbe8] sm:$0xff] }
 0x296   :  { %10571 = vst [vmem:[#allocation343_spill] sm:$0xff] %v8448_v8  ;;  %10572 = vst [vmem:[#allocation344_spill] sm:$0xff] %v8450_v28  ;;  %v8455_v2 = vpop.f32.mrb[17].mxu0  ;;  %v8457_v52 = vpop.f32.mrb[17].mxu1  ;;  %v8466_v28 = vcombine.high %v1317_v53, %v1325_v24 }
 0x297   :  { %10574 = vst [vmem:[#allocation346_spill] sm:$0xff] %v8455_v2  ;;  %10575 = vst [vmem:[#allocation347_spill] sm:$0xff] %v8457_v52  ;;  %v4096_v6 = vpop.f32.mrb[18].mxu0  ;;  %v4178_v25 = vpop.f32.mrb[18].mxu1  ;;  %4397 = vmatpush1.bf16.msra.mxu0 %v8440_v15  ;;  %v8469_v52 = vcombine.high %v1318_v20, %v1326_v60  ;;  %v1334_v2 = vld [vmem:[#allocation7 + $0xc28] sm:$0xff] }
 0x298   :  { %4479 = vmatpush1.bf16.msra.mxu1 %v8444_v23  ;;  %v4097_v5 = vpop.f32.mrb[19].mxu0  ;;  %v4179_v21 = vpop.f32.mrb[19].mxu1  ;;  %4398 = vmatprep.subr.bf16.mxu0 %v8446_v19  ;;  %10578 = vst [vmem:[#allocation350_spill] sm:$0xff] %v8466_v28  ;;  %v1333_v6 = vld [vmem:[#allocation7 + $0xc20] sm:$0xff]  ;;  %v1342_v15 = vld [vmem:[#allocation7 + $0xc68] sm:$0xff]  ;;  %10580 = vst [vmem:[#allocation352_spill] sm:$0xff] %v8472_v13 }
 0x299   :  { %4480 = vmatprep.subr.bf16.mxu1 %v8453_v0  ;;  %10579 = vst [vmem:[#allocation351_spill] sm:$0xff] %v8469_v52  ;;  %v1341_v25 = vld [vmem:[#allocation7 + $0xc60] sm:$0xff]  ;;  %v8476_v5 = vcombine.low %v1318_v20, %v1326_v60  ;;  %v8481_v45 = vcombine.high %v1334_v2, %v1342_v15  ;;  %v1350_v0 = vld [vmem:[#allocation7 + $0xca8] sm:$0xff]  ;;  %v8488_v24 = vcombine.low %v1334_v2, %v1342_v15 }
 0x29a   :  { %v8478_v3 = vcombine.high %v1333_v6, %v1341_v25  ;;  %v1357_v21 = vld [vmem:[#allocation7 + $0xce0] sm:$0xff]  ;;  %v1358_v19 = vld [vmem:[#allocation7 + $0xce8] sm:$0xff]  ;;  %v8484_v53 = vcombine.low %v1333_v6, %v1341_v25 }
 0x29b   :  { %4399 = vmatpush1.bf16.msra.mxu0 %v8460_v37  ;;  %10581 = vst [vmem:[#allocation353_spill] sm:$0xff] %v8476_v5  ;;  %10583 = vst [vmem:[#allocation355_spill] sm:$0xff] %v8481_v45  ;;  %v8490_v20 = vcombine.high %v1349_v40, %v1357_v21  ;;  %v8493_v60 = vcombine.high %v1350_v0, %v1358_v19  ;;  %v1374_v37 = vld [vmem:[#allocation7 + $0xd68] sm:$0xff]  ;;  %v8496_v6 = vcombine.low %v1349_v40, %v1357_v21 }
 0x29c   :  { %4481 = vmatpush1.bf16.msra.mxu1 %v8464_v44  ;;  %4400 = vmatprep.subr.bf16.mxu0 %v8466_v28  ;;  %10582 = vst [vmem:[#allocation354_spill] sm:$0xff] %v8478_v3  ;;  %10584 = vst [vmem:[#allocation356_spill] sm:$0xff] %v8484_v53  ;;  %v1373_v28 = vld [vmem:[#allocation7 + $0xd60] sm:$0xff]  ;;  %v1366_v44 = vld [vmem:[#allocation7 + $0xd28] sm:$0xff]  ;;  %v8500_v15 = vcombine.low %v1350_v0, %v1358_v19 }
 0x29d   :  { %4482 = vmatprep.subr.bf16.mxu1 %v8469_v52  ;;  %10585 = vst [vmem:[#allocation357_spill] sm:$0xff] %v8488_v24  ;;  %10586 = vst [vmem:[#allocation358_spill] sm:$0xff] %v8490_v20  ;;  %v1365_v52 = vld [vmem:[#allocation7 + $0xd20] sm:$0xff]  ;;  %v8505_v25 = vcombine.high %v1366_v44, %v1374_v37  ;;  %v8512_v0 = vcombine.low %v1366_v44, %v1374_v37 }
 0x29e   :  { %10587 = vst [vmem:[#allocation359_spill] sm:$0xff] %v8493_v60  ;;  %10588 = vst [vmem:[#allocation360_spill] sm:$0xff] %v8496_v6  ;;  %v8502_v2 = vcombine.high %v1365_v52, %v1373_v28  ;;  %v8508_v40 = vcombine.low %v1365_v52, %v1373_v28 }
 0x29f   :  { %4401 = vmatpush1.bf16.msra.mxu0 %v8472_v13  ;;  %10589 = vst [vmem:[#allocation361_spill] sm:$0xff] %v8500_v15  ;;  %10591 = vst [vmem:[#allocation363_spill] sm:$0xff] %v8505_v25  ;;  %v1390_v13 = vld [vmem:[#allocation7 + $0xde8] sm:$0xff] }
 0x2a0   :  { %4483 = vmatpush1.bf16.msra.mxu1 %v8476_v5  ;;  %4402 = vmatprep.subr.bf16.mxu0 %v8478_v3  ;;  %10590 = vst [vmem:[#allocation362_spill] sm:$0xff] %v8502_v2  ;;  %v1389_v3 = vld [vmem:[#allocation7 + $0xde0] sm:$0xff]  ;;  %v1382_v5 = vld [vmem:[#allocation7 + $0xda8] sm:$0xff]  ;;  %10592 = vst [vmem:[#allocation364_spill] sm:$0xff] %v8508_v40 }
 0x2a1   :  { %4484 = vmatprep.subr.bf16.mxu1 %v8481_v45  ;;  %v1381_v45 = vld [vmem:[#allocation7 + $0xda0] sm:$0xff]  ;;  %10593 = vst [vmem:[#allocation365_spill] sm:$0xff] %v8512_v0  ;;  %v8517_v21 = vcombine.high %v1382_v5, %v1390_v13  ;;  %v8524_v44 = vcombine.low %v1382_v5, %v1390_v13 }
 0x2a2   :  { %v8514_v19 = vcombine.high %v1381_v45, %v1389_v3  ;;  %v8520_v28 = vcombine.low %v1381_v45, %v1389_v3 }
 0x2a3   :  { %4403 = vmatpush1.bf16.msra.mxu0 %v8484_v53  ;;  %10595 = vst [vmem:[#allocation367_spill] sm:$0xff] %v8517_v21  ;;  %v1406_v53 = vld [vmem:[#allocation7 + $0xe68] sm:$0xff]  ;;  %10597 = vst [vmem:[#allocation369_spill] sm:$0xff] %v8524_v44 }
 0x2a4   :  { %4485 = vmatpush1.bf16.msra.mxu1 %v8488_v24  ;;  %4404 = vmatprep.subr.bf16.mxu0 %v8490_v20  ;;  %10594 = vst [vmem:[#allocation366_spill] sm:$0xff] %v8514_v19  ;;  %v1405_v20 = vld [vmem:[#allocation7 + $0xe60] sm:$0xff]  ;;  %v1398_v24 = vld [vmem:[#allocation7 + $0xe28] sm:$0xff]  ;;  %10596 = vst [vmem:[#allocation368_spill] sm:$0xff] %v8520_v28 }
 0x2a5   :  { %4486 = vmatprep.subr.bf16.mxu1 %v8493_v60  ;;  %v1397_v60 = vld [vmem:[#allocation7 + $0xe20] sm:$0xff]  ;;  %v8529_v52 = vcombine.high %v1398_v24, %v1406_v53  ;;  %v8536_v13 = vcombine.low %v1398_v24, %v1406_v53 }
 0x2a6   :  { %v8526_v37 = vcombine.high %v1397_v60, %v1405_v20  ;;  %v8532_v3 = vcombine.low %v1397_v60, %v1405_v20 }
 0x2a7   :  { %4405 = vmatpush1.bf16.msra.mxu0 %v8496_v6  ;;  %10599 = vst [vmem:[#allocation371_spill] sm:$0xff] %v8529_v52  ;;  %v1422_v6 = vld [vmem:[#allocation7 + $0xee8] sm:$0xff]  ;;  %10601 = vst [vmem:[#allocation373_spill] sm:$0xff] %v8536_v13 }
 0x2a8   :  { %4487 = vmatpush1.bf16.msra.mxu1 %v8500_v15  ;;  %4406 = vmatprep.subr.bf16.mxu0 %v8502_v2  ;;  %10598 = vst [vmem:[#allocation370_spill] sm:$0xff] %v8526_v37  ;;  %v1421_v2 = vld [vmem:[#allocation7 + $0xee0] sm:$0xff]  ;;  %v1414_v15 = vld [vmem:[#allocation7 + $0xea8] sm:$0xff]  ;;  %10600 = vst [vmem:[#allocation372_spill] sm:$0xff] %v8532_v3 }
 0x2a9   :  { %4488 = vmatprep.subr.bf16.mxu1 %v8505_v25  ;;  %v1413_v25 = vld [vmem:[#allocation7 + $0xea0] sm:$0xff]  ;;  %v8541_v45 = vcombine.high %v1414_v15, %v1422_v6  ;;  %v8548_v53 = vcombine.low %v1414_v15, %v1422_v6 }
 0x2aa   :  { %v8538_v5 = vcombine.high %v1413_v25, %v1421_v2  ;;  %v8544_v20 = vcombine.low %v1413_v25, %v1421_v2 }
 0x2ab   :  { %4407 = vmatpush1.bf16.msra.mxu0 %v8508_v40  ;;  %10603 = vst [vmem:[#allocation375_spill] sm:$0xff] %v8541_v45  ;;  %v1438_v40 = vld [vmem:[#allocation7 + $0xf68] sm:$0xff]  ;;  %10605 = vst [vmem:[#allocation377_spill] sm:$0xff] %v8548_v53 }
 0x2ac   :  { %4489 = vmatpush1.bf16.msra.mxu1 %v8512_v0  ;;  %4408 = vmatprep.subr.bf16.mxu0 %v8514_v19  ;;  %10602 = vst [vmem:[#allocation374_spill] sm:$0xff] %v8538_v5  ;;  %v1437_v19 = vld [vmem:[#allocation7 + $0xf60] sm:$0xff]  ;;  %v1430_v0 = vld [vmem:[#allocation7 + $0xf28] sm:$0xff]  ;;  %10604 = vst [vmem:[#allocation376_spill] sm:$0xff] %v8544_v20 }
 0x2ad   :  { %4490 = vmatprep.subr.bf16.mxu1 %v8517_v21  ;;  %v1429_v21 = vld [vmem:[#allocation7 + $0xf20] sm:$0xff]  ;;  %v8553_v60 = vcombine.high %v1430_v0, %v1438_v40  ;;  %v8560_v6 = vcombine.low %v1430_v0, %v1438_v40 }
 0x2ae   :  { %v8550_v24 = vcombine.high %v1429_v21, %v1437_v19  ;;  %v8556_v2 = vcombine.low %v1429_v21, %v1437_v19 }
 0x2af   :  { %4409 = vmatpush1.bf16.msra.mxu0 %v8520_v28  ;;  %10607 = vst [vmem:[#allocation379_spill] sm:$0xff] %v8553_v60  ;;  %v1454_v28 = vld [vmem:[#allocation7 + $0xfe8] sm:$0xff]  ;;  %10609 = vst [vmem:[#allocation381_spill] sm:$0xff] %v8560_v6 }
 0x2b0   :  { %4491 = vmatpush1.bf16.msra.mxu1 %v8524_v44  ;;  %4410 = vmatprep.subr.bf16.mxu0 %v8526_v37  ;;  %10606 = vst [vmem:[#allocation378_spill] sm:$0xff] %v8550_v24  ;;  %v1453_v37 = vld [vmem:[#allocation7 + $0xfe0] sm:$0xff]  ;;  %v1446_v44 = vld [vmem:[#allocation7 + $0xfa8] sm:$0xff]  ;;  %10608 = vst [vmem:[#allocation380_spill] sm:$0xff] %v8556_v2 }
 0x2b1   :  { %4492 = vmatprep.subr.bf16.mxu1 %v8529_v52  ;;  %v1445_v52 = vld [vmem:[#allocation7 + $0xfa0] sm:$0xff]  ;;  %v8565_v25 = vcombine.high %v1446_v44, %v1454_v28  ;;  %v8572_v40 = vcombine.low %v1446_v44, %v1454_v28 }
 0x2b2   :  { %v8562_v15 = vcombine.high %v1445_v52, %v1453_v37  ;;  %v8568_v19 = vcombine.low %v1445_v52, %v1453_v37  ;;  %v968_v37 = vld [vmem:[#allocation7 + $0xb8] sm:$0xff] }
 0x2b3   :  { %4411 = vmatpush1.bf16.msra.mxu0 %v8532_v3  ;;  %10611 = vst [vmem:[#allocation383_spill] sm:$0xff] %v8565_v25  ;;  %v960_v3 = vld [vmem:[#allocation7 + $0x78] sm:$0xff]  ;;  %10613 = vst [vmem:[#allocation385_spill] sm:$0xff] %v8572_v40 }
 0x2b4   :  { %4493 = vmatpush1.bf16.msra.mxu1 %v8536_v13  ;;  %4412 = vmatprep.subr.bf16.mxu0 %v8538_v5  ;;  %10610 = vst [vmem:[#allocation382_spill] sm:$0xff] %v8562_v15  ;;  %v959_v5 = vld [vmem:[#allocation7 + $0x70] sm:$0xff]  ;;  %v952_v13 = vld [vmem:[#allocation7 + $0x38] sm:$0xff]  ;;  %10612 = vst [vmem:[#allocation384_spill] sm:$0xff] %v8568_v19 }
 0x2b5   :  { %4494 = vmatprep.subr.bf16.mxu1 %v8541_v45  ;;  %v951_v45 = vld [vmem:[#allocation7 + $0x30] sm:$0xff]  ;;  %v8577_v21 = vcombine.high %v952_v13, %v960_v3  ;;  %v976_v52 = vld [vmem:[#allocation7 + $0xf8] sm:$0xff]  ;;  %v8584_v28 = vcombine.low %v952_v13, %v960_v3 }
 0x2b6   :  { %v8574_v0 = vcombine.high %v951_v45, %v959_v5  ;;  %v8598_v3 = vcombine.low %v968_v37, %v976_v52 }
 0x2b7   :  { %4413 = vmatpush1.bf16.msra.mxu0 %v8544_v20  ;;  %10615 = vst [vmem:[#allocation387_spill] sm:$0xff] %v8577_v21  ;;  %10617 = vst [vmem:[#allocation389_spill] sm:$0xff] %v8584_v28 }
 0x2b8   :  { %4495 = vmatpush1.bf16.msra.mxu1 %v8548_v53  ;;  %4414 = vmatprep.subr.bf16.mxu0 %v8550_v24  ;;  %10614 = vst [vmem:[#allocation386_spill] sm:$0xff] %v8574_v0  ;;  %v975_v24 = vld [vmem:[#allocation7 + $0xf0] sm:$0xff]  ;;  %v8580_v53 = vcombine.low %v951_v45, %v959_v5  ;;  %v984_v5 = vld [vmem:[#allocation7 + $0x138] sm:$0xff]  ;;  %10621 = vst [vmem:[#allocation393_spill] sm:$0xff] %v8598_v3 }
 0x2b9   :  { %4496 = vmatprep.subr.bf16.mxu1 %v8553_v60  ;;  %v967_v60 = vld [vmem:[#allocation7 + $0xb0] sm:$0xff]  ;;  %v992_v45 = vld [vmem:[#allocation7 + $0x178] sm:$0xff] }
 0x2ba   :  { %10616 = vst [vmem:[#allocation388_spill] sm:$0xff] %v8580_v53  ;;  %v8587_v44 = vcombine.high %v967_v60, %v975_v24 }
 0x2bb   :  { %4415 = vmatpush1.bf16.msra.mxu0 %v8556_v2  ;;  %v1024_v2 = vld [vmem:[#allocation7 + $0x278] sm:$0xff] }
 0x2bc   :  { %4497 = vmatpush1.bf16.msra.mxu1 %v8560_v6  ;;  %4416 = vmatprep.subr.bf16.mxu0 %v8562_v15  ;;  %10618 = vst [vmem:[#allocation390_spill] sm:$0xff] %v8587_v44  ;;  %v991_v15 = vld [vmem:[#allocation7 + $0x170] sm:$0xff]  ;;  %v8590_v6 = vcombine.high %v968_v37, %v976_v52  ;;  %v8612_v37 = vcombine.low %v984_v5, %v992_v45 }
 0x2bd   :  { %4498 = vmatprep.subr.bf16.mxu1 %v8565_v25  ;;  %v983_v25 = vld [vmem:[#allocation7 + $0x130] sm:$0xff] }
 0x2be   :  { %10619 = vst [vmem:[#allocation391_spill] sm:$0xff] %v8590_v6  ;;  %v8600_v13 = vcombine.high %v983_v25, %v991_v15  ;;  %10625 = vst [vmem:[#allocation397_spill] sm:$0xff] %v8612_v37 }
 0x2bf   :  { %4417 = vmatpush1.bf16.msra.mxu0 %v8568_v19  ;;  %v1007_v19 = vld [vmem:[#allocation7 + $0x1f0] sm:$0xff] }
 0x2c0   :  { %4499 = vmatpush1.bf16.msra.mxu1 %v8572_v40  ;;  %4509 = vmatprep.subr.bf16.mxu0 %v8574_v0  ;;  %v8594_v40 = vcombine.low %v967_v60, %v975_v24  ;;  %10622 = vst [vmem:[#allocation394_spill] sm:$0xff] %v8600_v13  ;;  %v999_v0 = vld [vmem:[#allocation7 + $0x1b0] sm:$0xff]  ;;  %v1000_v24 = vld [vmem:[#allocation7 + $0x1b8] sm:$0xff] }
 0x2c1   :  { %4591 = vmatprep.subr.bf16.mxu1 %v8577_v21  ;;  %v8604_v21 = vcombine.high %v984_v5, %v992_v45  ;;  %v1008_v60 = vld [vmem:[#allocation7 + $0x1f8] sm:$0xff] }
 0x2c2   :  { %4419 = vmatmul.mubr.bf16.vlgmr.msra.gmra.mrb[24].mxu0 %v7789_v38  ;;  %10620 = vst [vmem:[#allocation392_spill] sm:$0xff] %v8594_v40  ;;  %v8617_v52 = vcombine.high %v1000_v24, %v1008_v60 }
 0x2c3   :  { %4501 = vmatmul.mubr.bf16.vlgmr.msra.gmra.mrb[24].mxu1 %v7789_v38  ;;  %4510 = vmatpush1.bf16.msra.mxu0 %v8580_v53  ;;  %10623 = vst [vmem:[#allocation395_spill] sm:$0xff] %v8604_v21  ;;  %v8608_v53 = vcombine.low %v983_v25, %v991_v15  ;;  %v8620_v15 = vcombine.low %v999_v0, %v1007_v19 }
 0x2c4   :  { %4541 = vmatprep.mubr.bf16.mxu0 %v7577_v36  ;;  %4592 = vmatpush1.bf16.msra.mxu1 %v8584_v28  ;;  %10627 = vst [vmem:[#allocation399_spill] sm:$0xff] %v8617_v52  ;;  %v1016_v28 = vld [vmem:[#allocation7 + $0x238] sm:$0xff]  ;;  %v8624_v25 = vcombine.low %v1000_v24, %v1008_v60 }
 0x2c5   :  { %4623 = vmatprep.mubr.bf16.mxu1 %v7577_v36  ;;  %4511 = vmatprep.subr.bf16.mxu0 %v8587_v44  ;;  %10624 = vst [vmem:[#allocation396_spill] sm:$0xff] %v8608_v53  ;;  %v8614_v36 = vcombine.high %v999_v0, %v1007_v19  ;;  %v1015_v44 = vld [vmem:[#allocation7 + $0x230] sm:$0xff]  ;;  %10628 = vst [vmem:[#allocation400_spill] sm:$0xff] %v8620_v15  ;;  %v8629_v45 = vcombine.high %v1016_v28, %v1024_v2 }
 0x2c6   :  { %4593 = vmatprep.subr.bf16.mxu1 %v8590_v6  ;;  %v1023_v6 = vld [vmem:[#allocation7 + $0x270] sm:$0xff]  ;;  %10629 = vst [vmem:[#allocation401_spill] sm:$0xff] %v8624_v25  ;;  %v8636_v0 = vcombine.low %v1016_v28, %v1024_v2 }
 0x2c7   :  { %4512 = vmatpush1.bf16.msra.mxu0 %v8594_v40  ;;  %10626 = vst [vmem:[#allocation398_spill] sm:$0xff] %v8614_v36  ;;  %v8626_v5 = vcombine.high %v1015_v44, %v1023_v6  ;;  %10631 = vst [vmem:[#allocation403_spill] sm:$0xff] %v8629_v45  ;;  %v1040_v40 = vld [vmem:[#allocation7 + $0x2f8] sm:$0xff]  ;;  %v8632_v19 = vcombine.low %v1015_v44, %v1023_v6 }
 0x2c8   :  { %4594 = vmatpush1.bf16.msra.mxu1 %v8598_v3  ;;  %4513 = vmatprep.subr.bf16.mxu0 %v8600_v13  ;;  %v1039_v13 = vld [vmem:[#allocation7 + $0x2f0] sm:$0xff]  ;;  %v1032_v3 = vld [vmem:[#allocation7 + $0x2b8] sm:$0xff]  ;;  %10633 = vst [vmem:[#allocation405_spill] sm:$0xff] %v8636_v0 }
 0x2c9   :  { %4595 = vmatprep.subr.bf16.mxu1 %v8604_v21  ;;  %10630 = vst [vmem:[#allocation402_spill] sm:$0xff] %v8626_v5  ;;  %v1031_v21 = vld [vmem:[#allocation7 + $0x2b0] sm:$0xff]  ;;  %10632 = vst [vmem:[#allocation404_spill] sm:$0xff] %v8632_v19  ;;  %v8641_v60 = vcombine.high %v1032_v3, %v1040_v40  ;;  %v8648_v2 = vcombine.low %v1032_v3, %v1040_v40 }
 0x2ca   :  { %v8638_v24 = vcombine.high %v1031_v21, %v1039_v13  ;;  %v8644_v6 = vcombine.low %v1031_v21, %v1039_v13 }
 0x2cb   :  { %4514 = vmatpush1.bf16.msra.mxu0 %v8608_v53  ;;  %10635 = vst [vmem:[#allocation407_spill] sm:$0xff] %v8641_v60  ;;  %v1056_v53 = vld [vmem:[#allocation7 + $0x378] sm:$0xff]  ;;  %10637 = vst [vmem:[#allocation409_spill] sm:$0xff] %v8648_v2 }
 0x2cc   :  { %4596 = vmatpush1.bf16.msra.mxu1 %v8612_v37  ;;  %4515 = vmatprep.subr.bf16.mxu0 %v8614_v36  ;;  %10634 = vst [vmem:[#allocation406_spill] sm:$0xff] %v8638_v24  ;;  %v1055_v36 = vld [vmem:[#allocation7 + $0x370] sm:$0xff]  ;;  %v1048_v37 = vld [vmem:[#allocation7 + $0x338] sm:$0xff]  ;;  %10636 = vst [vmem:[#allocation408_spill] sm:$0xff] %v8644_v6 }
 0x2cd   :  { %4597 = vmatprep.subr.bf16.mxu1 %v8617_v52  ;;  %v1047_v52 = vld [vmem:[#allocation7 + $0x330] sm:$0xff]  ;;  %v8653_v44 = vcombine.high %v1048_v37, %v1056_v53  ;;  %v8660_v40 = vcombine.low %v1048_v37, %v1056_v53 }
 0x2ce   :  { %v8650_v28 = vcombine.high %v1047_v52, %v1055_v36  ;;  %v8656_v21 = vcombine.low %v1047_v52, %v1055_v36 }
 0x2cf   :  { %4516 = vmatpush1.bf16.msra.mxu0 %v8620_v15  ;;  %10639 = vst [vmem:[#allocation411_spill] sm:$0xff] %v8653_v44  ;;  %v1072_v15 = vld [vmem:[#allocation7 + $0x3f8] sm:$0xff]  ;;  %10641 = vst [vmem:[#allocation413_spill] sm:$0xff] %v8660_v40 }
 0x2d0   :  { %4598 = vmatpush1.bf16.msra.mxu1 %v8624_v25  ;;  %4517 = vmatprep.subr.bf16.mxu0 %v8626_v5  ;;  %10638 = vst [vmem:[#allocation410_spill] sm:$0xff] %v8650_v28  ;;  %v1071_v5 = vld [vmem:[#allocation7 + $0x3f0] sm:$0xff]  ;;  %v1064_v25 = vld [vmem:[#allocation7 + $0x3b8] sm:$0xff]  ;;  %10640 = vst [vmem:[#allocation412_spill] sm:$0xff] %v8656_v21 }
 0x2d1   :  { %4599 = vmatprep.subr.bf16.mxu1 %v8629_v45  ;;  %v1063_v45 = vld [vmem:[#allocation7 + $0x3b0] sm:$0xff]  ;;  %v8665_v13 = vcombine.high %v1064_v25, %v1072_v15  ;;  %v8672_v53 = vcombine.low %v1064_v25, %v1072_v15 }
 0x2d2   :  { %v8662_v3 = vcombine.high %v1063_v45, %v1071_v5  ;;  %v8668_v36 = vcombine.low %v1063_v45, %v1071_v5 }
 0x2d3   :  { %4518 = vmatpush1.bf16.msra.mxu0 %v8632_v19  ;;  %10643 = vst [vmem:[#allocation415_spill] sm:$0xff] %v8665_v13  ;;  %v1088_v19 = vld [vmem:[#allocation7 + $0x478] sm:$0xff]  ;;  %10645 = vst [vmem:[#allocation417_spill] sm:$0xff] %v8672_v53 }
 0x2d4   :  { %4600 = vmatpush1.bf16.msra.mxu1 %v8636_v0  ;;  %4519 = vmatprep.subr.bf16.mxu0 %v8638_v24  ;;  %10642 = vst [vmem:[#allocation414_spill] sm:$0xff] %v8662_v3  ;;  %v1087_v24 = vld [vmem:[#allocation7 + $0x470] sm:$0xff]  ;;  %v1080_v0 = vld [vmem:[#allocation7 + $0x438] sm:$0xff]  ;;  %10644 = vst [vmem:[#allocation416_spill] sm:$0xff] %v8668_v36 }
 0x2d5   :  { %4601 = vmatprep.subr.bf16.mxu1 %v8641_v60  ;;  %v1079_v60 = vld [vmem:[#allocation7 + $0x430] sm:$0xff]  ;;  %v8677_v52 = vcombine.high %v1080_v0, %v1088_v19  ;;  %v8684_v15 = vcombine.low %v1080_v0, %v1088_v19 }
 0x2d6   :  { %v8674_v37 = vcombine.high %v1079_v60, %v1087_v24  ;;  %v8680_v5 = vcombine.low %v1079_v60, %v1087_v24 }
 0x2d7   :  { %4520 = vmatpush1.bf16.msra.mxu0 %v8644_v6  ;;  %10647 = vst [vmem:[#allocation419_spill] sm:$0xff] %v8677_v52  ;;  %v1104_v6 = vld [vmem:[#allocation7 + $0x4f8] sm:$0xff]  ;;  %10649 = vst [vmem:[#allocation421_spill] sm:$0xff] %v8684_v15 }
 0x2d8   :  { %4602 = vmatpush1.bf16.msra.mxu1 %v8648_v2  ;;  %4521 = vmatprep.subr.bf16.mxu0 %v8650_v28  ;;  %10646 = vst [vmem:[#allocation418_spill] sm:$0xff] %v8674_v37  ;;  %v1103_v28 = vld [vmem:[#allocation7 + $0x4f0] sm:$0xff]  ;;  %v1096_v2 = vld [vmem:[#allocation7 + $0x4b8] sm:$0xff]  ;;  %10648 = vst [vmem:[#allocation420_spill] sm:$0xff] %v8680_v5 }
 0x2d9   :  { %4603 = vmatprep.subr.bf16.mxu1 %v8653_v44  ;;  %v1095_v44 = vld [vmem:[#allocation7 + $0x4b0] sm:$0xff]  ;;  %v8689_v45 = vcombine.high %v1096_v2, %v1104_v6  ;;  %v8696_v19 = vcombine.low %v1096_v2, %v1104_v6 }
 0x2da   :  { %v8686_v25 = vcombine.high %v1095_v44, %v1103_v28  ;;  %v8692_v24 = vcombine.low %v1095_v44, %v1103_v28 }
 0x2db   :  { %4522 = vmatpush1.bf16.msra.mxu0 %v8656_v21  ;;  %10651 = vst [vmem:[#allocation423_spill] sm:$0xff] %v8689_v45  ;;  %v1120_v21 = vld [vmem:[#allocation7 + $0x578] sm:$0xff]  ;;  %10653 = vst [vmem:[#allocation425_spill] sm:$0xff] %v8696_v19 }
 0x2dc   :  { %4604 = vmatpush1.bf16.msra.mxu1 %v8660_v40  ;;  %4523 = vmatprep.subr.bf16.mxu0 %v8662_v3  ;;  %10650 = vst [vmem:[#allocation422_spill] sm:$0xff] %v8686_v25  ;;  %v1119_v3 = vld [vmem:[#allocation7 + $0x570] sm:$0xff]  ;;  %v1112_v40 = vld [vmem:[#allocation7 + $0x538] sm:$0xff]  ;;  %10652 = vst [vmem:[#allocation424_spill] sm:$0xff] %v8692_v24 }
 0x2dd   :  { %4605 = vmatprep.subr.bf16.mxu1 %v8665_v13  ;;  %v1111_v13 = vld [vmem:[#allocation7 + $0x530] sm:$0xff]  ;;  %v8701_v60 = vcombine.high %v1112_v40, %v1120_v21  ;;  %v8708_v6 = vcombine.low %v1112_v40, %v1120_v21 }
 0x2de   :  { %v8698_v0 = vcombine.high %v1111_v13, %v1119_v3  ;;  %v8704_v28 = vcombine.low %v1111_v13, %v1119_v3 }
 0x2df   :  { %4524 = vmatpush1.bf16.msra.mxu0 %v8668_v36  ;;  %10655 = vst [vmem:[#allocation427_spill] sm:$0xff] %v8701_v60  ;;  %v1136_v36 = vld [vmem:[#allocation7 + $0x5f8] sm:$0xff]  ;;  %10657 = vst [vmem:[#allocation429_spill] sm:$0xff] %v8708_v6 }
 0x2e0   :  { %4606 = vmatpush1.bf16.msra.mxu1 %v8672_v53  ;;  %4525 = vmatprep.subr.bf16.mxu0 %v8674_v37  ;;  %10654 = vst [vmem:[#allocation426_spill] sm:$0xff] %v8698_v0  ;;  %v1135_v37 = vld [vmem:[#allocation7 + $0x5f0] sm:$0xff]  ;;  %v1128_v53 = vld [vmem:[#allocation7 + $0x5b8] sm:$0xff]  ;;  %10656 = vst [vmem:[#allocation428_spill] sm:$0xff] %v8704_v28 }
 0x2e1   :  { %4607 = vmatprep.subr.bf16.mxu1 %v8677_v52  ;;  %v1127_v52 = vld [vmem:[#allocation7 + $0x5b0] sm:$0xff]  ;;  %v8713_v44 = vcombine.high %v1128_v53, %v1136_v36  ;;  %v8720_v21 = vcombine.low %v1128_v53, %v1136_v36 }
 0x2e2   :  { %v8710_v2 = vcombine.high %v1127_v52, %v1135_v37  ;;  %v8716_v3 = vcombine.low %v1127_v52, %v1135_v37 }
 0x2e3   :  { %4526 = vmatpush1.bf16.msra.mxu0 %v8680_v5  ;;  %10659 = vst [vmem:[#allocation431_spill] sm:$0xff] %v8713_v44  ;;  %v1152_v5 = vld [vmem:[#allocation7 + $0x678] sm:$0xff]  ;;  %10661 = vst [vmem:[#allocation433_spill] sm:$0xff] %v8720_v21 }
 0x2e4   :  { %4608 = vmatpush1.bf16.msra.mxu1 %v8684_v15  ;;  %4527 = vmatprep.subr.bf16.mxu0 %v8686_v25  ;;  %10658 = vst [vmem:[#allocation430_spill] sm:$0xff] %v8710_v2  ;;  %v1151_v25 = vld [vmem:[#allocation7 + $0x670] sm:$0xff]  ;;  %v1144_v15 = vld [vmem:[#allocation7 + $0x638] sm:$0xff]  ;;  %10660 = vst [vmem:[#allocation432_spill] sm:$0xff] %v8716_v3 }
 0x2e5   :  { %4609 = vmatprep.subr.bf16.mxu1 %v8689_v45  ;;  %v1143_v45 = vld [vmem:[#allocation7 + $0x630] sm:$0xff]  ;;  %v8725_v13 = vcombine.high %v1144_v15, %v1152_v5  ;;  %v8732_v36 = vcombine.low %v1144_v15, %v1152_v5 }
 0x2e6   :  { %v8722_v40 = vcombine.high %v1143_v45, %v1151_v25  ;;  %v8728_v37 = vcombine.low %v1143_v45, %v1151_v25 }
 0x2e7   :  { %4528 = vmatpush1.bf16.msra.mxu0 %v8692_v24  ;;  %10663 = vst [vmem:[#allocation435_spill] sm:$0xff] %v8725_v13  ;;  %v1168_v24 = vld [vmem:[#allocation7 + $0x6f8] sm:$0xff]  ;;  %10665 = vst [vmem:[#allocation437_spill] sm:$0xff] %v8732_v36 }
 0x2e8   :  { %4610 = vmatpush1.bf16.msra.mxu1 %v8696_v19  ;;  %4529 = vmatprep.subr.bf16.mxu0 %v8698_v0  ;;  %10662 = vst [vmem:[#allocation434_spill] sm:$0xff] %v8722_v40  ;;  %v1167_v0 = vld [vmem:[#allocation7 + $0x6f0] sm:$0xff]  ;;  %v1160_v19 = vld [vmem:[#allocation7 + $0x6b8] sm:$0xff]  ;;  %10664 = vst [vmem:[#allocation436_spill] sm:$0xff] %v8728_v37 }
 0x2e9   :  { %4611 = vmatprep.subr.bf16.mxu1 %v8701_v60  ;;  %v1159_v60 = vld [vmem:[#allocation7 + $0x6b0] sm:$0xff]  ;;  %v8737_v52 = vcombine.high %v1160_v19, %v1168_v24  ;;  %v8744_v5 = vcombine.low %v1160_v19, %v1168_v24 }
 0x2ea   :  { %v8734_v53 = vcombine.high %v1159_v60, %v1167_v0  ;;  %v8740_v25 = vcombine.low %v1159_v60, %v1167_v0 }
 0x2eb   :  { %4530 = vmatpush1.bf16.msra.mxu0 %v8704_v28  ;;  %10667 = vst [vmem:[#allocation439_spill] sm:$0xff] %v8737_v52  ;;  %v1184_v28 = vld [vmem:[#allocation7 + $0x778] sm:$0xff]  ;;  %10669 = vst [vmem:[#allocation441_spill] sm:$0xff] %v8744_v5 }
 0x2ec   :  { %4612 = vmatpush1.bf16.msra.mxu1 %v8708_v6  ;;  %4531 = vmatprep.subr.bf16.mxu0 %v8710_v2  ;;  %10666 = vst [vmem:[#allocation438_spill] sm:$0xff] %v8734_v53  ;;  %v1183_v2 = vld [vmem:[#allocation7 + $0x770] sm:$0xff]  ;;  %v1176_v6 = vld [vmem:[#allocation7 + $0x738] sm:$0xff]  ;;  %10668 = vst [vmem:[#allocation440_spill] sm:$0xff] %v8740_v25 }
 0x2ed   :  { %4613 = vmatprep.subr.bf16.mxu1 %v8713_v44  ;;  %v1175_v44 = vld [vmem:[#allocation7 + $0x730] sm:$0xff]  ;;  %v8749_v45 = vcombine.high %v1176_v6, %v1184_v28  ;;  %v8756_v24 = vcombine.low %v1176_v6, %v1184_v28 }
 0x2ee   :  { %v8746_v15 = vcombine.high %v1175_v44, %v1183_v2  ;;  %v8752_v0 = vcombine.low %v1175_v44, %v1183_v2 }
 0x2ef   :  { %4532 = vmatpush1.bf16.msra.mxu0 %v8716_v3  ;;  %10671 = vst [vmem:[#allocation443_spill] sm:$0xff] %v8749_v45  ;;  %v1200_v3 = vld [vmem:[#allocation7 + $0x7f8] sm:$0xff]  ;;  %10673 = vst [vmem:[#allocation445_spill] sm:$0xff] %v8756_v24 }
 0x2f0   :  { %4614 = vmatpush1.bf16.msra.mxu1 %v8720_v21  ;;  %4533 = vmatprep.subr.bf16.mxu0 %v8722_v40  ;;  %10670 = vst [vmem:[#allocation442_spill] sm:$0xff] %v8746_v15  ;;  %v1199_v40 = vld [vmem:[#allocation7 + $0x7f0] sm:$0xff]  ;;  %v1192_v21 = vld [vmem:[#allocation7 + $0x7b8] sm:$0xff]  ;;  %10672 = vst [vmem:[#allocation444_spill] sm:$0xff] %v8752_v0 }
 0x2f1   :  { %4615 = vmatprep.subr.bf16.mxu1 %v8725_v13  ;;  %v1191_v13 = vld [vmem:[#allocation7 + $0x7b0] sm:$0xff]  ;;  %v8761_v60 = vcombine.high %v1192_v21, %v1200_v3  ;;  %v8768_v28 = vcombine.low %v1192_v21, %v1200_v3 }
 0x2f2   :  { %v8758_v19 = vcombine.high %v1191_v13, %v1199_v40  ;;  %v8764_v2 = vcombine.low %v1191_v13, %v1199_v40  ;;  %v1224_v40 = vld [vmem:[#allocation7 + $0x8b8] sm:$0xff] }
 0x2f3   :  { %4534 = vmatpush1.bf16.msra.mxu0 %v8728_v37  ;;  %10675 = vst [vmem:[#allocation447_spill] sm:$0xff] %v8761_v60  ;;  %v1216_v37 = vld [vmem:[#allocation7 + $0x878] sm:$0xff]  ;;  %10677 = vst [vmem:[#allocation449_spill] sm:$0xff] %v8768_v28 }
 0x2f4   :  { %4616 = vmatpush1.bf16.msra.mxu1 %v8732_v36  ;;  %4535 = vmatprep.subr.bf16.mxu0 %v8734_v53  ;;  %10674 = vst [vmem:[#allocation446_spill] sm:$0xff] %v8758_v19  ;;  %v1215_v53 = vld [vmem:[#allocation7 + $0x870] sm:$0xff]  ;;  %v1208_v36 = vld [vmem:[#allocation7 + $0x838] sm:$0xff]  ;;  %10676 = vst [vmem:[#allocation448_spill] sm:$0xff] %v8764_v2 }
 0x2f5   :  { %4617 = vmatprep.subr.bf16.mxu1 %v8737_v52  ;;  %v1207_v52 = vld [vmem:[#allocation7 + $0x830] sm:$0xff]  ;;  %v8773_v44 = vcombine.high %v1208_v36, %v1216_v37  ;;  %v1232_v13 = vld [vmem:[#allocation7 + $0x8f8] sm:$0xff]  ;;  %v8780_v3 = vcombine.low %v1208_v36, %v1216_v37 }
 0x2f6   :  { %v8770_v6 = vcombine.high %v1207_v52, %v1215_v53  ;;  %v8794_v37 = vcombine.low %v1224_v40, %v1232_v13 }
 0x2f7   :  { %4536 = vmatpush1.bf16.msra.mxu0 %v8740_v25  ;;  %10679 = vst [vmem:[#allocation451_spill] sm:$0xff] %v8773_v44  ;;  %10681 = vst [vmem:[#allocation453_spill] sm:$0xff] %v8780_v3 }
 0x2f8   :  { %4618 = vmatpush1.bf16.msra.mxu1 %v8744_v5  ;;  %4537 = vmatprep.subr.bf16.mxu0 %v8746_v15  ;;  %10678 = vst [vmem:[#allocation450_spill] sm:$0xff] %v8770_v6  ;;  %v1231_v15 = vld [vmem:[#allocation7 + $0x8f0] sm:$0xff]  ;;  %v8776_v5 = vcombine.low %v1207_v52, %v1215_v53  ;;  %v1240_v53 = vld [vmem:[#allocation7 + $0x938] sm:$0xff]  ;;  %10685 = vst [vmem:[#allocation457_spill] sm:$0xff] %v8794_v37 }
 0x2f9   :  { %4619 = vmatprep.subr.bf16.mxu1 %v8749_v45  ;;  %v1223_v45 = vld [vmem:[#allocation7 + $0x8b0] sm:$0xff]  ;;  %v1248_v52 = vld [vmem:[#allocation7 + $0x978] sm:$0xff] }
 0x2fa   :  { %10680 = vst [vmem:[#allocation452_spill] sm:$0xff] %v8776_v5  ;;  %v8783_v21 = vcombine.high %v1223_v45, %v1231_v15 }
 0x2fb   :  { %4538 = vmatpush1.bf16.msra.mxu0 %v8752_v0 }
 0x2fc   :  { %4620 = vmatpush1.bf16.msra.mxu1 %v8756_v24  ;;  %4539 = vmatprep.subr.bf16.mxu0 %v8758_v19  ;;  %10682 = vst [vmem:[#allocation454_spill] sm:$0xff] %v8783_v21  ;;  %v1247_v19 = vld [vmem:[#allocation7 + $0x970] sm:$0xff]  ;;  %v8786_v24 = vcombine.high %v1224_v40, %v1232_v13  ;;  %v8808_v40 = vcombine.low %v1240_v53, %v1248_v52 }
 0x2fd   :  { %4621 = vmatprep.subr.bf16.mxu1 %v8761_v60  ;;  %v1239_v60 = vld [vmem:[#allocation7 + $0x930] sm:$0xff] }
 0x2fe   :  { %10683 = vst [vmem:[#allocation455_spill] sm:$0xff] %v8786_v24  ;;  %v8796_v36 = vcombine.high %v1239_v60, %v1247_v19  ;;  %10689 = vst [vmem:[#allocation461_spill] sm:$0xff] %v8808_v40 }
 0x2ff   :  { %4540 = vmatpush1.bf16.msra.mxu0 %v8764_v2  ;;  %v1280_v2 = vld [vmem:[#allocation7 + $0xa78] sm:$0xff] }
 0x300   :  { %4622 = vmatpush1.bf16.msra.mxu1 %v8768_v28  ;;  %4550 = vmatprep.subr.bf16.mxu0 %v8770_v6  ;;  %v8790_v28 = vcombine.low %v1223_v45, %v1231_v15  ;;  %10686 = vst [vmem:[#allocation458_spill] sm:$0xff] %v8796_v36  ;;  %v1255_v6 = vld [vmem:[#allocation7 + $0x9b0] sm:$0xff]  ;;  %v1256_v15 = vld [vmem:[#allocation7 + $0x9b8] sm:$0xff] }
 0x301   :  { %4632 = vmatprep.subr.bf16.mxu1 %v8773_v44  ;;  %v8800_v44 = vcombine.high %v1240_v53, %v1248_v52  ;;  %v1264_v45 = vld [vmem:[#allocation7 + $0x9f8] sm:$0xff] }
 0x302   :  { %4542 = vmatmul.mubr.bf16.vlgmr.msra.gmra.mrb[28].mxu0 %v7582_v48  ;;  %10684 = vst [vmem:[#allocation456_spill] sm:$0xff] %v8790_v28  ;;  %v8813_v13 = vcombine.high %v1256_v15, %v1264_v45 }
 0x303   :  { %4624 = vmatmul.mubr.bf16.vlgmr.msra.gmra.mrb[28].mxu1 %v7582_v48  ;;  %4551 = vmatpush1.bf16.msra.mxu0 %v8776_v5  ;;  %10687 = vst [vmem:[#allocation459_spill] sm:$0xff] %v8800_v44  ;;  %v1263_v48 = vld [vmem:[#allocation7 + $0x9f0] sm:$0xff]  ;;  %v8804_v5 = vcombine.low %v1239_v60, %v1247_v19  ;;  %v8820_v60 = vcombine.low %v1256_v15, %v1264_v45 }
 0x304   :  { %4582 = vmatprep.mubr.bf16.mxu0 %v7607_v62  ;;  %4633 = vmatpush1.bf16.msra.mxu1 %v8780_v3  ;;  %10691 = vst [vmem:[#allocation463_spill] sm:$0xff] %v8813_v13  ;;  %v1272_v3 = vld [vmem:[#allocation7 + $0xa38] sm:$0xff]  ;;  %v8816_v19 = vcombine.low %v1255_v6, %v1263_v48 }
 0x305   :  { %4664 = vmatprep.mubr.bf16.mxu1 %v7607_v62  ;;  %4552 = vmatprep.subr.bf16.mxu0 %v8783_v21  ;;  %10688 = vst [vmem:[#allocation460_spill] sm:$0xff] %v8804_v5  ;;  %v8810_v62 = vcombine.high %v1255_v6, %v1263_v48  ;;  %v1271_v21 = vld [vmem:[#allocation7 + $0xa30] sm:$0xff]  ;;  %10693 = vst [vmem:[#allocation465_spill] sm:$0xff] %v8820_v60  ;;  %v8825_v52 = vcombine.high %v1272_v3, %v1280_v2 }
 0x306   :  { %4634 = vmatprep.subr.bf16.mxu1 %v8786_v24  ;;  %v1279_v24 = vld [vmem:[#allocation7 + $0xa70] sm:$0xff]  ;;  %10692 = vst [vmem:[#allocation464_spill] sm:$0xff] %v8816_v19  ;;  %v8832_v48 = vcombine.low %v1272_v3, %v1280_v2 }
 0x307   :  { %4553 = vmatpush1.bf16.msra.mxu0 %v8790_v28  ;;  %10690 = vst [vmem:[#allocation462_spill] sm:$0xff] %v8810_v62  ;;  %v8822_v53 = vcombine.high %v1271_v21, %v1279_v24  ;;  %10695 = vst [vmem:[#allocation467_spill] sm:$0xff] %v8825_v52  ;;  %v1296_v28 = vld [vmem:[#allocation7 + $0xaf8] sm:$0xff]  ;;  %v8828_v6 = vcombine.low %v1271_v21, %v1279_v24 }
 0x308   :  { %4635 = vmatpush1.bf16.msra.mxu1 %v8794_v37  ;;  %4554 = vmatprep.subr.bf16.mxu0 %v8796_v36  ;;  %v1295_v36 = vld [vmem:[#allocation7 + $0xaf0] sm:$0xff]  ;;  %v1288_v37 = vld [vmem:[#allocation7 + $0xab8] sm:$0xff]  ;;  %10697 = vst [vmem:[#allocation469_spill] sm:$0xff] %v8832_v48 }
 0x309   :  { %4636 = vmatprep.subr.bf16.mxu1 %v8800_v44  ;;  %10694 = vst [vmem:[#allocation466_spill] sm:$0xff] %v8822_v53  ;;  %v1287_v44 = vld [vmem:[#allocation7 + $0xab0] sm:$0xff]  ;;  %10696 = vst [vmem:[#allocation468_spill] sm:$0xff] %v8828_v6  ;;  %v8837_v45 = vcombine.high %v1288_v37, %v1296_v28  ;;  %v8844_v2 = vcombine.low %v1288_v37, %v1296_v28 }
 0x30a   :  { %v8834_v15 = vcombine.high %v1287_v44, %v1295_v36  ;;  %v8840_v24 = vcombine.low %v1287_v44, %v1295_v36  ;;  %v1320_v44 = vld [vmem:[#allocation7 + $0xbb8] sm:$0xff] }
 0x30b   :  { %4555 = vmatpush1.bf16.msra.mxu0 %v8804_v5  ;;  %10699 = vst [vmem:[#allocation471_spill] sm:$0xff] %v8837_v45  ;;  %v1312_v5 = vld [vmem:[#allocation7 + $0xb78] sm:$0xff]  ;;  %10700 = vst [vmem:[#allocation472_spill] sm:$0xff] %v8844_v2 }
 0x30c   :  { %4637 = vmatpush1.bf16.msra.mxu1 %v8808_v40  ;;  %4556 = vmatprep.subr.bf16.mxu0 %v8810_v62  ;;  %10698 = vst [vmem:[#allocation470_spill] sm:$0xff] %v8834_v15  ;;  %v1311_v62 = vld [vmem:[#allocation7 + $0xb70] sm:$0xff]  ;;  %v1304_v40 = vld [vmem:[#allocation7 + $0xb38] sm:$0xff] }
 0x30d   :  { %4638 = vmatprep.subr.bf16.mxu1 %v8813_v13  ;;  %v1303_v13 = vld [vmem:[#allocation7 + $0xb30] sm:$0xff]  ;;  %v1328_v36 = vld [vmem:[#allocation7 + $0xbf8] sm:$0xff] }
 0x30e   :  { %v8846_v3 = vcombine.high %v1303_v13, %v1311_v62  ;;  %v8852_v28 = vcombine.low %v1303_v13, %v1311_v62  ;;  %v8864_v62 = vcombine.high %v1320_v44, %v1328_v36 }
 0x30f   :  { %4557 = vmatpush1.bf16.msra.mxu0 %v8816_v19 }
 0x310   :  { %4639 = vmatpush1.bf16.msra.mxu1 %v8820_v60  ;;  %4558 = vmatprep.subr.bf16.mxu0 %v8822_v53  ;;  %10701 = vst [vmem:[#allocation473_spill] sm:$0xff] %v8846_v3  ;;  %v1319_v53 = vld [vmem:[#allocation7 + $0xbb0] sm:$0xff]  ;;  %10704 = vst [vmem:[#allocation476_spill] sm:$0xff] %v8864_v62 }
 0x311   :  { %4640 = vmatprep.subr.bf16.mxu1 %v8825_v52  ;;  %v8849_v52 = vcombine.high %v1304_v40, %v1312_v5  ;;  %v1327_v60 = vld [vmem:[#allocation7 + $0xbf0] sm:$0xff] }
 0x312   :  { %v8859_v4 = vcombine.high %v1319_v53, %v1327_v60 }
 0x313   :  { %4559 = vmatpush1.bf16.msra.mxu0 %v8828_v6 }
 0x314   :  { %4641 = vmatpush1.bf16.msra.mxu1 %v8832_v48  ;;  %4560 = vmatprep.subr.bf16.mxu0 %v8834_v15  ;;  %10703 = vst [vmem:[#allocation475_spill] sm:$0xff] %v8859_v4 }
 0x315   :  { %v4256_v21 = vpop.f32.mrb[20].mxu0  ;;  %4642 = vmatprep.subr.bf16.mxu1 %v8837_v45 }
 0x316   :  { %v4693_v19 = vrot.slane %v4256_v21, 6  ;;  %v4338_v0 = vpop.f32.mrb[20].mxu1  ;;  %v4258_v6 = vpop.f32.mrb[21].mxu0  ;;  %v8857_v21 = vcombine.low %v1304_v40, %v1312_v5 }
 0x317   :  { %v4695_v25 = vrot.slane %v4338_v0, 6  ;;  %v4694_v48 = vrot.slane %v4258_v6, 6  ;;  %v4340_v20 = vpop.f32.mrb[21].mxu1  ;;  %v4260_v15 = vpop.f32.mrb[22].mxu0  ;;  %4561 = vmatpush1.bf16.msra.mxu0 %v8840_v24 }
 0x318   :  { %v4725_v37 = vadd.f32 %v4693_v19, %v7512_v1  ;;  %v4696_v45 = vrot.slane %v4340_v20, 6  ;;  %v4342_v23 = vpop.f32.mrb[22].mxu1  ;;  %4643 = vmatpush1.bf16.msra.mxu1 %v8844_v2  ;;  %v4261_v8 = vpop.f32.mrb[23].mxu0  ;;  %4562 = vmatprep.subr.bf16.mxu0 %v8846_v3  ;;  %10702 = vst [vmem:[#allocation474_spill] sm:$0xff] %v8857_v21  ;;  %v1335_v20 = vld [vmem:[#allocation7 + $0xc30] sm:$0xff]  ;;  %v1336_v19 = vld [vmem:[#allocation7 + $0xc38] sm:$0xff]  ;;  %v8868_v2 = vcombine.low %v1319_v53, %v1327_v60 }
 0x319   :  { %v4727_v0 = vadd.f32 %v4695_v25, %v7524_v61  ;;  %v4726_v6 = vadd.f32 %v4694_v48, %v7514_v56  ;;  %v4343_v15 = vpop.f32.mrb[23].mxu1  ;;  %4644 = vmatprep.subr.bf16.mxu1 %v8849_v52  ;;  %v1343_v23 = vld [vmem:[#allocation7 + $0xc70] sm:$0xff]  ;;  %v1344_v3 = vld [vmem:[#allocation7 + $0xc78] sm:$0xff]  ;;  %v8872_v48 = vcombine.low %v1320_v44, %v1328_v36 }
 0x31a   :  { %v6669_v13 = vmul.f32 -1.442695, %v4725_v37  ;;  %v4728_v8 = vadd.f32 %v4696_v45, %v7529_v46  ;;  %10705 = vst [vmem:[#allocation477_spill] sm:$0xff] %v8868_v2  ;;  %v8874_v15 = vcombine.high %v1335_v20, %v1343_v23  ;;  %v8877_v45 = vcombine.high %v1336_v19, %v1344_v3  ;;  %v1351_v37 = vld [vmem:[#allocation7 + $0xcb0] sm:$0xff]  ;;  %v1352_v60 = vld [vmem:[#allocation7 + $0xcb8] sm:$0xff] }
 0x31b   :  { %v6671_v5 = vmul.f32 -1.442695, %v4727_v0  ;;  %v6670_v40 = vmul.f32 -1.442695, %v4726_v6  ;;  %4563 = vmatpush1.bf16.msra.mxu0 %v8852_v28  ;;  %10706 = vst [vmem:[#allocation478_spill] sm:$0xff] %v8872_v48  ;;  %v1359_v0 = vld [vmem:[#allocation7 + $0xcf0] sm:$0xff]  ;;  %v8880_v6 = vcombine.low %v1335_v20, %v1343_v23  ;;  %v8884_v44 = vcombine.low %v1336_v19, %v1344_v3 }
 0x31c   :  { %6919 = vpow2.f32 %v6669_v13  ;;  %v6672_v25 = vmul.f32 -1.442695, %v4728_v8  ;;  %4645 = vmatpush1.bf16.msra.mxu1 %v8857_v21  ;;  %4564 = vmatprep.subr.bf16.mxu0 %v8859_v4  ;;  %10707 = vst [vmem:[#allocation479_spill] sm:$0xff] %v8874_v15  ;;  %10708 = vst [vmem:[#allocation480_spill] sm:$0xff] %v8877_v45  ;;  %v1360_v53 = vld [vmem:[#allocation7 + $0xcf8] sm:$0xff]  ;;  %v8886_v36 = vcombine.high %v1351_v37, %v1359_v0  ;;  %v1367_v8 = vld [vmem:[#allocation7 + $0xd30] sm:$0xff] }
 0x31d   :  { %6921 = vpow2.f32 %v6671_v5  ;;  %4646 = vmatprep.subr.bf16.mxu1 %v8864_v62  ;;  %10709 = vst [vmem:[#allocation481_spill] sm:$0xff] %v8880_v6  ;;  %10710 = vst [vmem:[#allocation482_spill] sm:$0xff] %v8884_v44  ;;  %v8889_v13 = vcombine.high %v1352_v60, %v1360_v53  ;;  %v1375_v5 = vld [vmem:[#allocation7 + $0xd70] sm:$0xff]  ;;  %v8892_v20 = vcombine.low %v1351_v37, %v1359_v0  ;;  %v1392_v62 = vld [vmem:[#allocation7 + $0xdf8] sm:$0xff] }
 0x31e   :  { %6923 = vpow2.f32 %v6670_v40  ;;  %10711 = vst [vmem:[#allocation483_spill] sm:$0xff] %v8886_v36  ;;  %v1368_v40 = vld [vmem:[#allocation7 + $0xd38] sm:$0xff]  ;;  %v8896_v3 = vcombine.low %v1352_v60, %v1360_v53  ;;  %v8898_v23 = vcombine.high %v1367_v8, %v1375_v5  ;;  %v8904_v0 = vcombine.low %v1367_v8, %v1375_v5  ;;  %v1407_v8 = vld [vmem:[#allocation7 + $0xe70] sm:$0xff] }
 0x31f   :  { %6925 = vpow2.f32 %v6672_v25  ;;  %4565 = vmatpush1.bf16.msra.mxu0 %v8868_v2  ;;  %10712 = vst [vmem:[#allocation484_spill] sm:$0xff] %v8889_v13  ;;  %v1376_v25 = vld [vmem:[#allocation7 + $0xd78] sm:$0xff]  ;;  %10713 = vst [vmem:[#allocation485_spill] sm:$0xff] %v8892_v20 }
 0x320   :  { %4647 = vmatpush1.bf16.msra.mxu1 %v8872_v48  ;;  %4566 = vmatprep.subr.bf16.mxu0 %v8874_v15  ;;  %10714 = vst [vmem:[#allocation486_spill] sm:$0xff] %v8898_v23  ;;  %v8901_v19 = vcombine.high %v1368_v40, %v1376_v25  ;;  %v1391_v15 = vld [vmem:[#allocation7 + $0xdf0] sm:$0xff]  ;;  %v1384_v2 = vld [vmem:[#allocation7 + $0xdb8] sm:$0xff]  ;;  %10716 = vst [vmem:[#allocation488_spill] sm:$0xff] %v8904_v0  ;;  %v8908_v53 = vcombine.low %v1368_v40, %v1376_v25 }
 0x321   :  { %4648 = vmatprep.subr.bf16.mxu1 %v8877_v45  ;;  %v1383_v45 = vld [vmem:[#allocation7 + $0xdb0] sm:$0xff]  ;;  %v1408_v21 = vld [vmem:[#allocation7 + $0xe78] sm:$0xff] }
 0x322   :  { %10715 = vst [vmem:[#allocation487_spill] sm:$0xff] %v8901_v19  ;;  %10717 = vst [vmem:[#allocation489_spill] sm:$0xff] %v8908_v53  ;;  %v8916_v40 = vcombine.low %v1383_v45, %v1391_v15 }
 0x323   :  { %4567 = vmatpush1.bf16.msra.mxu0 %v8880_v6 }
 0x324   :  { %4649 = vmatpush1.bf16.msra.mxu1 %v8884_v44  ;;  %4568 = vmatprep.subr.bf16.mxu0 %v8886_v36  ;;  %10720 = vst [vmem:[#allocation492_spill] sm:$0xff] %v8916_v40 }
 0x325   :  { %4650 = vmatprep.subr.bf16.mxu1 %v8889_v13  ;;  %v8910_v13 = vcombine.high %v1383_v45, %v1391_v15 }
 0x326   :  { %v6920_v48 = vpop.eup %6919 }
 0x327   :  { %v6922_v6 = vpop.eup %6921  ;;  %v4777_v37 = vadd.f32 1.0, %v6920_v48  ;;  %4569 = vmatpush1.bf16.msra.mxu0 %v8892_v20  ;;  %10718 = vst [vmem:[#allocation490_spill] sm:$0xff] %v8910_v13  ;;  %v8913_v48 = vcombine.high %v1384_v2, %v1392_v62  ;;  %v1399_v20 = vld [vmem:[#allocation7 + $0xe30] sm:$0xff] }
 0x328   :  { %v6924_v36 = vpop.eup %6923  ;;  %v4779_v60 = vadd.f32 1.0, %v6922_v6  ;;  %4651 = vmatpush1.bf16.msra.mxu1 %v8896_v3  ;;  %4570 = vmatprep.subr.bf16.mxu0 %v8898_v23  ;;  %v1400_v6 = vld [vmem:[#allocation7 + $0xe38] sm:$0xff]  ;;  %v8922_v25 = vcombine.high %v1399_v20, %v1407_v8  ;;  %v8928_v15 = vcombine.low %v1399_v20, %v1407_v8  ;;  %v4819_v8 = vrot.slane %v7722_v12, 6 }
 0x329   :  { %v6926_v44 = vpop.eup %6925  ;;  %6927 = vrcp.f32 %v4777_v37  ;;  %v4778_v4 = vadd.f32 1.0, %v6924_v36  ;;  %4652 = vmatprep.subr.bf16.mxu1 %v8901_v19  ;;  %10719 = vst [vmem:[#allocation491_spill] sm:$0xff] %v8913_v48  ;;  %v8920_v36 = vcombine.low %v1384_v2, %v1392_v62  ;;  %v8925_v37 = vcombine.high %v1400_v6, %v1408_v21  ;;  %v1424_v19 = vld [vmem:[#allocation7 + $0xef8] sm:$0xff] }
 0x32a   :  { %6929 = vrcp.f32 %v4779_v60  ;;  %v4780_v5 = vadd.f32 1.0, %v6926_v44  ;;  %10722 = vst [vmem:[#allocation494_spill] sm:$0xff] %v8922_v25  ;;  %v1415_v44 = vld [vmem:[#allocation7 + $0xeb0] sm:$0xff]  ;;  %v8932_v2 = vcombine.low %v1400_v6, %v1408_v21  ;;  %v4818_v6 = vrot.slane %v7570_v35, 6 }
 0x32b   :  { %6931 = vrcp.f32 %v4778_v4  ;;  %4571 = vmatpush1.bf16.msra.mxu0 %v8904_v0  ;;  %10721 = vst [vmem:[#allocation493_spill] sm:$0xff] %v8920_v36  ;;  %10723 = vst [vmem:[#allocation495_spill] sm:$0xff] %v8925_v37  ;;  %v1423_v60 = vld [vmem:[#allocation7 + $0xef0] sm:$0xff]  ;;  %v1416_v4 = vld [vmem:[#allocation7 + $0xeb8] sm:$0xff]  ;;  %v4820_v12 = vrot.slane %v7574_v29, 6 }
 0x32c   :  { %6933 = vrcp.f32 %v4780_v5  ;;  %4653 = vmatpush1.bf16.msra.mxu1 %v8908_v53  ;;  %4572 = vmatprep.subr.bf16.mxu0 %v8910_v13  ;;  %10724 = vst [vmem:[#allocation496_spill] sm:$0xff] %v8932_v2  ;;  %v8934_v62 = vcombine.high %v1415_v44, %v1423_v60  ;;  %v8937_v45 = vcombine.high %v1416_v4, %v1424_v19  ;;  %v1431_v5 = vld [vmem:[#allocation7 + $0xf30] sm:$0xff]  ;;  %v4817_v13 = vrot.slane %v7568_v54, 6  ;;  %v1432_v53 = vld [vmem:[#allocation7 + $0xf38] sm:$0xff] }
 0x32d   :  { %4654 = vmatprep.subr.bf16.mxu1 %v8913_v48  ;;  %v1439_v48 = vld [vmem:[#allocation7 + $0xf70] sm:$0xff] }
 0x32e   :  { %10725 = vst [vmem:[#allocation497_spill] sm:$0xff] %v8934_v62  ;;  %v8951_v54 = vcombine.high %v1431_v5, %v1439_v48  ;;  %v1447_v35 = vld [vmem:[#allocation7 + $0xfb0] sm:$0xff] }
 0x32f   :  { %4573 = vmatpush1.bf16.msra.mxu0 %v8916_v40  ;;  %v1440_v40 = vld [vmem:[#allocation7 + $0xf78] sm:$0xff] }
 0x330   :  { %4655 = vmatpush1.bf16.msra.mxu1 %v8920_v36  ;;  %4574 = vmatprep.subr.bf16.mxu0 %v8922_v25  ;;  %v8942_v25 = vcombine.low %v1415_v44, %v1423_v60  ;;  %v8957_v44 = vcombine.high %v1432_v53, %v1440_v40  ;;  %v8968_v29 = vcombine.low %v1432_v53, %v1440_v40  ;;  %v10756_v53 = vld [vmem:[#allocation44_spill] sm:$0xff]  ;;  %v10757_v40 = vld [vmem:[#allocation46_spill] sm:$0xff] }
 0x331   :  { %4656 = vmatprep.subr.bf16.mxu1 %v8925_v37  ;;  %v8949_v37 = vcombine.low %v1416_v4, %v1424_v19  ;;  %v8964_v4 = vcombine.low %v1431_v5, %v1439_v48  ;;  %v10760_v5 = vld [vmem:[#allocation48_spill] sm:$0xff] }
 0x333   :  { %v6928_v20 = vpop.eup %6927  ;;  %4575 = vmatpush1.bf16.msra.mxu0 %v8928_v15 }
 0x334   :  { %v6930_v21 = vpop.eup %6929  ;;  %v8945_v36 = vmul.f32 %v6928_v20, %v4817_v13  ;;  %4657 = vmatpush1.bf16.msra.mxu1 %v8932_v2  ;;  %4576 = vmatprep.subr.bf16.mxu0 %v8934_v62  ;;  %v1455_v13 = vld [vmem:[#allocation7 + $0xff0] sm:$0xff]  ;;  %v1448_v2 = vld [vmem:[#allocation7 + $0xfb8] sm:$0xff] }
 0x335   :  { %v6932_v0 = vpop.eup %6931  ;;  %v8954_v23 = vmul.f32 %v6930_v21, %v4819_v8  ;;  %4658 = vmatprep.subr.bf16.mxu1 %v8937_v45  ;;  %v1456_v62 = vld [vmem:[#allocation7 + $0xff8] sm:$0xff]  ;;  %v8970_v8 = vcombine.high %v1447_v35, %v1455_v13  ;;  %v8976_v21 = vcombine.low %v1447_v35, %v1455_v13 }
 0x336   :  { %v6934_v60 = vpop.eup %6933  ;;  %v8959_v20 = vmul.f32 %v6932_v0, %v4818_v6  ;;  %v8973_v0 = vcombine.high %v1448_v2, %v1456_v62  ;;  %v8980_v48 = vcombine.low %v1448_v2, %v1456_v62  ;;  %v10758_v2 = vld [vmem:[#allocation49_spill] sm:$0xff]  ;;  %v10759_v62 = vld [vmem:[#allocation47_spill] sm:$0xff]  ;;  %v10761_v6 = vld [vmem:[#allocation50_spill] sm:$0xff] }
 0x337   :  { %v8961_v19 = vmul.f32 %v6934_v60, %v4820_v12  ;;  %4577 = vmatpush1.bf16.msra.mxu0 %v8942_v25  ;;  %v10762_v12 = vld [vmem:[#allocation53_spill] sm:$0xff] }
 0x338   :  { %4659 = vmatpush1.bf16.msra.mxu1 %v8949_v37  ;;  %4578 = vmatprep.subr.bf16.mxu0 %v8951_v54 }
 0x339   :  { %4660 = vmatprep.subr.bf16.mxu1 %v8957_v44 }
 0x33b   :  { %4579 = vmatpush1.bf16.msra.mxu0 %v8964_v4 }
 0x33c   :  { %4661 = vmatpush1.bf16.msra.mxu1 %v8968_v29  ;;  %4580 = vmatprep.subr.bf16.mxu0 %v8970_v8 }
 0x33d   :  { %4662 = vmatprep.subr.bf16.mxu1 %v8973_v0 }
 0x33f   :  { %4581 = vmatpush1.bf16.msra.mxu0 %v8976_v21 }
 0x340   :  { %4663 = vmatpush1.bf16.msra.mxu1 %v8980_v48  ;;  %4861 = vmatprep.subr.bf16.mxu0 %v7296_v7  ;;  %v10726_v7 = vld [vmem:[#allocation17_spill] sm:$0xff] }
 0x341   :  { %4943 = vmatprep.subr.bf16.mxu1 %v7302_v11  ;;  %v10729_v11 = vld [vmem:[#allocation18_spill] sm:$0xff] }
 0x342   :  { %4583 = vmatmul.mubr.bf16.vlgmr.msra.gmra.mrb[28].mxu0 %v7789_v38 }
 0x343   :  { %4665 = vmatmul.mubr.bf16.vlgmr.msra.gmra.mrb[28].mxu1 %v7789_v38  ;;  %4862 = vmatpush1.bf16.msra.mxu0 %v7298_v9  ;;  %v10727_v9 = vld [vmem:[#allocation15_spill] sm:$0xff] }
 0x344   :  { %4944 = vmatpush1.bf16.msra.mxu1 %v7300_v10  ;;  %4863 = vmatprep.subr.bf16.mxu0 %v7308_v14  ;;  %v10728_v10 = vld [vmem:[#allocation16_spill] sm:$0xff]  ;;  %v10730_v14 = vld [vmem:[#allocation21_spill] sm:$0xff]  ;;  %v10755_v38 = vld [vmem:[#allocation43_spill] sm:$0xff] }
 0x345   :  { %4945 = vmatprep.subr.bf16.mxu1 %v7314_v18  ;;  %v10733_v18 = vld [vmem:[#allocation22_spill] sm:$0xff] }
 0x347   :  { %4864 = vmatpush1.bf16.msra.mxu0 %v7310_v16  ;;  %v10731_v16 = vld [vmem:[#allocation19_spill] sm:$0xff] }
 0x348   :  { %4946 = vmatpush1.bf16.msra.mxu1 %v7312_v17  ;;  %4865 = vmatprep.subr.bf16.mxu0 %v7317_v22  ;;  %v10732_v17 = vld [vmem:[#allocation20_spill] sm:$0xff]  ;;  %v10734_v22 = vld [vmem:[#allocation25_spill] sm:$0xff] }
 0x349   :  { %4947 = vmatprep.subr.bf16.mxu1 %v7323_v27  ;;  %v10736_v27 = vld [vmem:[#allocation24_spill] sm:$0xff] }
 0x34b   :  { %4866 = vmatpush1.bf16.msra.mxu0 %v7321_v26  ;;  %v10735_v26 = vld [vmem:[#allocation23_spill] sm:$0xff] }
 0x34c   :  { %4948 = vmatpush1.bf16.msra.mxu1 %v7327_v30  ;;  %4867 = vmatprep.subr.bf16.mxu0 %v7329_v31  ;;  %v10737_v30 = vld [vmem:[#allocation26_spill] sm:$0xff]  ;;  %v10738_v31 = vld [vmem:[#allocation29_spill] sm:$0xff] }
 0x34d   :  { %4949 = vmatprep.subr.bf16.mxu1 %v7332_v32  ;;  %v10739_v32 = vld [vmem:[#allocation27_spill] sm:$0xff] }
 0x34f   :  { %4868 = vmatpush1.bf16.msra.mxu0 %v7335_v33  ;;  %v10740_v33 = vld [vmem:[#allocation28_spill] sm:$0xff] }
 0x350   :  { %4950 = vmatpush1.bf16.msra.mxu1 %v7339_v34  ;;  %4869 = vmatprep.subr.bf16.mxu0 %v7344_v39  ;;  %v10741_v34 = vld [vmem:[#allocation30_spill] sm:$0xff]  ;;  %v10742_v39 = vld [vmem:[#allocation33_spill] sm:$0xff] }
 0x351   :  { %4951 = vmatprep.subr.bf16.mxu1 %v7350_v43  ;;  %v10745_v43 = vld [vmem:[#allocation34_spill] sm:$0xff] }
 0x353   :  { %4870 = vmatpush1.bf16.msra.mxu0 %v7346_v41  ;;  %v10743_v41 = vld [vmem:[#allocation31_spill] sm:$0xff] }
 0x354   :  { %4952 = vmatpush1.bf16.msra.mxu1 %v7348_v42  ;;  %4871 = vmatprep.subr.bf16.mxu0 %v7356_v47  ;;  %v10744_v42 = vld [vmem:[#allocation32_spill] sm:$0xff]  ;;  %v10746_v47 = vld [vmem:[#allocation37_spill] sm:$0xff] }
 0x355   :  { %4953 = vmatprep.subr.bf16.mxu1 %v7362_v51  ;;  %v10749_v51 = vld [vmem:[#allocation38_spill] sm:$0xff] }
 0x357   :  { %4872 = vmatpush1.bf16.msra.mxu0 %v7358_v49  ;;  %v10747_v49 = vld [vmem:[#allocation35_spill] sm:$0xff] }
 0x358   :  { %4954 = vmatpush1.bf16.msra.mxu1 %v7360_v50  ;;  %4873 = vmatprep.subr.bf16.mxu0 %v7368_v55  ;;  %v10748_v50 = vld [vmem:[#allocation36_spill] sm:$0xff]  ;;  %v10750_v55 = vld [vmem:[#allocation41_spill] sm:$0xff] }
 0x359   :  { %4955 = vmatprep.subr.bf16.mxu1 %v7374_v59  ;;  %v10753_v59 = vld [vmem:[#allocation42_spill] sm:$0xff] }
 0x35b   :  { %4874 = vmatpush1.bf16.msra.mxu0 %v7370_v57  ;;  %v10751_v57 = vld [vmem:[#allocation39_spill] sm:$0xff] }
 0x35c   :  { %4956 = vmatpush1.bf16.msra.mxu1 %v7372_v58  ;;  %4875 = vmatprep.subr.bf16.mxu0 %v7380_v63  ;;  %v10752_v58 = vld [vmem:[#allocation40_spill] sm:$0xff]  ;;  %v10754_v63 = vld [vmem:[#allocation45_spill] sm:$0xff] }
 0x35d   :  { %4957 = vmatprep.subr.bf16.mxu1 %v10726_v7 }
 0x35f   :  { %4876 = vmatpush1.bf16.msra.mxu0 %v10727_v9 }
 0x360   :  { %4958 = vmatpush1.bf16.msra.mxu1 %v10728_v10  ;;  %4877 = vmatprep.subr.bf16.mxu0 %v10729_v11 }
 0x361   :  { %4959 = vmatprep.subr.bf16.mxu1 %v10730_v14 }
 0x363   :  { %4878 = vmatpush1.bf16.msra.mxu0 %v10731_v16  ;;  %v10763_v16 = vld [vmem:[#allocation343_spill] sm:$0xff] }
 0x364   :  { %4960 = vmatpush1.bf16.msra.mxu1 %v10732_v17  ;;  %4879 = vmatprep.subr.bf16.mxu0 %v10733_v18  ;;  %v4689_v17 = vrot.slane %v10763_v16, 6  ;;  %v10764_v18 = vld [vmem:[#allocation344_spill] sm:$0xff] }
 0x365   :  { %4961 = vmatprep.subr.bf16.mxu1 %v10734_v22  ;;  %v4691_v22 = vrot.slane %v10764_v18, 6 }
 0x367   :  { %4880 = vmatpush1.bf16.msra.mxu0 %v10735_v26  ;;  %v10765_v26 = vld [vmem:[#allocation54_spill] sm:$0xff] }
 0x368   :  { %4962 = vmatpush1.bf16.msra.mxu1 %v10736_v27  ;;  %4881 = vmatprep.subr.bf16.mxu0 %v10737_v30  ;;  %v4721_v27 = vadd.f32 %v4689_v17, %v10765_v26  ;;  %v10766_v30 = vld [vmem:[#allocation68_spill] sm:$0xff] }
 0x369   :  { %4963 = vmatprep.subr.bf16.mxu1 %v10738_v31  ;;  %v4723_v31 = vadd.f32 %v4691_v22, %v10766_v30 }
 0x36b   :  { %4882 = vmatpush1.bf16.msra.mxu0 %v10739_v32  ;;  %v10767_v32 = vld [vmem:[#allocation346_spill] sm:$0xff] }
 0x36c   :  { %4964 = vmatpush1.bf16.msra.mxu1 %v10740_v33  ;;  %4883 = vmatprep.subr.bf16.mxu0 %v10741_v34  ;;  %v4690_v33 = vrot.slane %v10767_v32, 6  ;;  %v10768_v34 = vld [vmem:[#allocation347_spill] sm:$0xff] }
 0x36d   :  { %4965 = vmatprep.subr.bf16.mxu1 %v10742_v39  ;;  %v4692_v39 = vrot.slane %v10768_v34, 6 }
 0x36f   :  { %4884 = vmatpush1.bf16.msra.mxu0 %v10743_v41  ;;  %v6665_v41 = vmul.f32 -1.442695, %v4721_v27 }
 0x370   :  { %4966 = vmatpush1.bf16.msra.mxu1 %v10744_v42  ;;  %4885 = vmatprep.subr.bf16.mxu0 %v10745_v43  ;;  %v6667_v42 = vmul.f32 -1.442695, %v4723_v31  ;;  %v10769_v43 = vld [vmem:[#allocation55_spill] sm:$0xff] }
 0x371   :  { %4967 = vmatprep.subr.bf16.mxu1 %v10746_v47  ;;  %v4722_v47 = vadd.f32 %v4690_v33, %v10769_v43  ;;  %6935 = vpow2.f32 %v6665_v41 }
 0x372   :  { %6937 = vpow2.f32 %v6667_v42 }
 0x373   :  { %4886 = vmatpush1.bf16.msra.mxu0 %v10747_v49  ;;  %v10770_v49 = vld [vmem:[#allocation56_spill] sm:$0xff] }
 0x374   :  { %4968 = vmatpush1.bf16.msra.mxu1 %v10748_v50  ;;  %4887 = vmatprep.subr.bf16.mxu0 %v10749_v51  ;;  %v4724_v50 = vadd.f32 %v4692_v39, %v10770_v49  ;;  %v6666_v51 = vmul.f32 -1.442695, %v4722_v47  ;;  %v10775_v47 = vld [vmem:[#allocation61_spill] sm:$0xff] }
 0x375   :  { %4969 = vmatprep.subr.bf16.mxu1 %v10750_v55 }
 0x376   :  { %v6668_v55 = vmul.f32 -1.442695, %v4724_v50  ;;  %6939 = vpow2.f32 %v6666_v51 }
 0x377   :  { %4888 = vmatpush1.bf16.msra.mxu0 %v10751_v57 }
 0x378   :  { %4970 = vmatpush1.bf16.msra.mxu1 %v10752_v58  ;;  %4889 = vmatprep.subr.bf16.mxu0 %v10753_v59  ;;  %6941 = vpow2.f32 %v6668_v55 }
 0x379   :  { %4971 = vmatprep.subr.bf16.mxu1 %v10754_v63 }
 0x37b   :  { %4890 = vmatpush1.bf16.msra.mxu0 %v10755_v38  ;;  %v6936_v63 = vpop.eup %6935 }
 0x37c   :  { %4972 = vmatpush1.bf16.msra.mxu1 %v10756_v53  ;;  %4891 = vmatprep.subr.bf16.mxu0 %v10757_v40  ;;  %v6938_v53 = vpop.eup %6937  ;;  %v10771_v40 = vld [vmem:[#allocation57_spill] sm:$0xff] }
 0x37d   :  { %4973 = vmatprep.subr.bf16.mxu1 %v10758_v2 }
 0x37f   :  { %4892 = vmatpush1.bf16.msra.mxu0 %v10759_v62  ;;  %v10772_v62 = vld [vmem:[#allocation59_spill] sm:$0xff] }
 0x380   :  { %4974 = vmatpush1.bf16.msra.mxu1 %v10760_v5  ;;  %4902 = vmatprep.subr.bf16.mxu0 %v10761_v6  ;;  %v4773_v6 = vadd.f32 1.0, %v6936_v63  ;;  %v6940_v17 = vpop.eup %6939  ;;  %v10777_v63 = vld [vmem:[#allocation62_spill] sm:$0xff] }
 0x381   :  { %4984 = vmatprep.subr.bf16.mxu1 %v10762_v12  ;;  %v10773_v12 = vld [vmem:[#allocation58_spill] sm:$0xff] }
 0x382   :  { %v6942_v22 = vpop.eup %6941  ;;  %6943 = vrcp.f32 %v4773_v6 }
 0x38c   :  { %v6944_v6 = vpop.eup %6943 }
 0x395   :  { %v4420_v35 = vpop.f32.mrb[24].mxu0 }
 0x396   :  { %v4502_v13 = vpop.f32.mrb[24].mxu1  ;;  %v4422_v60 = vpop.f32.mrb[25].mxu0  ;;  %v4697_v57 = vrot.slane %v4420_v35, 6 }
 0x397   :  { %v4504_v7 = vpop.f32.mrb[25].mxu1  ;;  %v4424_v9 = vpop.f32.mrb[26].mxu0  ;;  %v4699_v58 = vrot.slane %v4502_v13, 6  ;;  %v4698_v59 = vrot.slane %v4422_v60, 6  ;;  %v4774_v60 = vadd.f32 1.0, %v6940_v17 }
 0x398   :  { %v4506_v10 = vpop.f32.mrb[26].mxu1  ;;  %v4425_v11 = vpop.f32.mrb[27].mxu0  ;;  %v4700_v38 = vrot.slane %v4504_v7, 6  ;;  %v4729_v2 = vadd.f32 %v4697_v57, %v10771_v40  ;;  %v4776_v7 = vadd.f32 1.0, %v6942_v22 }
 0x399   :  { %v4507_v14 = vpop.f32.mrb[27].mxu1  ;;  %v4731_v5 = vadd.f32 %v4699_v58, %v10772_v62  ;;  %v4730_v9 = vadd.f32 %v4698_v59, %v10773_v12  ;;  %v4775_v10 = vadd.f32 1.0, %v6938_v53  ;;  %v10774_v11 = vld [vmem:[#allocation60_spill] sm:$0xff]  ;;  %v10776_v58 = vld [vmem:[#allocation63_spill] sm:$0xff] }
 0x39a   :  { %v4732_v14 = vadd.f32 %v4700_v38, %v10774_v11  ;;  %v6673_v16 = vmul.f32 -1.442695, %v4729_v2  ;;  %v10778_v2 = vld [vmem:[#allocation64_spill] sm:$0xff] }
 0x39b   :  { %v6675_v18 = vmul.f32 -1.442695, %v4731_v5  ;;  %v6674_v35 = vmul.f32 -1.442695, %v4730_v9  ;;  %6945 = vrcp.f32 %v4775_v10 }
 0x39c   :  { %v6676_v13 = vmul.f32 -1.442695, %v4732_v14  ;;  %6947 = vpow2.f32 %v6673_v16 }
 0x39d   :  { %6949 = vpow2.f32 %v6675_v18 }
 0x39e   :  { %6951 = vpow2.f32 %v6674_v35 }
 0x39f   :  { %6953 = vpow2.f32 %v6676_v13 }
 0x3a0   :  { %6955 = vrcp.f32 %v4774_v60 }
 0x3a1   :  { %6957 = vrcp.f32 %v4776_v7 }
 0x3a5   :  { %v6946_v9 = vpop.eup %6945 }
 0x3a6   :  { %v6948_v10 = vpop.eup %6947 }
 0x3a7   :  { %v6950_v14 = vpop.eup %6949  ;;  %v4781_v18 = vadd.f32 1.0, %v6948_v10 }
 0x3a8   :  { %v6952_v16 = vpop.eup %6951  ;;  %v4783_v35 = vadd.f32 1.0, %v6950_v14 }
 0x3a9   :  { %v6954_v17 = vpop.eup %6953  ;;  %v4782_v60 = vadd.f32 1.0, %v6952_v16 }
 0x3aa   :  { %v6956_v22 = vpop.eup %6955 }
 0x3ab   :  { %v6958_v13 = vpop.eup %6957 }
 0x415   :  { %v4584_v27 = vpop.f32.mrb[28].mxu0 }
 0x416   :  { %v4701_v31 = vrot.slane %v4584_v27, 6  ;;  %v4666_v32 = vpop.f32.mrb[28].mxu1  ;;  %v4586_v33 = vpop.f32.mrb[29].mxu0  ;;  %v4784_v27 = vadd.f32 1.0, %v6954_v17 }
 0x417   :  { %v4703_v34 = vrot.slane %v4666_v32, 6  ;;  %v4702_v39 = vrot.slane %v4586_v33, 6  ;;  %v4668_v41 = vpop.f32.mrb[29].mxu1  ;;  %v4588_v42 = vpop.f32.mrb[30].mxu0 }
 0x418   :  { %v4733_v50 = vadd.f32 %v4701_v31, %v10775_v47  ;;  %v4704_v51 = vrot.slane %v4668_v41, 6  ;;  %v4670_v55 = vpop.f32.mrb[30].mxu1  ;;  %v4589_v57 = vpop.f32.mrb[31].mxu0 }
 0x419   :  { %v4735_v59 = vadd.f32 %v4703_v34, %v10776_v58  ;;  %v4734_v38 = vadd.f32 %v4702_v39, %v10777_v63  ;;  %v4671_v53 = vpop.f32.mrb[31].mxu1 }
 0x41a   :  { %6959 = vtanh.f32 %v4733_v50  ;;  %v4736_v5 = vadd.f32 %v4704_v51, %v10778_v2 }
 0x41b   :  { %6961 = vtanh.f32 %v4735_v59 }
 0x41c   :  { %6963 = vtanh.f32 %v4734_v38 }
 0x41d   :  { %6965 = vtanh.f32 %v4736_v5 }
 0x41e   :  { %6967 = vrcp.f32 %v4781_v18 }
 0x41f   :  { %6969 = vrcp.f32 %v4783_v35 }
 0x420   :  { %6971 = vrcp.f32 %v4782_v60  ;;  %v10779_v60 = vld [vmem:[#allocation51_spill] sm:$0xff] }
 0x421   :  { %6973 = vrcp.f32 %v4784_v27  ;;  %v10781_v27 = vld [vmem:[#allocation65_spill] sm:$0xff] }
 0x424   :  { %v6960_v7 = vpop.eup %6959 }
 0x425   :  { %v6962_v31 = vpop.eup %6961  ;;  %v4829_v32 = vmul.f32 %v6960_v7, %v6944_v6  ;;  %v10780_v7 = vld [vmem:[#allocation52_spill] sm:$0xff] }
 0x426   :  { %v6964_v33 = vpop.eup %6963  ;;  %v4831_v34 = vmul.f32 %v6962_v31, %v6946_v9  ;;  %v10782_v31 = vld [vmem:[#allocation66_spill] sm:$0xff] }
 0x427   :  { %v6966_v39 = vpop.eup %6965  ;;  %v9070_v41 = vadd.f32 %v4829_v32, %v8945_v36  ;;  %v4830_v42 = vmul.f32 %v6964_v33, %v6956_v22  ;;  %v10783_v32 = vld [vmem:[#allocation67_spill] sm:$0xff]  ;;  %v10784_v33 = vld [vmem:[#allocation69_spill] sm:$0xff] }
 0x428   :  { %v9073_v50 = vadd.f32 %v4831_v34, %v8954_v23  ;;  %v4832_v51 = vmul.f32 %v6966_v39, %v6958_v13  ;;  %v6968_v36 = vpop.eup %6967  ;;  %v10785_v34 = vld [vmem:[#allocation70_spill] sm:$0xff]  ;;  %v10786_v39 = vld [vmem:[#allocation71_spill] sm:$0xff] }
 0x429   :  { %6975 = vtanh.f32 %v9070_v41  ;;  %v9077_v55 = vadd.f32 %v4830_v42, %v8959_v20  ;;  %v6970_v59 = vpop.eup %6969  ;;  %v10787_v42 = vld [vmem:[#allocation72_spill] sm:$0xff] }
 0x42a   :  { %6977 = vtanh.f32 %v9073_v50  ;;  %v9081_v57 = vadd.f32 %v4832_v51, %v8961_v19  ;;  %v6972_v38 = vpop.eup %6971  ;;  %v10788_v51 = vld [vmem:[#allocation73_spill] sm:$0xff] }
 0x42b   :  { %6979 = vtanh.f32 %v9077_v55  ;;  %v6974_v23 = vpop.eup %6973 }
 0x42c   :  { %6981 = vtanh.f32 %v9081_v57 }
 0x433   :  { %v6976_v53 = vpop.eup %6975 }
 0x434   :  { %v6978_v5 = vpop.eup %6977  ;;  %v4841_v6 = vmul.f32 %v6976_v53, %v6968_v36  ;;  %v10789_v36 = vld [vmem:[#allocation74_spill] sm:$0xff] }
 0x435   :  { %v6980_v9 = vpop.eup %6979  ;;  %v9085_v10 = vmul.f32 %v6978_v5, %v6970_v59  ;;  %v10790_v59 = vld [vmem:[#allocation75_spill] sm:$0xff]  ;;  %v10793_v53 = vld [vmem:[#allocation78_spill] sm:$0xff] }
 0x436   :  { %v6982_v20 = vpop.eup %6981  ;;  %v4842_v14 = vmul.f32 %v6980_v9, %v6972_v38  ;;  %v4845_v16 = vpack.c.bf16 %v4841_v6, %v4841_v6  ;;  %v10791_v38 = vld [vmem:[#allocation76_spill] sm:$0xff]  ;;  %v10794_v5 = vld [vmem:[#allocation79_spill] sm:$0xff]  ;;  %v10796_v9 = vld [vmem:[#allocation81_spill] sm:$0xff] }
 0x437   :  { %v4844_v17 = vmul.f32 %v6982_v20, %v6974_v23  ;;  %v10792_v23 = vld [vmem:[#allocation77_spill] sm:$0xff]  ;;  %v10795_v6 = vld [vmem:[#allocation80_spill] sm:$0xff]  ;;  %v10797_v20 = vld [vmem:[#allocation82_spill] sm:$0xff] }
 0x438   :  { %v4846_v19 = vpack.c.bf16 %v4842_v14, %v4842_v14  ;;  %v9089_v35 = vrot.slane %v4845_v16, 1  ;;  %v10798_v14 = vld [vmem:[#allocation83_spill] sm:$0xff]  ;;  %v10799_v16 = vld [vmem:[#allocation84_spill] sm:$0xff] }
 0x439   :  { %v4848_v18 = vpack.c.bf16 %v4844_v17, %v4844_v17  ;;  %v10800_v17 = vld [vmem:[#allocation85_spill] sm:$0xff] }
 0x43a   :  { %v9087_v22 = vrot.slane %v4846_v19, 1  ;;  %v10801_v19 = vld [vmem:[#allocation86_spill] sm:$0xff] }
 0x43b   :  { %v9093_v13 = vrot.slane %v4848_v18, 1  ;;  %v10802_v18 = vld [vmem:[#allocation87_spill] sm:$0xff] }
 0x43c   :  { %4893 = vmatprep.mubr.bf16.mxu0 %v9087_v22  ;;  %4975 = vmatprep.mubr.bf16.mxu1 %v9087_v22 }
 0x43d   :  { %4894 = vmatmul.mubr.bf16.vlgmr.msra.gmra.mrb[32].mxu0 %v9089_v35  ;;  %4976 = vmatmul.mubr.bf16.vlgmr.msra.gmra.mrb[32].mxu1 %v9089_v35 }
 0x43e   :  { %4903 = vmatpush1.bf16.msra.mxu0 %v10779_v60  ;;  %4985 = vmatpush1.bf16.msra.mxu1 %v10780_v7  ;;  %v10803_v60 = vld [vmem:[#allocation88_spill] sm:$0xff]  ;;  %v10804_v7 = vld [vmem:[#allocation89_spill] sm:$0xff] }
 0x43f   :  { %4934 = vmatprep.mubr.bf16.mxu0 %v9093_v13  ;;  %5016 = vmatprep.mubr.bf16.mxu1 %v9093_v13 }
 0x440   :  { %4904 = vmatprep.subr.bf16.mxu0 %v10781_v27  ;;  %4986 = vmatprep.subr.bf16.mxu1 %v10782_v31  ;;  %v10805_v27 = vld [vmem:[#allocation90_spill] sm:$0xff]  ;;  %v10806_v31 = vld [vmem:[#allocation91_spill] sm:$0xff] }
 0x442   :  { %4905 = vmatpush1.bf16.msra.mxu0 %v10783_v32  ;;  %4987 = vmatpush1.bf16.msra.mxu1 %v10784_v33  ;;  %v10807_v32 = vld [vmem:[#allocation92_spill] sm:$0xff]  ;;  %v10808_v33 = vld [vmem:[#allocation93_spill] sm:$0xff] }
 0x443   :  { %4906 = vmatprep.subr.bf16.mxu0 %v10785_v34  ;;  %4988 = vmatprep.subr.bf16.mxu1 %v10786_v39  ;;  %v10809_v34 = vld [vmem:[#allocation94_spill] sm:$0xff]  ;;  %v10810_v39 = vld [vmem:[#allocation95_spill] sm:$0xff] }
 0x446   :  { %4907 = vmatpush1.bf16.msra.mxu0 %v10787_v42  ;;  %4989 = vmatpush1.bf16.msra.mxu1 %v10788_v51  ;;  %v10811_v42 = vld [vmem:[#allocation96_spill] sm:$0xff]  ;;  %v10812_v51 = vld [vmem:[#allocation97_spill] sm:$0xff] }
 0x447   :  { %4908 = vmatprep.subr.bf16.mxu0 %v10789_v36  ;;  %4990 = vmatprep.subr.bf16.mxu1 %v10790_v59  ;;  %v10813_v36 = vld [vmem:[#allocation98_spill] sm:$0xff]  ;;  %v10814_v59 = vld [vmem:[#allocation99_spill] sm:$0xff] }
 0x44a   :  { %4909 = vmatpush1.bf16.msra.mxu0 %v10791_v38  ;;  %4991 = vmatpush1.bf16.msra.mxu1 %v10792_v23  ;;  %v10815_v38 = vld [vmem:[#allocation100_spill] sm:$0xff]  ;;  %v10816_v23 = vld [vmem:[#allocation101_spill] sm:$0xff] }
 0x44b   :  { %4910 = vmatprep.subr.bf16.mxu0 %v10793_v53  ;;  %4992 = vmatprep.subr.bf16.mxu1 %v10794_v5  ;;  %v10817_v53 = vld [vmem:[#allocation102_spill] sm:$0xff]  ;;  %v10818_v5 = vld [vmem:[#allocation103_spill] sm:$0xff] }
 0x44e   :  { %4911 = vmatpush1.bf16.msra.mxu0 %v10795_v6  ;;  %4993 = vmatpush1.bf16.msra.mxu1 %v10796_v9  ;;  %v10819_v6 = vld [vmem:[#allocation104_spill] sm:$0xff]  ;;  %v10820_v9 = vld [vmem:[#allocation105_spill] sm:$0xff] }
 0x44f   :  { %4912 = vmatprep.subr.bf16.mxu0 %v10797_v20  ;;  %4994 = vmatprep.subr.bf16.mxu1 %v10798_v14  ;;  %v10821_v20 = vld [vmem:[#allocation106_spill] sm:$0xff]  ;;  %v10822_v14 = vld [vmem:[#allocation107_spill] sm:$0xff] }
 0x452   :  { %4913 = vmatpush1.bf16.msra.mxu0 %v10799_v16  ;;  %4995 = vmatpush1.bf16.msra.mxu1 %v10800_v17  ;;  %v10823_v16 = vld [vmem:[#allocation108_spill] sm:$0xff]  ;;  %v10824_v17 = vld [vmem:[#allocation109_spill] sm:$0xff] }
 0x453   :  { %4914 = vmatprep.subr.bf16.mxu0 %v10801_v19  ;;  %4996 = vmatprep.subr.bf16.mxu1 %v10802_v18  ;;  %v10825_v19 = vld [vmem:[#allocation110_spill] sm:$0xff]  ;;  %v10826_v18 = vld [vmem:[#allocation111_spill] sm:$0xff] }
 0x456   :  { %4915 = vmatpush1.bf16.msra.mxu0 %v10803_v60  ;;  %4997 = vmatpush1.bf16.msra.mxu1 %v10804_v7  ;;  %v10827_v60 = vld [vmem:[#allocation112_spill] sm:$0xff]  ;;  %v10828_v7 = vld [vmem:[#allocation113_spill] sm:$0xff] }
 0x457   :  { %4916 = vmatprep.subr.bf16.mxu0 %v10805_v27  ;;  %4998 = vmatprep.subr.bf16.mxu1 %v10806_v31  ;;  %v10829_v27 = vld [vmem:[#allocation114_spill] sm:$0xff]  ;;  %v10830_v31 = vld [vmem:[#allocation115_spill] sm:$0xff] }
 0x45a   :  { %4917 = vmatpush1.bf16.msra.mxu0 %v10807_v32  ;;  %4999 = vmatpush1.bf16.msra.mxu1 %v10808_v33  ;;  %v10831_v32 = vld [vmem:[#allocation116_spill] sm:$0xff]  ;;  %v10832_v33 = vld [vmem:[#allocation117_spill] sm:$0xff] }
 0x45b   :  { %4918 = vmatprep.subr.bf16.mxu0 %v10809_v34  ;;  %5000 = vmatprep.subr.bf16.mxu1 %v10810_v39  ;;  %v10833_v34 = vld [vmem:[#allocation118_spill] sm:$0xff]  ;;  %v10834_v39 = vld [vmem:[#allocation119_spill] sm:$0xff] }
 0x45e   :  { %4919 = vmatpush1.bf16.msra.mxu0 %v10811_v42  ;;  %5001 = vmatpush1.bf16.msra.mxu1 %v10812_v51  ;;  %v10835_v42 = vld [vmem:[#allocation120_spill] sm:$0xff]  ;;  %v10836_v51 = vld [vmem:[#allocation121_spill] sm:$0xff] }
 0x45f   :  { %4920 = vmatprep.subr.bf16.mxu0 %v10813_v36  ;;  %5002 = vmatprep.subr.bf16.mxu1 %v10814_v59  ;;  %v4847_v36 = vpack.c.bf16 %v9085_v10, %v9085_v10  ;;  %v10837_v59 = vld [vmem:[#allocation122_spill] sm:$0xff]  ;;  %v10844_v10 = vld [vmem:[#allocation129_spill] sm:$0xff] }
 0x462   :  { %4921 = vmatpush1.bf16.msra.mxu0 %v10815_v38  ;;  %5003 = vmatpush1.bf16.msra.mxu1 %v10816_v23  ;;  %v10838_v38 = vld [vmem:[#allocation123_spill] sm:$0xff]  ;;  %v10839_v23 = vld [vmem:[#allocation124_spill] sm:$0xff] }
 0x463   :  { %4922 = vmatprep.subr.bf16.mxu0 %v10817_v53  ;;  %5004 = vmatprep.subr.bf16.mxu1 %v10818_v5  ;;  %v10840_v53 = vld [vmem:[#allocation125_spill] sm:$0xff]  ;;  %v9163_v5 = vrot.slane %v4847_v36, 1 }
 0x464   :  { %v10860_v36 = vld [vmem:[#allocation145_spill] sm:$0xff] }
 0x466   :  { %4923 = vmatpush1.bf16.msra.mxu0 %v10819_v6  ;;  %5005 = vmatpush1.bf16.msra.mxu1 %v10820_v9  ;;  %v10841_v6 = vld [vmem:[#allocation126_spill] sm:$0xff]  ;;  %v10842_v9 = vld [vmem:[#allocation127_spill] sm:$0xff] }
 0x467   :  { %4924 = vmatprep.subr.bf16.mxu0 %v10821_v20  ;;  %5006 = vmatprep.subr.bf16.mxu1 %v10822_v14  ;;  %v10843_v20 = vld [vmem:[#allocation128_spill] sm:$0xff]  ;;  %v10845_v14 = vld [vmem:[#allocation130_spill] sm:$0xff] }
 0x46a   :  { %4925 = vmatpush1.bf16.msra.mxu0 %v10823_v16  ;;  %5007 = vmatpush1.bf16.msra.mxu1 %v10824_v17  ;;  %v10846_v16 = vld [vmem:[#allocation131_spill] sm:$0xff]  ;;  %v10847_v17 = vld [vmem:[#allocation132_spill] sm:$0xff] }
 0x46b   :  { %4926 = vmatprep.subr.bf16.mxu0 %v10825_v19  ;;  %5008 = vmatprep.subr.bf16.mxu1 %v10826_v18  ;;  %v10848_v19 = vld [vmem:[#allocation133_spill] sm:$0xff]  ;;  %v10849_v18 = vld [vmem:[#allocation134_spill] sm:$0xff] }
 0x46e   :  { %4927 = vmatpush1.bf16.msra.mxu0 %v10827_v60  ;;  %5009 = vmatpush1.bf16.msra.mxu1 %v10828_v7  ;;  %v10850_v60 = vld [vmem:[#allocation135_spill] sm:$0xff]  ;;  %v10851_v7 = vld [vmem:[#allocation136_spill] sm:$0xff] }
 0x46f   :  { %4928 = vmatprep.subr.bf16.mxu0 %v10829_v27  ;;  %5010 = vmatprep.subr.bf16.mxu1 %v10830_v31  ;;  %v10852_v27 = vld [vmem:[#allocation137_spill] sm:$0xff]  ;;  %v10853_v31 = vld [vmem:[#allocation138_spill] sm:$0xff] }
 0x472   :  { %4929 = vmatpush1.bf16.msra.mxu0 %v10831_v32  ;;  %5011 = vmatpush1.bf16.msra.mxu1 %v10832_v33  ;;  %v10854_v32 = vld [vmem:[#allocation139_spill] sm:$0xff]  ;;  %v10855_v33 = vld [vmem:[#allocation140_spill] sm:$0xff] }
 0x473   :  { %4930 = vmatprep.subr.bf16.mxu0 %v10833_v34  ;;  %5012 = vmatprep.subr.bf16.mxu1 %v10834_v39  ;;  %v10856_v34 = vld [vmem:[#allocation141_spill] sm:$0xff]  ;;  %v10857_v39 = vld [vmem:[#allocation142_spill] sm:$0xff] }
 0x476   :  { %4931 = vmatpush1.bf16.msra.mxu0 %v10835_v42  ;;  %5013 = vmatpush1.bf16.msra.mxu1 %v10836_v51  ;;  %v10858_v42 = vld [vmem:[#allocation143_spill] sm:$0xff]  ;;  %v10859_v51 = vld [vmem:[#allocation144_spill] sm:$0xff] }
 0x477   :  { %4932 = vmatprep.subr.bf16.mxu0 %v10837_v59  ;;  %5014 = vmatprep.subr.bf16.mxu1 %v10838_v38  ;;  %v10861_v59 = vld [vmem:[#allocation146_spill] sm:$0xff]  ;;  %v10862_v38 = vld [vmem:[#allocation147_spill] sm:$0xff] }
 0x47a   :  { %4933 = vmatpush1.bf16.msra.mxu0 %v10839_v23  ;;  %5015 = vmatpush1.bf16.msra.mxu1 %v10840_v53  ;;  %v10863_v23 = vld [vmem:[#allocation148_spill] sm:$0xff]  ;;  %v10864_v53 = vld [vmem:[#allocation149_spill] sm:$0xff] }
 0x47b   :  { %5025 = vmatprep.subr.bf16.mxu0 %v10841_v6  ;;  %5107 = vmatprep.subr.bf16.mxu1 %v10842_v9  ;;  %v10865_v6 = vld [vmem:[#allocation150_spill] sm:$0xff]  ;;  %v10866_v9 = vld [vmem:[#allocation151_spill] sm:$0xff] }
 0x47d   :  { %4935 = vmatmul.mubr.bf16.vlgmr.msra.gmra.mrb[32].mxu0 %v9163_v5  ;;  %5017 = vmatmul.mubr.bf16.vlgmr.msra.gmra.mrb[32].mxu1 %v9163_v5 }
 0x47e   :  { %5026 = vmatpush1.bf16.msra.mxu0 %v10843_v20  ;;  %5057 = vmatprep.mubr.bf16.mxu0 %v9087_v22  ;;  %v10867_v20 = vld [vmem:[#allocation152_spill] sm:$0xff] }
 0x47f   :  { %5108 = vmatpush1.bf16.msra.mxu1 %v10844_v10  ;;  %5139 = vmatprep.mubr.bf16.mxu1 %v9087_v22  ;;  %v10868_v10 = vld [vmem:[#allocation153_spill] sm:$0xff] }
 0x480   :  { %5027 = vmatprep.subr.bf16.mxu0 %v10845_v14  ;;  %5109 = vmatprep.subr.bf16.mxu1 %v10846_v16  ;;  %v10869_v14 = vld [vmem:[#allocation154_spill] sm:$0xff]  ;;  %v10870_v16 = vld [vmem:[#allocation155_spill] sm:$0xff] }
 0x482   :  { %5028 = vmatpush1.bf16.msra.mxu0 %v10847_v17  ;;  %v10871_v17 = vld [vmem:[#allocation156_spill] sm:$0xff] }
 0x483   :  { %5110 = vmatpush1.bf16.msra.mxu1 %v10848_v19  ;;  %5029 = vmatprep.subr.bf16.mxu0 %v10849_v18  ;;  %v10872_v19 = vld [vmem:[#allocation157_spill] sm:$0xff]  ;;  %v10873_v18 = vld [vmem:[#allocation158_spill] sm:$0xff] }
 0x484   :  { %5111 = vmatprep.subr.bf16.mxu1 %v10850_v60  ;;  %v10874_v60 = vld [vmem:[#allocation159_spill] sm:$0xff] }
 0x486   :  { %5030 = vmatpush1.bf16.msra.mxu0 %v10851_v7  ;;  %v10875_v7 = vld [vmem:[#allocation160_spill] sm:$0xff] }
 0x487   :  { %5112 = vmatpush1.bf16.msra.mxu1 %v10852_v27  ;;  %5031 = vmatprep.subr.bf16.mxu0 %v10853_v31  ;;  %v10876_v27 = vld [vmem:[#allocation161_spill] sm:$0xff]  ;;  %v10877_v31 = vld [vmem:[#allocation162_spill] sm:$0xff] }
 0x488   :  { %5113 = vmatprep.subr.bf16.mxu1 %v10854_v32  ;;  %v10878_v32 = vld [vmem:[#allocation163_spill] sm:$0xff] }
 0x48a   :  { %5032 = vmatpush1.bf16.msra.mxu0 %v10855_v33  ;;  %v10879_v33 = vld [vmem:[#allocation164_spill] sm:$0xff] }
 0x48b   :  { %5114 = vmatpush1.bf16.msra.mxu1 %v10856_v34  ;;  %5033 = vmatprep.subr.bf16.mxu0 %v10857_v39  ;;  %v10880_v34 = vld [vmem:[#allocation165_spill] sm:$0xff]  ;;  %v10881_v39 = vld [vmem:[#allocation166_spill] sm:$0xff] }
 0x48c   :  { %5115 = vmatprep.subr.bf16.mxu1 %v10858_v42  ;;  %v10882_v42 = vld [vmem:[#allocation167_spill] sm:$0xff] }
 0x48e   :  { %5034 = vmatpush1.bf16.msra.mxu0 %v10859_v51  ;;  %v10883_v51 = vld [vmem:[#allocation168_spill] sm:$0xff] }
 0x48f   :  { %5116 = vmatpush1.bf16.msra.mxu1 %v10860_v36  ;;  %5035 = vmatprep.subr.bf16.mxu0 %v10861_v59  ;;  %v10884_v36 = vld [vmem:[#allocation169_spill] sm:$0xff]  ;;  %v10885_v59 = vld [vmem:[#allocation170_spill] sm:$0xff] }
 0x490   :  { %5117 = vmatprep.subr.bf16.mxu1 %v10862_v38  ;;  %v10886_v38 = vld [vmem:[#allocation171_spill] sm:$0xff] }
 0x492   :  { %5036 = vmatpush1.bf16.msra.mxu0 %v10863_v23  ;;  %v10887_v23 = vld [vmem:[#allocation172_spill] sm:$0xff] }
 0x493   :  { %5118 = vmatpush1.bf16.msra.mxu1 %v10864_v53  ;;  %5037 = vmatprep.subr.bf16.mxu0 %v10865_v6  ;;  %v10888_v53 = vld [vmem:[#allocation173_spill] sm:$0xff]  ;;  %v10889_v6 = vld [vmem:[#allocation174_spill] sm:$0xff] }
 0x494   :  { %5119 = vmatprep.subr.bf16.mxu1 %v10866_v9  ;;  %v10890_v9 = vld [vmem:[#allocation175_spill] sm:$0xff] }
 0x496   :  { %5038 = vmatpush1.bf16.msra.mxu0 %v10867_v20  ;;  %v10891_v20 = vld [vmem:[#allocation176_spill] sm:$0xff] }
 0x497   :  { %5120 = vmatpush1.bf16.msra.mxu1 %v10868_v10  ;;  %5039 = vmatprep.subr.bf16.mxu0 %v10869_v14  ;;  %v10892_v10 = vld [vmem:[#allocation177_spill] sm:$0xff]  ;;  %v10893_v14 = vld [vmem:[#allocation178_spill] sm:$0xff] }
 0x498   :  { %5121 = vmatprep.subr.bf16.mxu1 %v10870_v16  ;;  %v10894_v16 = vld [vmem:[#allocation179_spill] sm:$0xff] }
 0x49a   :  { %5040 = vmatpush1.bf16.msra.mxu0 %v10871_v17  ;;  %v10895_v17 = vld [vmem:[#allocation180_spill] sm:$0xff] }
 0x49b   :  { %5122 = vmatpush1.bf16.msra.mxu1 %v10872_v19  ;;  %5041 = vmatprep.subr.bf16.mxu0 %v10873_v18  ;;  %v10896_v19 = vld [vmem:[#allocation181_spill] sm:$0xff]  ;;  %v10897_v18 = vld [vmem:[#allocation182_spill] sm:$0xff] }
 0x49c   :  { %5123 = vmatprep.subr.bf16.mxu1 %v10874_v60  ;;  %v10898_v60 = vld [vmem:[#allocation183_spill] sm:$0xff] }
 0x49e   :  { %5042 = vmatpush1.bf16.msra.mxu0 %v10875_v7  ;;  %v10899_v7 = vld [vmem:[#allocation184_spill] sm:$0xff] }
 0x49f   :  { %5124 = vmatpush1.bf16.msra.mxu1 %v10876_v27  ;;  %5043 = vmatprep.subr.bf16.mxu0 %v10877_v31  ;;  %v10900_v27 = vld [vmem:[#allocation185_spill] sm:$0xff]  ;;  %v10901_v31 = vld [vmem:[#allocation186_spill] sm:$0xff] }
 0x4a0   :  { %5125 = vmatprep.subr.bf16.mxu1 %v10878_v32  ;;  %v10902_v32 = vld [vmem:[#allocation187_spill] sm:$0xff] }
 0x4a2   :  { %5044 = vmatpush1.bf16.msra.mxu0 %v10879_v33  ;;  %v10903_v33 = vld [vmem:[#allocation188_spill] sm:$0xff] }
 0x4a3   :  { %5126 = vmatpush1.bf16.msra.mxu1 %v10880_v34  ;;  %5045 = vmatprep.subr.bf16.mxu0 %v10881_v39  ;;  %v10904_v34 = vld [vmem:[#allocation189_spill] sm:$0xff]  ;;  %v10905_v39 = vld [vmem:[#allocation190_spill] sm:$0xff] }
 0x4a4   :  { %5127 = vmatprep.subr.bf16.mxu1 %v10882_v42  ;;  %v10906_v42 = vld [vmem:[#allocation191_spill] sm:$0xff] }
 0x4a6   :  { %5046 = vmatpush1.bf16.msra.mxu0 %v10883_v51  ;;  %v10907_v51 = vld [vmem:[#allocation192_spill] sm:$0xff] }
 0x4a7   :  { %5128 = vmatpush1.bf16.msra.mxu1 %v10884_v36  ;;  %5047 = vmatprep.subr.bf16.mxu0 %v10885_v59  ;;  %v10908_v36 = vld [vmem:[#allocation193_spill] sm:$0xff]  ;;  %v10909_v59 = vld [vmem:[#allocation194_spill] sm:$0xff] }
 0x4a8   :  { %5129 = vmatprep.subr.bf16.mxu1 %v10886_v38  ;;  %v10910_v38 = vld [vmem:[#allocation195_spill] sm:$0xff] }
 0x4aa   :  { %5048 = vmatpush1.bf16.msra.mxu0 %v10887_v23  ;;  %v10911_v23 = vld [vmem:[#allocation196_spill] sm:$0xff] }
 0x4ab   :  { %5130 = vmatpush1.bf16.msra.mxu1 %v10888_v53  ;;  %5049 = vmatprep.subr.bf16.mxu0 %v10889_v6  ;;  %v10912_v53 = vld [vmem:[#allocation197_spill] sm:$0xff]  ;;  %v10913_v6 = vld [vmem:[#allocation198_spill] sm:$0xff] }
 0x4ac   :  { %5131 = vmatprep.subr.bf16.mxu1 %v10890_v9  ;;  %v10914_v9 = vld [vmem:[#allocation199_spill] sm:$0xff] }
 0x4ae   :  { %5050 = vmatpush1.bf16.msra.mxu0 %v10891_v20  ;;  %v10915_v20 = vld [vmem:[#allocation200_spill] sm:$0xff] }
 0x4af   :  { %5132 = vmatpush1.bf16.msra.mxu1 %v10892_v10  ;;  %5051 = vmatprep.subr.bf16.mxu0 %v10893_v14  ;;  %v10916_v10 = vld [vmem:[#allocation201_spill] sm:$0xff]  ;;  %v10917_v14 = vld [vmem:[#allocation202_spill] sm:$0xff] }
 0x4b0   :  { %5133 = vmatprep.subr.bf16.mxu1 %v10894_v16  ;;  %v10918_v16 = vld [vmem:[#allocation203_spill] sm:$0xff] }
 0x4b2   :  { %5052 = vmatpush1.bf16.msra.mxu0 %v10895_v17  ;;  %v10919_v17 = vld [vmem:[#allocation204_spill] sm:$0xff] }
 0x4b3   :  { %5134 = vmatpush1.bf16.msra.mxu1 %v10896_v19  ;;  %5053 = vmatprep.subr.bf16.mxu0 %v10897_v18  ;;  %v10920_v19 = vld [vmem:[#allocation205_spill] sm:$0xff]  ;;  %v10921_v18 = vld [vmem:[#allocation206_spill] sm:$0xff] }
 0x4b4   :  { %5135 = vmatprep.subr.bf16.mxu1 %v10898_v60  ;;  %v10922_v60 = vld [vmem:[#allocation207_spill] sm:$0xff] }
 0x4b6   :  { %5054 = vmatpush1.bf16.msra.mxu0 %v10899_v7  ;;  %v10923_v7 = vld [vmem:[#allocation208_spill] sm:$0xff] }
 0x4b7   :  { %5136 = vmatpush1.bf16.msra.mxu1 %v10900_v27  ;;  %5055 = vmatprep.subr.bf16.mxu0 %v10901_v31  ;;  %v10924_v27 = vld [vmem:[#allocation209_spill] sm:$0xff]  ;;  %v10925_v31 = vld [vmem:[#allocation210_spill] sm:$0xff] }
 0x4b8   :  { %5137 = vmatprep.subr.bf16.mxu1 %v10902_v32  ;;  %v10926_v32 = vld [vmem:[#allocation211_spill] sm:$0xff] }
 0x4ba   :  { %5056 = vmatpush1.bf16.msra.mxu0 %v10903_v33  ;;  %v10927_v33 = vld [vmem:[#allocation212_spill] sm:$0xff] }
 0x4bb   :  { %5138 = vmatpush1.bf16.msra.mxu1 %v10904_v34  ;;  %5066 = vmatprep.subr.bf16.mxu0 %v10905_v39  ;;  %v10928_v34 = vld [vmem:[#allocation213_spill] sm:$0xff]  ;;  %v10929_v39 = vld [vmem:[#allocation214_spill] sm:$0xff] }
 0x4bc   :  { %5148 = vmatprep.subr.bf16.mxu1 %v10906_v42  ;;  %v10930_v42 = vld [vmem:[#allocation215_spill] sm:$0xff] }
 0x4bd   :  { %5058 = vmatmul.mubr.bf16.vlgmr.msra.gmra.mrb[36].mxu0 %v9089_v35 }
 0x4be   :  { %5140 = vmatmul.mubr.bf16.vlgmr.msra.gmra.mrb[36].mxu1 %v9089_v35  ;;  %5067 = vmatpush1.bf16.msra.mxu0 %v10907_v51  ;;  %v10931_v51 = vld [vmem:[#allocation216_spill] sm:$0xff] }
 0x4bf   :  { %5098 = vmatprep.mubr.bf16.mxu0 %v9093_v13  ;;  %5149 = vmatpush1.bf16.msra.mxu1 %v10908_v36  ;;  %v10932_v36 = vld [vmem:[#allocation217_spill] sm:$0xff] }
 0x4c0   :  { %5180 = vmatprep.mubr.bf16.mxu1 %v9093_v13  ;;  %5068 = vmatprep.subr.bf16.mxu0 %v10909_v59  ;;  %v10933_v59 = vld [vmem:[#allocation218_spill] sm:$0xff] }
 0x4c1   :  { %5150 = vmatprep.subr.bf16.mxu1 %v10910_v38  ;;  %v10934_v38 = vld [vmem:[#allocation219_spill] sm:$0xff] }
 0x4c2   :  { %5069 = vmatpush1.bf16.msra.mxu0 %v10911_v23  ;;  %v10935_v23 = vld [vmem:[#allocation220_spill] sm:$0xff] }
 0x4c3   :  { %5151 = vmatpush1.bf16.msra.mxu1 %v10912_v53  ;;  %5070 = vmatprep.subr.bf16.mxu0 %v10913_v6  ;;  %v10936_v53 = vld [vmem:[#allocation221_spill] sm:$0xff]  ;;  %v10937_v6 = vld [vmem:[#allocation222_spill] sm:$0xff] }
 0x4c4   :  { %5152 = vmatprep.subr.bf16.mxu1 %v10914_v9  ;;  %v10938_v9 = vld [vmem:[#allocation223_spill] sm:$0xff] }
 0x4c6   :  { %5071 = vmatpush1.bf16.msra.mxu0 %v10915_v20  ;;  %v10939_v20 = vld [vmem:[#allocation224_spill] sm:$0xff] }
 0x4c7   :  { %5153 = vmatpush1.bf16.msra.mxu1 %v10916_v10  ;;  %5072 = vmatprep.subr.bf16.mxu0 %v10917_v14  ;;  %v10940_v10 = vld [vmem:[#allocation225_spill] sm:$0xff]  ;;  %v10941_v14 = vld [vmem:[#allocation226_spill] sm:$0xff] }
 0x4c8   :  { %5154 = vmatprep.subr.bf16.mxu1 %v10918_v16  ;;  %v10942_v16 = vld [vmem:[#allocation227_spill] sm:$0xff] }
 0x4ca   :  { %5073 = vmatpush1.bf16.msra.mxu0 %v10919_v17  ;;  %v10943_v17 = vld [vmem:[#allocation228_spill] sm:$0xff] }
 0x4cb   :  { %5155 = vmatpush1.bf16.msra.mxu1 %v10920_v19  ;;  %5074 = vmatprep.subr.bf16.mxu0 %v10921_v18  ;;  %v10944_v19 = vld [vmem:[#allocation229_spill] sm:$0xff]  ;;  %v10945_v18 = vld [vmem:[#allocation230_spill] sm:$0xff] }
 0x4cc   :  { %5156 = vmatprep.subr.bf16.mxu1 %v10922_v60  ;;  %v10946_v60 = vld [vmem:[#allocation231_spill] sm:$0xff] }
 0x4ce   :  { %5075 = vmatpush1.bf16.msra.mxu0 %v10923_v7  ;;  %v10947_v7 = vld [vmem:[#allocation232_spill] sm:$0xff] }
 0x4cf   :  { %5157 = vmatpush1.bf16.msra.mxu1 %v10924_v27  ;;  %5076 = vmatprep.subr.bf16.mxu0 %v10925_v31  ;;  %v10948_v27 = vld [vmem:[#allocation233_spill] sm:$0xff]  ;;  %v10949_v31 = vld [vmem:[#allocation234_spill] sm:$0xff] }
 0x4d0   :  { %5158 = vmatprep.subr.bf16.mxu1 %v10926_v32  ;;  %v10950_v32 = vld [vmem:[#allocation235_spill] sm:$0xff] }
 0x4d2   :  { %5077 = vmatpush1.bf16.msra.mxu0 %v10927_v33  ;;  %v10951_v33 = vld [vmem:[#allocation236_spill] sm:$0xff] }
 0x4d3   :  { %5159 = vmatpush1.bf16.msra.mxu1 %v10928_v34  ;;  %5078 = vmatprep.subr.bf16.mxu0 %v10929_v39  ;;  %v10952_v34 = vld [vmem:[#allocation237_spill] sm:$0xff]  ;;  %v10953_v39 = vld [vmem:[#allocation238_spill] sm:$0xff] }
 0x4d4   :  { %5160 = vmatprep.subr.bf16.mxu1 %v10930_v42  ;;  %v10954_v42 = vld [vmem:[#allocation239_spill] sm:$0xff] }
 0x4d6   :  { %5079 = vmatpush1.bf16.msra.mxu0 %v10931_v51  ;;  %v10955_v51 = vld [vmem:[#allocation240_spill] sm:$0xff] }
 0x4d7   :  { %5161 = vmatpush1.bf16.msra.mxu1 %v10932_v36  ;;  %5080 = vmatprep.subr.bf16.mxu0 %v10933_v59  ;;  %v10956_v36 = vld [vmem:[#allocation241_spill] sm:$0xff]  ;;  %v10957_v59 = vld [vmem:[#allocation242_spill] sm:$0xff] }
 0x4d8   :  { %5162 = vmatprep.subr.bf16.mxu1 %v10934_v38  ;;  %v10958_v38 = vld [vmem:[#allocation243_spill] sm:$0xff] }
 0x4da   :  { %5081 = vmatpush1.bf16.msra.mxu0 %v10935_v23  ;;  %v10959_v23 = vld [vmem:[#allocation244_spill] sm:$0xff] }
 0x4db   :  { %5163 = vmatpush1.bf16.msra.mxu1 %v10936_v53  ;;  %5082 = vmatprep.subr.bf16.mxu0 %v10937_v6  ;;  %v10960_v53 = vld [vmem:[#allocation245_spill] sm:$0xff]  ;;  %v10961_v6 = vld [vmem:[#allocation246_spill] sm:$0xff] }
 0x4dc   :  { %5164 = vmatprep.subr.bf16.mxu1 %v10938_v9  ;;  %v10962_v9 = vld [vmem:[#allocation247_spill] sm:$0xff] }
 0x4de   :  { %5083 = vmatpush1.bf16.msra.mxu0 %v10939_v20  ;;  %v10963_v20 = vld [vmem:[#allocation248_spill] sm:$0xff] }
 0x4df   :  { %5165 = vmatpush1.bf16.msra.mxu1 %v10940_v10  ;;  %5084 = vmatprep.subr.bf16.mxu0 %v10941_v14  ;;  %v10964_v10 = vld [vmem:[#allocation249_spill] sm:$0xff]  ;;  %v10965_v14 = vld [vmem:[#allocation250_spill] sm:$0xff] }
 0x4e0   :  { %5166 = vmatprep.subr.bf16.mxu1 %v10942_v16  ;;  %v10966_v16 = vld [vmem:[#allocation251_spill] sm:$0xff] }
 0x4e2   :  { %5085 = vmatpush1.bf16.msra.mxu0 %v10943_v17  ;;  %v10967_v17 = vld [vmem:[#allocation252_spill] sm:$0xff] }
 0x4e3   :  { %5167 = vmatpush1.bf16.msra.mxu1 %v10944_v19  ;;  %5086 = vmatprep.subr.bf16.mxu0 %v10945_v18  ;;  %v10968_v19 = vld [vmem:[#allocation253_spill] sm:$0xff]  ;;  %v10969_v18 = vld [vmem:[#allocation254_spill] sm:$0xff] }
 0x4e4   :  { %5168 = vmatprep.subr.bf16.mxu1 %v10946_v60  ;;  %v10970_v60 = vld [vmem:[#allocation255_spill] sm:$0xff] }
 0x4e6   :  { %5087 = vmatpush1.bf16.msra.mxu0 %v10947_v7  ;;  %v10971_v7 = vld [vmem:[#allocation256_spill] sm:$0xff] }
 0x4e7   :  { %5169 = vmatpush1.bf16.msra.mxu1 %v10948_v27  ;;  %5088 = vmatprep.subr.bf16.mxu0 %v10949_v31  ;;  %v10972_v27 = vld [vmem:[#allocation257_spill] sm:$0xff]  ;;  %v10973_v31 = vld [vmem:[#allocation258_spill] sm:$0xff] }
 0x4e8   :  { %5170 = vmatprep.subr.bf16.mxu1 %v10950_v32  ;;  %v10974_v32 = vld [vmem:[#allocation259_spill] sm:$0xff] }
 0x4ea   :  { %5089 = vmatpush1.bf16.msra.mxu0 %v10951_v33  ;;  %v10975_v33 = vld [vmem:[#allocation260_spill] sm:$0xff] }
 0x4eb   :  { %5171 = vmatpush1.bf16.msra.mxu1 %v10952_v34  ;;  %5090 = vmatprep.subr.bf16.mxu0 %v10953_v39  ;;  %v10976_v34 = vld [vmem:[#allocation261_spill] sm:$0xff]  ;;  %v10977_v39 = vld [vmem:[#allocation262_spill] sm:$0xff] }
 0x4ec   :  { %5172 = vmatprep.subr.bf16.mxu1 %v10954_v42  ;;  %v10978_v42 = vld [vmem:[#allocation263_spill] sm:$0xff] }
 0x4ee   :  { %5091 = vmatpush1.bf16.msra.mxu0 %v10955_v51  ;;  %v10979_v51 = vld [vmem:[#allocation264_spill] sm:$0xff] }
 0x4ef   :  { %5173 = vmatpush1.bf16.msra.mxu1 %v10956_v36  ;;  %5092 = vmatprep.subr.bf16.mxu0 %v10957_v59  ;;  %v10980_v36 = vld [vmem:[#allocation265_spill] sm:$0xff]  ;;  %v10981_v59 = vld [vmem:[#allocation266_spill] sm:$0xff] }
 0x4f0   :  { %5174 = vmatprep.subr.bf16.mxu1 %v10958_v38  ;;  %v10982_v38 = vld [vmem:[#allocation267_spill] sm:$0xff] }
 0x4f2   :  { %5093 = vmatpush1.bf16.msra.mxu0 %v10959_v23  ;;  %v10983_v23 = vld [vmem:[#allocation268_spill] sm:$0xff] }
 0x4f3   :  { %5175 = vmatpush1.bf16.msra.mxu1 %v10960_v53  ;;  %5094 = vmatprep.subr.bf16.mxu0 %v10961_v6  ;;  %v10984_v53 = vld [vmem:[#allocation269_spill] sm:$0xff]  ;;  %v10985_v6 = vld [vmem:[#allocation270_spill] sm:$0xff] }
 0x4f4   :  { %5176 = vmatprep.subr.bf16.mxu1 %v10962_v9  ;;  %v10986_v9 = vld [vmem:[#allocation271_spill] sm:$0xff] }
 0x4f6   :  { %5095 = vmatpush1.bf16.msra.mxu0 %v10963_v20  ;;  %v10987_v20 = vld [vmem:[#allocation272_spill] sm:$0xff] }
 0x4f7   :  { %5177 = vmatpush1.bf16.msra.mxu1 %v10964_v10  ;;  %5096 = vmatprep.subr.bf16.mxu0 %v10965_v14  ;;  %v10988_v10 = vld [vmem:[#allocation273_spill] sm:$0xff]  ;;  %v10989_v14 = vld [vmem:[#allocation274_spill] sm:$0xff] }
 0x4f8   :  { %5178 = vmatprep.subr.bf16.mxu1 %v10966_v16  ;;  %v10990_v16 = vld [vmem:[#allocation275_spill] sm:$0xff] }
 0x4fa   :  { %5097 = vmatpush1.bf16.msra.mxu0 %v10967_v17  ;;  %v10991_v17 = vld [vmem:[#allocation276_spill] sm:$0xff] }
 0x4fb   :  { %5179 = vmatpush1.bf16.msra.mxu1 %v10968_v19  ;;  %5189 = vmatprep.subr.bf16.mxu0 %v10969_v18  ;;  %v10992_v19 = vld [vmem:[#allocation277_spill] sm:$0xff]  ;;  %v10993_v18 = vld [vmem:[#allocation278_spill] sm:$0xff] }
 0x4fc   :  { %5271 = vmatprep.subr.bf16.mxu1 %v10970_v60  ;;  %v10994_v60 = vld [vmem:[#allocation279_spill] sm:$0xff] }
 0x4fd   :  { %5099 = vmatmul.mubr.bf16.vlgmr.msra.gmra.mrb[36].mxu0 %v9163_v5 }
 0x4fe   :  { %5181 = vmatmul.mubr.bf16.vlgmr.msra.gmra.mrb[36].mxu1 %v9163_v5  ;;  %5190 = vmatpush1.bf16.msra.mxu0 %v10971_v7  ;;  %v10995_v7 = vld [vmem:[#allocation280_spill] sm:$0xff] }
 0x4ff   :  { %5221 = vmatprep.mubr.bf16.mxu0 %v9087_v22  ;;  %5272 = vmatpush1.bf16.msra.mxu1 %v10972_v27  ;;  %v10996_v27 = vld [vmem:[#allocation281_spill] sm:$0xff] }
 0x500   :  { %5303 = vmatprep.mubr.bf16.mxu1 %v9087_v22  ;;  %5191 = vmatprep.subr.bf16.mxu0 %v10973_v31  ;;  %v10997_v31 = vld [vmem:[#allocation282_spill] sm:$0xff] }
 0x501   :  { %5273 = vmatprep.subr.bf16.mxu1 %v10974_v32  ;;  %v10998_v32 = vld [vmem:[#allocation283_spill] sm:$0xff] }
 0x502   :  { %5192 = vmatpush1.bf16.msra.mxu0 %v10975_v33  ;;  %v10999_v33 = vld [vmem:[#allocation284_spill] sm:$0xff] }
 0x503   :  { %5274 = vmatpush1.bf16.msra.mxu1 %v10976_v34  ;;  %5193 = vmatprep.subr.bf16.mxu0 %v10977_v39  ;;  %v11000_v34 = vld [vmem:[#allocation285_spill] sm:$0xff]  ;;  %v11001_v39 = vld [vmem:[#allocation286_spill] sm:$0xff] }
 0x504   :  { %5275 = vmatprep.subr.bf16.mxu1 %v10978_v42  ;;  %v11002_v42 = vld [vmem:[#allocation287_spill] sm:$0xff] }
 0x506   :  { %5194 = vmatpush1.bf16.msra.mxu0 %v10979_v51  ;;  %v11003_v51 = vld [vmem:[#allocation288_spill] sm:$0xff] }
 0x507   :  { %5276 = vmatpush1.bf16.msra.mxu1 %v10980_v36  ;;  %5195 = vmatprep.subr.bf16.mxu0 %v10981_v59  ;;  %v11004_v36 = vld [vmem:[#allocation289_spill] sm:$0xff]  ;;  %v11005_v59 = vld [vmem:[#allocation290_spill] sm:$0xff] }
 0x508   :  { %5277 = vmatprep.subr.bf16.mxu1 %v10982_v38  ;;  %v11006_v38 = vld [vmem:[#allocation291_spill] sm:$0xff] }
 0x50a   :  { %5196 = vmatpush1.bf16.msra.mxu0 %v10983_v23  ;;  %v11007_v23 = vld [vmem:[#allocation292_spill] sm:$0xff] }
 0x50b   :  { %5278 = vmatpush1.bf16.msra.mxu1 %v10984_v53  ;;  %5197 = vmatprep.subr.bf16.mxu0 %v10985_v6  ;;  %v11008_v53 = vld [vmem:[#allocation293_spill] sm:$0xff]  ;;  %v11009_v6 = vld [vmem:[#allocation294_spill] sm:$0xff] }
 0x50c   :  { %5279 = vmatprep.subr.bf16.mxu1 %v10986_v9  ;;  %v11010_v9 = vld [vmem:[#allocation295_spill] sm:$0xff] }
 0x50e   :  { %5198 = vmatpush1.bf16.msra.mxu0 %v10987_v20  ;;  %v11011_v20 = vld [vmem:[#allocation296_spill] sm:$0xff] }
 0x50f   :  { %5280 = vmatpush1.bf16.msra.mxu1 %v10988_v10  ;;  %5199 = vmatprep.subr.bf16.mxu0 %v10989_v14  ;;  %v11012_v10 = vld [vmem:[#allocation297_spill] sm:$0xff]  ;;  %v11013_v14 = vld [vmem:[#allocation298_spill] sm:$0xff] }
 0x510   :  { %5281 = vmatprep.subr.bf16.mxu1 %v10990_v16  ;;  %v11014_v16 = vld [vmem:[#allocation299_spill] sm:$0xff] }
 0x512   :  { %5200 = vmatpush1.bf16.msra.mxu0 %v10991_v17  ;;  %v11015_v17 = vld [vmem:[#allocation300_spill] sm:$0xff] }
 0x513   :  { %5282 = vmatpush1.bf16.msra.mxu1 %v10992_v19  ;;  %5201 = vmatprep.subr.bf16.mxu0 %v10993_v18  ;;  %v11016_v19 = vld [vmem:[#allocation301_spill] sm:$0xff]  ;;  %v11017_v18 = vld [vmem:[#allocation302_spill] sm:$0xff] }
 0x514   :  { %5283 = vmatprep.subr.bf16.mxu1 %v10994_v60  ;;  %v11018_v60 = vld [vmem:[#allocation303_spill] sm:$0xff] }
 0x516   :  { %5202 = vmatpush1.bf16.msra.mxu0 %v10995_v7  ;;  %v11019_v7 = vld [vmem:[#allocation304_spill] sm:$0xff] }
 0x517   :  { %5284 = vmatpush1.bf16.msra.mxu1 %v10996_v27  ;;  %5203 = vmatprep.subr.bf16.mxu0 %v10997_v31  ;;  %v11020_v27 = vld [vmem:[#allocation305_spill] sm:$0xff]  ;;  %v11021_v31 = vld [vmem:[#allocation306_spill] sm:$0xff] }
 0x518   :  { %5285 = vmatprep.subr.bf16.mxu1 %v10998_v32  ;;  %v11022_v32 = vld [vmem:[#allocation307_spill] sm:$0xff] }
 0x51a   :  { %5204 = vmatpush1.bf16.msra.mxu0 %v10999_v33  ;;  %v11023_v33 = vld [vmem:[#allocation308_spill] sm:$0xff] }
 0x51b   :  { %5286 = vmatpush1.bf16.msra.mxu1 %v11000_v34  ;;  %5205 = vmatprep.subr.bf16.mxu0 %v11001_v39  ;;  %v11024_v34 = vld [vmem:[#allocation309_spill] sm:$0xff]  ;;  %v11025_v39 = vld [vmem:[#allocation310_spill] sm:$0xff] }
 0x51c   :  { %5287 = vmatprep.subr.bf16.mxu1 %v11002_v42  ;;  %v11026_v42 = vld [vmem:[#allocation311_spill] sm:$0xff] }
 0x51e   :  { %5206 = vmatpush1.bf16.msra.mxu0 %v11003_v51  ;;  %v11027_v51 = vld [vmem:[#allocation312_spill] sm:$0xff] }
 0x51f   :  { %5288 = vmatpush1.bf16.msra.mxu1 %v11004_v36  ;;  %5207 = vmatprep.subr.bf16.mxu0 %v11005_v59  ;;  %v11028_v36 = vld [vmem:[#allocation313_spill] sm:$0xff]  ;;  %v11029_v59 = vld [vmem:[#allocation314_spill] sm:$0xff] }
 0x520   :  { %5289 = vmatprep.subr.bf16.mxu1 %v11006_v38  ;;  %v11030_v38 = vld [vmem:[#allocation315_spill] sm:$0xff] }
 0x522   :  { %5208 = vmatpush1.bf16.msra.mxu0 %v11007_v23  ;;  %v11031_v23 = vld [vmem:[#allocation316_spill] sm:$0xff] }
 0x523   :  { %5290 = vmatpush1.bf16.msra.mxu1 %v11008_v53  ;;  %5209 = vmatprep.subr.bf16.mxu0 %v11009_v6  ;;  %v11032_v53 = vld [vmem:[#allocation317_spill] sm:$0xff]  ;;  %v11033_v6 = vld [vmem:[#allocation318_spill] sm:$0xff] }
 0x524   :  { %5291 = vmatprep.subr.bf16.mxu1 %v11010_v9  ;;  %v11034_v9 = vld [vmem:[#allocation319_spill] sm:$0xff] }
 0x526   :  { %5210 = vmatpush1.bf16.msra.mxu0 %v11011_v20  ;;  %v11035_v20 = vld [vmem:[#allocation320_spill] sm:$0xff] }
 0x527   :  { %5292 = vmatpush1.bf16.msra.mxu1 %v11012_v10  ;;  %5211 = vmatprep.subr.bf16.mxu0 %v11013_v14  ;;  %v11036_v10 = vld [vmem:[#allocation321_spill] sm:$0xff]  ;;  %v11037_v14 = vld [vmem:[#allocation322_spill] sm:$0xff] }
 0x528   :  { %5293 = vmatprep.subr.bf16.mxu1 %v11014_v16  ;;  %v11038_v16 = vld [vmem:[#allocation323_spill] sm:$0xff] }
 0x52a   :  { %5212 = vmatpush1.bf16.msra.mxu0 %v11015_v17  ;;  %v11039_v17 = vld [vmem:[#allocation324_spill] sm:$0xff] }
 0x52b   :  { %5294 = vmatpush1.bf16.msra.mxu1 %v11016_v19  ;;  %5213 = vmatprep.subr.bf16.mxu0 %v11017_v18  ;;  %v11040_v19 = vld [vmem:[#allocation325_spill] sm:$0xff]  ;;  %v11041_v18 = vld [vmem:[#allocation326_spill] sm:$0xff] }
 0x52c   :  { %5295 = vmatprep.subr.bf16.mxu1 %v11018_v60  ;;  %v11042_v60 = vld [vmem:[#allocation327_spill] sm:$0xff] }
 0x52e   :  { %5214 = vmatpush1.bf16.msra.mxu0 %v11019_v7  ;;  %v11043_v7 = vld [vmem:[#allocation328_spill] sm:$0xff] }
 0x52f   :  { %5296 = vmatpush1.bf16.msra.mxu1 %v11020_v27  ;;  %5215 = vmatprep.subr.bf16.mxu0 %v11021_v31  ;;  %v11044_v27 = vld [vmem:[#allocation329_spill] sm:$0xff]  ;;  %v11045_v31 = vld [vmem:[#allocation330_spill] sm:$0xff] }
 0x530   :  { %5297 = vmatprep.subr.bf16.mxu1 %v11022_v32  ;;  %v11046_v32 = vld [vmem:[#allocation331_spill] sm:$0xff] }
 0x532   :  { %5216 = vmatpush1.bf16.msra.mxu0 %v11023_v33  ;;  %v11047_v33 = vld [vmem:[#allocation332_spill] sm:$0xff] }
 0x533   :  { %5298 = vmatpush1.bf16.msra.mxu1 %v11024_v34  ;;  %5217 = vmatprep.subr.bf16.mxu0 %v11025_v39  ;;  %v11048_v34 = vld [vmem:[#allocation333_spill] sm:$0xff]  ;;  %v11049_v39 = vld [vmem:[#allocation334_spill] sm:$0xff] }
 0x534   :  { %5299 = vmatprep.subr.bf16.mxu1 %v11026_v42  ;;  %v11050_v42 = vld [vmem:[#allocation335_spill] sm:$0xff] }
 0x536   :  { %5218 = vmatpush1.bf16.msra.mxu0 %v11027_v51  ;;  %v11051_v51 = vld [vmem:[#allocation336_spill] sm:$0xff] }
 0x537   :  { %5300 = vmatpush1.bf16.msra.mxu1 %v11028_v36  ;;  %5219 = vmatprep.subr.bf16.mxu0 %v11029_v59  ;;  %v11052_v36 = vld [vmem:[#allocation337_spill] sm:$0xff]  ;;  %v11053_v59 = vld [vmem:[#allocation338_spill] sm:$0xff] }
 0x538   :  { %5301 = vmatprep.subr.bf16.mxu1 %v11030_v38 }
 0x53a   :  { %5220 = vmatpush1.bf16.msra.mxu0 %v11031_v23 }
 0x53b   :  { %5302 = vmatpush1.bf16.msra.mxu1 %v11032_v53  ;;  %5230 = vmatprep.subr.bf16.mxu0 %v11033_v6  ;;  %v11054_v53 = vld [vmem:[#allocation339_spill] sm:$0xff] }
 0x53c   :  { %5312 = vmatprep.subr.bf16.mxu1 %v11034_v9 }
 0x53d   :  { %5222 = vmatmul.mubr.bf16.vlgmr.msra.gmra.mrb[40].mxu0 %v9089_v35 }
 0x53e   :  { %5304 = vmatmul.mubr.bf16.vlgmr.msra.gmra.mrb[40].mxu1 %v9089_v35  ;;  %5231 = vmatpush1.bf16.msra.mxu0 %v11035_v20 }
 0x53f   :  { %5262 = vmatprep.mubr.bf16.mxu0 %v9093_v13  ;;  %5313 = vmatpush1.bf16.msra.mxu1 %v11036_v10 }
 0x540   :  { %5344 = vmatprep.mubr.bf16.mxu1 %v9093_v13  ;;  %5232 = vmatprep.subr.bf16.mxu0 %v11037_v14  ;;  %v11055_v14 = vld [vmem:[#allocation340_spill] sm:$0xff] }
 0x541   :  { %5314 = vmatprep.subr.bf16.mxu1 %v11038_v16  ;;  %v11056_v16 = vld [vmem:[#allocation341_spill] sm:$0xff] }
 0x542   :  { %5233 = vmatpush1.bf16.msra.mxu0 %v11039_v17 }
 0x543   :  { %5315 = vmatpush1.bf16.msra.mxu1 %v11040_v19  ;;  %5234 = vmatprep.subr.bf16.mxu0 %v11041_v18  ;;  %v11057_v18 = vld [vmem:[#allocation342_spill] sm:$0xff] }
 0x544   :  { %5316 = vmatprep.subr.bf16.mxu1 %v11042_v60  ;;  %v11058_v60 = vld [vmem:[#allocation345_spill] sm:$0xff] }
 0x546   :  { %5235 = vmatpush1.bf16.msra.mxu0 %v11043_v7  ;;  %v11059_v7 = vld [vmem:[#allocation348_spill] sm:$0xff] }
 0x547   :  { %5317 = vmatpush1.bf16.msra.mxu1 %v11044_v27  ;;  %5236 = vmatprep.subr.bf16.mxu0 %v11045_v31  ;;  %v11060_v27 = vld [vmem:[#allocation349_spill] sm:$0xff]  ;;  %v11061_v31 = vld [vmem:[#allocation350_spill] sm:$0xff] }
 0x548   :  { %5318 = vmatprep.subr.bf16.mxu1 %v11046_v32  ;;  %v11062_v32 = vld [vmem:[#allocation351_spill] sm:$0xff] }
 0x54a   :  { %5237 = vmatpush1.bf16.msra.mxu0 %v11047_v33  ;;  %v11063_v33 = vld [vmem:[#allocation352_spill] sm:$0xff] }
 0x54b   :  { %5319 = vmatpush1.bf16.msra.mxu1 %v11048_v34  ;;  %5238 = vmatprep.subr.bf16.mxu0 %v11049_v39  ;;  %v11064_v34 = vld [vmem:[#allocation353_spill] sm:$0xff]  ;;  %v11065_v39 = vld [vmem:[#allocation354_spill] sm:$0xff] }
 0x54c   :  { %5320 = vmatprep.subr.bf16.mxu1 %v11050_v42  ;;  %v11066_v42 = vld [vmem:[#allocation355_spill] sm:$0xff] }
 0x54e   :  { %5239 = vmatpush1.bf16.msra.mxu0 %v11051_v51  ;;  %v11067_v51 = vld [vmem:[#allocation356_spill] sm:$0xff] }
 0x54f   :  { %5321 = vmatpush1.bf16.msra.mxu1 %v11052_v36  ;;  %5240 = vmatprep.subr.bf16.mxu0 %v11053_v59  ;;  %v11068_v36 = vld [vmem:[#allocation357_spill] sm:$0xff]  ;;  %v11069_v59 = vld [vmem:[#allocation358_spill] sm:$0xff] }
 0x550   :  { %v9394_v38 = vpop.f32.mrb[32].mxu0  ;;  %v9396_v23 = vpop.f32.mrb[32].mxu1  ;;  %5322 = vmatprep.subr.bf16.mxu1 %v11054_v53  ;;  %v11070_v53 = vld [vmem:[#allocation359_spill] sm:$0xff] }
 0x551   :  { %v9399_v6 = vpop.f32.mrb[33].mxu0  ;;  %v9401_v9 = vpop.f32.mrb[33].mxu1 }
 0x552   :  { %v4940_v20 = vpop.f32.mrb[34].mxu0  ;;  %v5022_v10 = vpop.f32.mrb[34].mxu1  ;;  %5241 = vmatpush1.bf16.msra.mxu0 %v11055_v14  ;;  %v11073_v14 = vld [vmem:[#allocation362_spill] sm:$0xff] }
 0x553   :  { %5323 = vmatpush1.bf16.msra.mxu1 %v11056_v16  ;;  %v4941_v17 = vpop.f32.mrb[35].mxu0  ;;  %v5023_v19 = vpop.f32.mrb[35].mxu1  ;;  %5242 = vmatprep.subr.bf16.mxu0 %v11057_v18  ;;  %v11071_v20 = vld [vmem:[#allocation360_spill] sm:$0xff]  ;;  %v11072_v10 = vld [vmem:[#allocation361_spill] sm:$0xff]  ;;  %v11074_v16 = vld [vmem:[#allocation363_spill] sm:$0xff] }
 0x554   :  { %5324 = vmatprep.subr.bf16.mxu1 %v11058_v60  ;;  %v11075_v17 = vld [vmem:[#allocation364_spill] sm:$0xff]  ;;  %v11076_v19 = vld [vmem:[#allocation365_spill] sm:$0xff]  ;;  %v11077_v18 = vld [vmem:[#allocation366_spill] sm:$0xff] }
 0x555   :  { %v11078_v60 = vld [vmem:[#allocation367_spill] sm:$0xff] }
 0x556   :  { %5243 = vmatpush1.bf16.msra.mxu0 %v11059_v7  ;;  %v11079_v7 = vld [vmem:[#allocation368_spill] sm:$0xff] }
 0x557   :  { %5325 = vmatpush1.bf16.msra.mxu1 %v11060_v27  ;;  %5244 = vmatprep.subr.bf16.mxu0 %v11061_v31  ;;  %v11080_v27 = vld [vmem:[#allocation369_spill] sm:$0xff]  ;;  %v11081_v31 = vld [vmem:[#allocation370_spill] sm:$0xff] }
 0x558   :  { %5326 = vmatprep.subr.bf16.mxu1 %v11062_v32  ;;  %v11082_v32 = vld [vmem:[#allocation371_spill] sm:$0xff] }
 0x55a   :  { %5245 = vmatpush1.bf16.msra.mxu0 %v11063_v33  ;;  %v11083_v33 = vld [vmem:[#allocation372_spill] sm:$0xff] }
 0x55b   :  { %5327 = vmatpush1.bf16.msra.mxu1 %v11064_v34  ;;  %5246 = vmatprep.subr.bf16.mxu0 %v11065_v39  ;;  %v11084_v34 = vld [vmem:[#allocation373_spill] sm:$0xff]  ;;  %v11085_v39 = vld [vmem:[#allocation374_spill] sm:$0xff] }
 0x55c   :  { %5328 = vmatprep.subr.bf16.mxu1 %v11066_v42  ;;  %v11086_v42 = vld [vmem:[#allocation375_spill] sm:$0xff] }
 0x55e   :  { %5247 = vmatpush1.bf16.msra.mxu0 %v11067_v51  ;;  %v11087_v51 = vld [vmem:[#allocation376_spill] sm:$0xff] }
 0x55f   :  { %5329 = vmatpush1.bf16.msra.mxu1 %v11068_v36  ;;  %5248 = vmatprep.subr.bf16.mxu0 %v11069_v59  ;;  %v11088_v36 = vld [vmem:[#allocation377_spill] sm:$0xff]  ;;  %v11089_v59 = vld [vmem:[#allocation378_spill] sm:$0xff] }
 0x560   :  { %5330 = vmatprep.subr.bf16.mxu1 %v11070_v53  ;;  %v11090_v53 = vld [vmem:[#allocation379_spill] sm:$0xff] }
 0x562   :  { %5249 = vmatpush1.bf16.msra.mxu0 %v11071_v20  ;;  %v11091_v20 = vld [vmem:[#allocation380_spill] sm:$0xff] }
 0x563   :  { %5331 = vmatpush1.bf16.msra.mxu1 %v11072_v10  ;;  %5250 = vmatprep.subr.bf16.mxu0 %v11073_v14  ;;  %v11092_v10 = vld [vmem:[#allocation381_spill] sm:$0xff]  ;;  %v11093_v14 = vld [vmem:[#allocation382_spill] sm:$0xff] }
 0x564   :  { %5332 = vmatprep.subr.bf16.mxu1 %v11074_v16  ;;  %v11094_v16 = vld [vmem:[#allocation383_spill] sm:$0xff] }
 0x566   :  { %5251 = vmatpush1.bf16.msra.mxu0 %v11075_v17  ;;  %v11095_v17 = vld [vmem:[#allocation384_spill] sm:$0xff] }
 0x567   :  { %5333 = vmatpush1.bf16.msra.mxu1 %v11076_v19  ;;  %5252 = vmatprep.subr.bf16.mxu0 %v11077_v18  ;;  %v11096_v19 = vld [vmem:[#allocation385_spill] sm:$0xff]  ;;  %v11097_v18 = vld [vmem:[#allocation386_spill] sm:$0xff] }
 0x568   :  { %5334 = vmatprep.subr.bf16.mxu1 %v11078_v60  ;;  %v11098_v60 = vld [vmem:[#allocation387_spill] sm:$0xff] }
 0x56a   :  { %5253 = vmatpush1.bf16.msra.mxu0 %v11079_v7  ;;  %v11099_v7 = vld [vmem:[#allocation388_spill] sm:$0xff] }
 0x56b   :  { %5335 = vmatpush1.bf16.msra.mxu1 %v11080_v27  ;;  %5254 = vmatprep.subr.bf16.mxu0 %v11081_v31  ;;  %v11100_v27 = vld [vmem:[#allocation389_spill] sm:$0xff]  ;;  %v11101_v31 = vld [vmem:[#allocation390_spill] sm:$0xff] }
 0x56c   :  { %5336 = vmatprep.subr.bf16.mxu1 %v11082_v32  ;;  %v11102_v32 = vld [vmem:[#allocation391_spill] sm:$0xff] }
 0x56e   :  { %5255 = vmatpush1.bf16.msra.mxu0 %v11083_v33  ;;  %v11103_v33 = vld [vmem:[#allocation392_spill] sm:$0xff] }
 0x56f   :  { %5337 = vmatpush1.bf16.msra.mxu1 %v11084_v34  ;;  %5256 = vmatprep.subr.bf16.mxu0 %v11085_v39  ;;  %v11104_v34 = vld [vmem:[#allocation393_spill] sm:$0xff]  ;;  %v11105_v39 = vld [vmem:[#allocation394_spill] sm:$0xff] }
 0x570   :  { %5338 = vmatprep.subr.bf16.mxu1 %v11086_v42  ;;  %v11106_v42 = vld [vmem:[#allocation395_spill] sm:$0xff] }
 0x572   :  { %5257 = vmatpush1.bf16.msra.mxu0 %v11087_v51  ;;  %v11107_v51 = vld [vmem:[#allocation396_spill] sm:$0xff] }
 0x573   :  { %5339 = vmatpush1.bf16.msra.mxu1 %v11088_v36  ;;  %5258 = vmatprep.subr.bf16.mxu0 %v11089_v59  ;;  %v11108_v36 = vld [vmem:[#allocation397_spill] sm:$0xff]  ;;  %v11109_v59 = vld [vmem:[#allocation398_spill] sm:$0xff] }
 0x574   :  { %5340 = vmatprep.subr.bf16.mxu1 %v11090_v53  ;;  %v11110_v53 = vld [vmem:[#allocation399_spill] sm:$0xff] }
 0x576   :  { %5259 = vmatpush1.bf16.msra.mxu0 %v11091_v20  ;;  %v11112_v20 = vld [vmem:[#allocation401_spill] sm:$0xff] }
 0x577   :  { %5341 = vmatpush1.bf16.msra.mxu1 %v11092_v10  ;;  %5260 = vmatprep.subr.bf16.mxu0 %v11093_v14  ;;  %v11113_v10 = vld [vmem:[#allocation402_spill] sm:$0xff]  ;;  %v11114_v14 = vld [vmem:[#allocation403_spill] sm:$0xff] }
 0x578   :  { %5342 = vmatprep.subr.bf16.mxu1 %v11094_v16  ;;  %v11115_v16 = vld [vmem:[#allocation404_spill] sm:$0xff] }
 0x57a   :  { %5261 = vmatpush1.bf16.msra.mxu0 %v11095_v17  ;;  %v11116_v17 = vld [vmem:[#allocation405_spill] sm:$0xff] }
 0x57b   :  { %5343 = vmatpush1.bf16.msra.mxu1 %v11096_v19  ;;  %5353 = vmatprep.subr.bf16.mxu0 %v11097_v18  ;;  %v11117_v19 = vld [vmem:[#allocation406_spill] sm:$0xff]  ;;  %v11118_v18 = vld [vmem:[#allocation407_spill] sm:$0xff] }
 0x57c   :  { %5435 = vmatprep.subr.bf16.mxu1 %v11098_v60  ;;  %v11119_v60 = vld [vmem:[#allocation408_spill] sm:$0xff] }
 0x57d   :  { %5263 = vmatmul.mubr.bf16.vlgmr.msra.gmra.mrb[40].mxu0 %v9163_v5 }
 0x57e   :  { %5345 = vmatmul.mubr.bf16.vlgmr.msra.gmra.mrb[40].mxu1 %v9163_v5  ;;  %5354 = vmatpush1.bf16.msra.mxu0 %v11099_v7  ;;  %v11120_v7 = vld [vmem:[#allocation409_spill] sm:$0xff] }
 0x57f   :  { %5385 = vmatprep.mubr.bf16.mxu0 %v9087_v22  ;;  %5436 = vmatpush1.bf16.msra.mxu1 %v11100_v27  ;;  %v11121_v27 = vld [vmem:[#allocation410_spill] sm:$0xff] }
 0x580   :  { %5467 = vmatprep.mubr.bf16.mxu1 %v9087_v22  ;;  %5355 = vmatprep.subr.bf16.mxu0 %v11101_v31  ;;  %v11111_v22 = vld [vmem:[#allocation400_spill] sm:$0xff]  ;;  %v11122_v31 = vld [vmem:[#allocation411_spill] sm:$0xff] }
 0x581   :  { %5437 = vmatprep.subr.bf16.mxu1 %v11102_v32  ;;  %v11123_v32 = vld [vmem:[#allocation412_spill] sm:$0xff] }
 0x582   :  { %5356 = vmatpush1.bf16.msra.mxu0 %v11103_v33  ;;  %v11124_v33 = vld [vmem:[#allocation413_spill] sm:$0xff] }
 0x583   :  { %5438 = vmatpush1.bf16.msra.mxu1 %v11104_v34  ;;  %5357 = vmatprep.subr.bf16.mxu0 %v11105_v39  ;;  %v11125_v34 = vld [vmem:[#allocation414_spill] sm:$0xff]  ;;  %v11126_v39 = vld [vmem:[#allocation415_spill] sm:$0xff] }
 0x584   :  { %5439 = vmatprep.subr.bf16.mxu1 %v11106_v42  ;;  %v11127_v42 = vld [vmem:[#allocation416_spill] sm:$0xff] }
 0x586   :  { %5358 = vmatpush1.bf16.msra.mxu0 %v11107_v51  ;;  %v11128_v51 = vld [vmem:[#allocation417_spill] sm:$0xff] }
 0x587   :  { %5440 = vmatpush1.bf16.msra.mxu1 %v11108_v36  ;;  %5359 = vmatprep.subr.bf16.mxu0 %v11109_v59  ;;  %v11129_v36 = vld [vmem:[#allocation418_spill] sm:$0xff]  ;;  %v11130_v59 = vld [vmem:[#allocation419_spill] sm:$0xff] }
 0x588   :  { %5441 = vmatprep.subr.bf16.mxu1 %v11110_v53  ;;  %v11131_v53 = vld [vmem:[#allocation420_spill] sm:$0xff] }
 0x58a   :  { %5360 = vmatpush1.bf16.msra.mxu0 %v11111_v22  ;;  %v11132_v22 = vld [vmem:[#allocation421_spill] sm:$0xff] }
 0x58b   :  { %5442 = vmatpush1.bf16.msra.mxu1 %v11112_v20  ;;  %5361 = vmatprep.subr.bf16.mxu0 %v11113_v10  ;;  %v11133_v20 = vld [vmem:[#allocation422_spill] sm:$0xff]  ;;  %v11134_v10 = vld [vmem:[#allocation423_spill] sm:$0xff] }
 0x58c   :  { %5443 = vmatprep.subr.bf16.mxu1 %v11114_v14  ;;  %v11135_v14 = vld [vmem:[#allocation424_spill] sm:$0xff] }
 0x58e   :  { %5362 = vmatpush1.bf16.msra.mxu0 %v11115_v16  ;;  %v11136_v16 = vld [vmem:[#allocation425_spill] sm:$0xff] }
 0x58f   :  { %5444 = vmatpush1.bf16.msra.mxu1 %v11116_v17  ;;  %5363 = vmatprep.subr.bf16.mxu0 %v11117_v19  ;;  %v11137_v17 = vld [vmem:[#allocation426_spill] sm:$0xff]  ;;  %v11138_v19 = vld [vmem:[#allocation427_spill] sm:$0xff] }
 0x590   :  { %5445 = vmatprep.subr.bf16.mxu1 %v11118_v18  ;;  %v11139_v18 = vld [vmem:[#allocation428_spill] sm:$0xff] }
 0x592   :  { %5364 = vmatpush1.bf16.msra.mxu0 %v11119_v60  ;;  %v11140_v60 = vld [vmem:[#allocation429_spill] sm:$0xff] }
 0x593   :  { %5446 = vmatpush1.bf16.msra.mxu1 %v11120_v7  ;;  %5365 = vmatprep.subr.bf16.mxu0 %v11121_v27  ;;  %v11141_v7 = vld [vmem:[#allocation430_spill] sm:$0xff]  ;;  %v11142_v27 = vld [vmem:[#allocation431_spill] sm:$0xff] }
 0x594   :  { %5447 = vmatprep.subr.bf16.mxu1 %v11122_v31  ;;  %v11143_v31 = vld [vmem:[#allocation432_spill] sm:$0xff] }
 0x596   :  { %5366 = vmatpush1.bf16.msra.mxu0 %v11123_v32  ;;  %v11144_v32 = vld [vmem:[#allocation433_spill] sm:$0xff] }
 0x597   :  { %5448 = vmatpush1.bf16.msra.mxu1 %v11124_v33  ;;  %5367 = vmatprep.subr.bf16.mxu0 %v11125_v34  ;;  %v11145_v33 = vld [vmem:[#allocation434_spill] sm:$0xff]  ;;  %v11146_v34 = vld [vmem:[#allocation435_spill] sm:$0xff] }
 0x598   :  { %5449 = vmatprep.subr.bf16.mxu1 %v11126_v39  ;;  %v11147_v39 = vld [vmem:[#allocation436_spill] sm:$0xff] }
 0x59a   :  { %5368 = vmatpush1.bf16.msra.mxu0 %v11127_v42  ;;  %v11148_v42 = vld [vmem:[#allocation437_spill] sm:$0xff] }
 0x59b   :  { %5450 = vmatpush1.bf16.msra.mxu1 %v11128_v51  ;;  %5369 = vmatprep.subr.bf16.mxu0 %v11129_v36  ;;  %v11149_v51 = vld [vmem:[#allocation438_spill] sm:$0xff]  ;;  %v11150_v36 = vld [vmem:[#allocation439_spill] sm:$0xff] }
 0x59c   :  { %5451 = vmatprep.subr.bf16.mxu1 %v11130_v59  ;;  %v11151_v59 = vld [vmem:[#allocation440_spill] sm:$0xff] }
 0x59e   :  { %5370 = vmatpush1.bf16.msra.mxu0 %v11131_v53  ;;  %v11152_v53 = vld [vmem:[#allocation441_spill] sm:$0xff] }
 0x59f   :  { %5452 = vmatpush1.bf16.msra.mxu1 %v11132_v22  ;;  %5371 = vmatprep.subr.bf16.mxu0 %v11133_v20  ;;  %v11153_v22 = vld [vmem:[#allocation442_spill] sm:$0xff]  ;;  %v11154_v20 = vld [vmem:[#allocation443_spill] sm:$0xff] }
 0x5a0   :  { %5453 = vmatprep.subr.bf16.mxu1 %v11134_v10  ;;  %v11155_v10 = vld [vmem:[#allocation444_spill] sm:$0xff] }
 0x5a2   :  { %5372 = vmatpush1.bf16.msra.mxu0 %v11135_v14  ;;  %v11156_v14 = vld [vmem:[#allocation445_spill] sm:$0xff] }
 0x5a3   :  { %5454 = vmatpush1.bf16.msra.mxu1 %v11136_v16  ;;  %5373 = vmatprep.subr.bf16.mxu0 %v11137_v17  ;;  %v11157_v16 = vld [vmem:[#allocation446_spill] sm:$0xff]  ;;  %v11158_v17 = vld [vmem:[#allocation447_spill] sm:$0xff] }
 0x5a4   :  { %5455 = vmatprep.subr.bf16.mxu1 %v11138_v19  ;;  %v11159_v19 = vld [vmem:[#allocation448_spill] sm:$0xff] }
 0x5a6   :  { %5374 = vmatpush1.bf16.msra.mxu0 %v11139_v18  ;;  %v11160_v18 = vld [vmem:[#allocation449_spill] sm:$0xff] }
 0x5a7   :  { %5456 = vmatpush1.bf16.msra.mxu1 %v11140_v60  ;;  %5375 = vmatprep.subr.bf16.mxu0 %v11141_v7  ;;  %v11161_v60 = vld [vmem:[#allocation450_spill] sm:$0xff]  ;;  %v11162_v7 = vld [vmem:[#allocation451_spill] sm:$0xff] }
 0x5a8   :  { %5457 = vmatprep.subr.bf16.mxu1 %v11142_v27  ;;  %v11163_v27 = vld [vmem:[#allocation452_spill] sm:$0xff] }
 0x5aa   :  { %5376 = vmatpush1.bf16.msra.mxu0 %v11143_v31  ;;  %v11164_v31 = vld [vmem:[#allocation453_spill] sm:$0xff] }
 0x5ab   :  { %5458 = vmatpush1.bf16.msra.mxu1 %v11144_v32  ;;  %5377 = vmatprep.subr.bf16.mxu0 %v11145_v33  ;;  %v11165_v32 = vld [vmem:[#allocation454_spill] sm:$0xff]  ;;  %v11166_v33 = vld [vmem:[#allocation455_spill] sm:$0xff] }
 0x5ac   :  { %5459 = vmatprep.subr.bf16.mxu1 %v11146_v34  ;;  %v11167_v34 = vld [vmem:[#allocation456_spill] sm:$0xff] }
 0x5ae   :  { %5378 = vmatpush1.bf16.msra.mxu0 %v11147_v39  ;;  %v11168_v39 = vld [vmem:[#allocation457_spill] sm:$0xff] }
 0x5af   :  { %5460 = vmatpush1.bf16.msra.mxu1 %v11148_v42  ;;  %5379 = vmatprep.subr.bf16.mxu0 %v11149_v51  ;;  %v11169_v42 = vld [vmem:[#allocation458_spill] sm:$0xff]  ;;  %v11170_v51 = vld [vmem:[#allocation459_spill] sm:$0xff] }
 0x5b0   :  { %5461 = vmatprep.subr.bf16.mxu1 %v11150_v36  ;;  %v11172_v36 = vld [vmem:[#allocation461_spill] sm:$0xff] }
 0x5b2   :  { %5380 = vmatpush1.bf16.msra.mxu0 %v11151_v59  ;;  %v11173_v59 = vld [vmem:[#allocation462_spill] sm:$0xff] }
 0x5b3   :  { %5462 = vmatpush1.bf16.msra.mxu1 %v11152_v53  ;;  %5381 = vmatprep.subr.bf16.mxu0 %v11153_v22  ;;  %v11174_v53 = vld [vmem:[#allocation463_spill] sm:$0xff]  ;;  %v11176_v22 = vld [vmem:[#allocation465_spill] sm:$0xff] }
 0x5b4   :  { %5463 = vmatprep.subr.bf16.mxu1 %v11154_v20  ;;  %v11177_v20 = vld [vmem:[#allocation466_spill] sm:$0xff] }
 0x5b6   :  { %5382 = vmatpush1.bf16.msra.mxu0 %v11155_v10  ;;  %v11178_v10 = vld [vmem:[#allocation467_spill] sm:$0xff] }
 0x5b7   :  { %5464 = vmatpush1.bf16.msra.mxu1 %v11156_v14  ;;  %5383 = vmatprep.subr.bf16.mxu0 %v11157_v16  ;;  %v11179_v14 = vld [vmem:[#allocation468_spill] sm:$0xff]  ;;  %v11180_v16 = vld [vmem:[#allocation469_spill] sm:$0xff] }
 0x5b8   :  { %5465 = vmatprep.subr.bf16.mxu1 %v11158_v17  ;;  %v11181_v17 = vld [vmem:[#allocation470_spill] sm:$0xff] }
 0x5ba   :  { %5384 = vmatpush1.bf16.msra.mxu0 %v11159_v19 }
 0x5bb   :  { %5466 = vmatpush1.bf16.msra.mxu1 %v11160_v18  ;;  %5394 = vmatprep.subr.bf16.mxu0 %v11161_v60  ;;  %v11182_v18 = vld [vmem:[#allocation471_spill] sm:$0xff] }
 0x5bc   :  { %5476 = vmatprep.subr.bf16.mxu1 %v11162_v7 }
 0x5bd   :  { %5386 = vmatmul.mubr.bf16.vlgmr.msra.gmra.mrb[44].mxu0 %v9089_v35 }
 0x5be   :  { %5468 = vmatmul.mubr.bf16.vlgmr.msra.gmra.mrb[44].mxu1 %v9089_v35  ;;  %5395 = vmatpush1.bf16.msra.mxu0 %v11163_v27  ;;  %v11171_v35 = vld [vmem:[#allocation460_spill] sm:$0xff] }
 0x5bf   :  { %5426 = vmatprep.mubr.bf16.mxu0 %v9093_v13  ;;  %5477 = vmatpush1.bf16.msra.mxu1 %v11164_v31 }
 0x5c0   :  { %5508 = vmatprep.mubr.bf16.mxu1 %v9093_v13  ;;  %5396 = vmatprep.subr.bf16.mxu0 %v11165_v32  ;;  %v11175_v13 = vld [vmem:[#allocation464_spill] sm:$0xff] }
 0x5c1   :  { %5478 = vmatprep.subr.bf16.mxu1 %v11166_v33 }
 0x5c2   :  { %5397 = vmatpush1.bf16.msra.mxu0 %v11167_v34 }
 0x5c3   :  { %5479 = vmatpush1.bf16.msra.mxu1 %v11168_v39  ;;  %5398 = vmatprep.subr.bf16.mxu0 %v11169_v42 }
 0x5c4   :  { %5480 = vmatprep.subr.bf16.mxu1 %v11170_v51 }
 0x5c6   :  { %5399 = vmatpush1.bf16.msra.mxu0 %v11171_v35  ;;  %v11183_v35 = vld [vmem:[#allocation472_spill] sm:$0xff] }
 0x5c7   :  { %5481 = vmatpush1.bf16.msra.mxu1 %v11172_v36  ;;  %5400 = vmatprep.subr.bf16.mxu0 %v11173_v59  ;;  %v11184_v59 = vld [vmem:[#allocation473_spill] sm:$0xff] }
 0x5c8   :  { %5482 = vmatprep.subr.bf16.mxu1 %v11174_v53 }
 0x5ca   :  { %5401 = vmatpush1.bf16.msra.mxu0 %v11175_v13 }
 0x5cb   :  { %5483 = vmatpush1.bf16.msra.mxu1 %v11176_v22  ;;  %5402 = vmatprep.subr.bf16.mxu0 %v11177_v20 }
 0x5cc   :  { %5484 = vmatprep.subr.bf16.mxu1 %v11178_v10 }
 0x5ce   :  { %5403 = vmatpush1.bf16.msra.mxu0 %v11179_v14 }
 0x5cf   :  { %5485 = vmatpush1.bf16.msra.mxu1 %v11180_v16  ;;  %5404 = vmatprep.subr.bf16.mxu0 %v11181_v17  ;;  %v11185_v16 = vld [vmem:[#allocation474_spill] sm:$0xff]  ;;  %v11186_v17 = vld [vmem:[#allocation475_spill] sm:$0xff] }
 0x5d0   :  { %v5100_v19 = vpop.f32.mrb[36].mxu0  ;;  %5486 = vmatprep.subr.bf16.mxu1 %v11182_v18  ;;  %v11193_v18 = vld [vmem:[#allocation482_spill] sm:$0xff] }
 0x5d1   :  { %v5537_v60 = vrot.slane %v5100_v19, 4  ;;  %v5182_v7 = vpop.f32.mrb[36].mxu1  ;;  %v5102_v27 = vpop.f32.mrb[37].mxu0  ;;  %v11191_v19 = vld [vmem:[#allocation480_spill] sm:$0xff] }
 0x5d2   :  { %v5539_v31 = vrot.slane %v5182_v7, 4  ;;  %v5538_v32 = vrot.slane %v5102_v27, 4  ;;  %v5184_v33 = vpop.f32.mrb[37].mxu1  ;;  %v5104_v34 = vpop.f32.mrb[38].mxu0  ;;  %5405 = vmatpush1.bf16.msra.mxu0 %v8840_v24  ;;  %v11195_v7 = vld [vmem:[#allocation484_spill] sm:$0xff] }
 0x5d3   :  { %v5569_v39 = vadd.f32 %v5537_v60, %v7512_v1  ;;  %v5540_v42 = vrot.slane %v5184_v33, 4  ;;  %v5186_v51 = vpop.f32.mrb[38].mxu1  ;;  %5487 = vmatpush1.bf16.msra.mxu1 %v11183_v35  ;;  %v5105_v36 = vpop.f32.mrb[39].mxu0  ;;  %5406 = vmatprep.subr.bf16.mxu0 %v11184_v59  ;;  %v11194_v60 = vld [vmem:[#allocation483_spill] sm:$0xff]  ;;  %v11196_v33 = vld [vmem:[#allocation485_spill] sm:$0xff] }
 0x5d4   :  { %v5571_v53 = vadd.f32 %v5539_v31, %v7524_v61  ;;  %v5570_v13 = vadd.f32 %v5538_v32, %v7514_v56  ;;  %v5187_v22 = vpop.f32.mrb[39].mxu1  ;;  %5488 = vmatprep.subr.bf16.mxu1 %v8849_v52  ;;  %v11187_v61 = vld [vmem:[#allocation476_spill] sm:$0xff]  ;;  %v11188_v56 = vld [vmem:[#allocation477_spill] sm:$0xff]  ;;  %v11189_v52 = vld [vmem:[#allocation478_spill] sm:$0xff] }
 0x5d5   :  { %v6681_v20 = vmul.f32 -1.442695, %v5569_v39  ;;  %v5572_v10 = vadd.f32 %v5540_v42, %v7529_v46  ;;  %v11190_v46 = vld [vmem:[#allocation479_spill] sm:$0xff]  ;;  %v11197_v42 = vld [vmem:[#allocation486_spill] sm:$0xff] }
 0x5d6   :  { %v6683_v24 = vmul.f32 -1.442695, %v5571_v53  ;;  %v6682_v14 = vmul.f32 -1.442695, %v5570_v13  ;;  %5407 = vmatpush1.bf16.msra.mxu0 %v8852_v28  ;;  %v11192_v28 = vld [vmem:[#allocation481_spill] sm:$0xff]  ;;  %v11198_v36 = vld [vmem:[#allocation487_spill] sm:$0xff] }
 0x5d7   :  { %6983 = vpow2.f32 %v6681_v20  ;;  %v6684_v1 = vmul.f32 -1.442695, %v5572_v10  ;;  %5489 = vmatpush1.bf16.msra.mxu1 %v11185_v16  ;;  %5408 = vmatprep.subr.bf16.mxu0 %v11186_v17  ;;  %v11199_v53 = vld [vmem:[#allocation488_spill] sm:$0xff]  ;;  %v11200_v13 = vld [vmem:[#allocation489_spill] sm:$0xff]  ;;  %v11201_v22 = vld [vmem:[#allocation490_spill] sm:$0xff]  ;;  %v5663_v17 = vrot.slane %v9073_v50, 6 }
 0x5d8   :  { %6985 = vpow2.f32 %v6683_v24  ;;  %5490 = vmatprep.subr.bf16.mxu1 %v11187_v61  ;;  %v11202_v20 = vld [vmem:[#allocation491_spill] sm:$0xff]  ;;  %v11204_v10 = vld [vmem:[#allocation493_spill] sm:$0xff]  ;;  %v11205_v24 = vld [vmem:[#allocation494_spill] sm:$0xff] }
 0x5d9   :  { %6987 = vpow2.f32 %v6682_v14  ;;  %v11206_v14 = vld [vmem:[#allocation495_spill] sm:$0xff] }
 0x5da   :  { %6989 = vpow2.f32 %v6684_v1  ;;  %5409 = vmatpush1.bf16.msra.mxu0 %v11188_v56  ;;  %v5661_v1 = vrot.slane %v9070_v41, 6  ;;  %v5662_v56 = vrot.slane %v9077_v55, 6  ;;  %v6842_v55 = vld [vmem:[%s9743_s4 + $0x80] sm:$0xff]  }
 0x5db   :  { %5491 = vmatpush1.bf16.msra.mxu1 %v11189_v52  ;;  %5410 = vmatprep.subr.bf16.mxu0 %v11190_v46  ;;  %v11207_v46 = vld [vmem:[#allocation496_spill] sm:$0xff] }
 0x5dc   :  { %5492 = vmatprep.subr.bf16.mxu1 %v11191_v19  ;;  %v11208_v19 = vld [vmem:[#allocation497_spill] sm:$0xff] }
 0x5de   :  { %5411 = vmatpush1.bf16.msra.mxu0 %v11192_v28 }
 0x5df   :  { %5493 = vmatpush1.bf16.msra.mxu1 %v11193_v18  ;;  %5412 = vmatprep.subr.bf16.mxu0 %v11194_v60  ;;  %v5664_v18 = vrot.slane %v9081_v57, 6  ;;  %v6843_v57 = vld [vmem:[%s9743_s4 + $0x48] sm:$0xff]  }
 0x5e0   :  { %5494 = vmatprep.subr.bf16.mxu1 %v11195_v7  ;;  %v6845_v7 = vld [vmem:[%s9743_s4 + $0x8] sm:$0xff]  }
 0x5e1   :  { %v6984_v27 = vpop.eup %6983 }
 0x5e2   :  { %v6986_v31 = vpop.eup %6985  ;;  %v5621_v32 = vadd.f32 1.0, %v6984_v27  ;;  %5413 = vmatpush1.bf16.msra.mxu0 %v11196_v33  ;;  %v6846_v27 = vld [vmem:[%s9743_s4 + $0x88] sm:$0xff]   ;;  %v6849_v33 = vld [vmem:[%s9743_s4 + $0x10] sm:$0xff]  }
 0x5e3   :  { %v6988_v34 = vpop.eup %6987  ;;  %v5623_v39 = vadd.f32 1.0, %v6986_v31  ;;  %5495 = vmatpush1.bf16.msra.mxu1 %v8896_v3  ;;  %5414 = vmatprep.subr.bf16.mxu0 %v11197_v42  ;;  %v11203_v3 = vld [vmem:[#allocation492_spill] sm:$0xff]  ;;  %v6847_v31 = vld [vmem:[%s9743_s4 + $0x50] sm:$0xff]  }
 0x5e4   :  { %v6990_v51 = vpop.eup %6989  ;;  %6991 = vrcp.f32 %v5621_v32  ;;  %v5622_v35 = vadd.f32 1.0, %v6988_v34  ;;  %5496 = vmatprep.subr.bf16.mxu1 %v11198_v36  ;;  %v6848_v32 = vld [vmem:[%s9743_s4 + $0xd0] sm:$0xff]   ;;  %v6852_v42 = vld [vmem:[%s9743_s4 + $0xd8] sm:$0xff]   ;;  %v6855_v36 = vld [vmem:[%s9743_s4 + $0x60] sm:$0xff]  }
 0x5e5   :  { %6993 = vrcp.f32 %v5623_v39  ;;  %v5624_v59 = vadd.f32 1.0, %v6990_v51  ;;  %v6850_v34 = vld [vmem:[%s9743_s4 + $0x90] sm:$0xff]   ;;  %v6851_v39 = vld [vmem:[%s9743_s4 + $0x58] sm:$0xff]  }
 0x5e6   :  { %6995 = vrcp.f32 %v5622_v35  ;;  %5415 = vmatpush1.bf16.msra.mxu0 %v11199_v53  ;;  %v6853_v51 = vld [vmem:[%s9743_s4 + $0x18] sm:$0xff]   ;;  %v6857_v53 = vld [vmem:[%s9743_s4 + $0x20] sm:$0xff]  }
 0x5e7   :  { %6997 = vrcp.f32 %v5624_v59  ;;  %5497 = vmatpush1.bf16.msra.mxu1 %v11200_v13  ;;  %5416 = vmatprep.subr.bf16.mxu0 %v11201_v22  ;;  %v6854_v35 = vld [vmem:[%s9743_s4 + $0x98] sm:$0xff]   ;;  %v6856_v59 = vld [vmem:[%s9743_s4 + $0xe0] sm:$0xff]   ;;  %v6859_v22 = vld [vmem:[%s9743_s4 + $0x68] sm:$0xff]  }
 0x5e8   :  { %5498 = vmatprep.subr.bf16.mxu1 %v11202_v20  ;;  %v6858_v13 = vld [vmem:[%s9743_s4 + $0xa0] sm:$0xff]   ;;  %v6860_v20 = vld [vmem:[%s9743_s4 + $0xe8] sm:$0xff]  }
 0x5ea   :  { %5417 = vmatpush1.bf16.msra.mxu0 %v11203_v3  ;;  %v6861_v3 = vld [vmem:[%s9743_s4 + $0x28] sm:$0xff]  }
 0x5eb   :  { %5499 = vmatpush1.bf16.msra.mxu1 %v11204_v10  ;;  %5418 = vmatprep.subr.bf16.mxu0 %v11205_v24  ;;  %v6862_v10 = vld [vmem:[%s9743_s4 + $0xa8] sm:$0xff]   ;;  %v6863_v24 = vld [vmem:[%s9743_s4 + $0x70] sm:$0xff]  }
 0x5ec   :  { %5500 = vmatprep.subr.bf16.mxu1 %v11206_v14  ;;  %v6864_v14 = vld [vmem:[%s9743_s4 + $0xf0] sm:$0xff]  }
 0x5ee   :  { %v6992_v16 = vpop.eup %6991  ;;  %5419 = vmatpush1.bf16.msra.mxu0 %v8928_v15 }
 0x5ef   :  { %v6994_v61 = vpop.eup %6993  ;;  %v9575_v52 = vmul.f32 %v6992_v16, %v5661_v1  ;;  %5501 = vmatpush1.bf16.msra.mxu1 %v11207_v46  ;;  %5420 = vmatprep.subr.bf16.mxu0 %v11208_v19  ;;  %v6865_v1 = vld [vmem:[%s9743_s4 + $0x30] sm:$0xff]   ;;  %v6870_v46 = vld [vmem:[%s9743_s4 + $0xb8] sm:$0xff]   ;;  %v5533_v19 = vrot.slane %v9394_v38, 4 }
 0x5f0   :  { %v6996_v28 = vpop.eup %6995  ;;  %v9580_v60 = vmul.f32 %v6994_v61, %v5663_v17  ;;  %5502 = vmatprep.subr.bf16.mxu1 %v8937_v45  ;;  %v6866_v16 = vld [vmem:[%s9743_s4 + $0xb0] sm:$0xff]   ;;  %v6867_v17 = vld [vmem:[%s9743_s4 + $0x78] sm:$0xff]  }
 0x5f1   :  { %v6998_v41 = vpop.eup %6997  ;;  %v9583_v50 = vmul.f32 %v6996_v28, %v5662_v56  ;;  %v6868_v61 = vld [vmem:[%s9743_s4 + $0xf8] sm:$0xff]   ;;  %v5535_v28 = vrot.slane %v9396_v23, 4 }
 0x5f2   :  { %v9585_v15 = vmul.f32 %v6998_v41, %v5664_v18  ;;  %5421 = vmatpush1.bf16.msra.mxu0 %v8942_v25  ;;  %v6869_v56 = vld [vmem:[%s9743_s4 + $0x38] sm:$0xff]   ;;  %v5565_v18 = vadd.f32 %v5533_v19, %v10765_v26 }
 0x5f3   :  { %5503 = vmatpush1.bf16.msra.mxu1 %v8949_v37  ;;  %5422 = vmatprep.subr.bf16.mxu0 %v8951_v54  ;;  %v5567_v41 = vadd.f32 %v5535_v28, %v10766_v30 }
 0x5f4   :  { %5504 = vmatprep.subr.bf16.mxu1 %v8957_v44 }
 0x5f6   :  { %5423 = vmatpush1.bf16.msra.mxu0 %v8964_v4 }
 0x5f7   :  { %5505 = vmatpush1.bf16.msra.mxu1 %v8968_v29  ;;  %5424 = vmatprep.subr.bf16.mxu0 %v8970_v8 }
 0x5f8   :  { %5506 = vmatprep.subr.bf16.mxu1 %v8973_v0  ;;  %v6839_v0 = vld [vmem:[%s9743_s4 + $0x40] sm:$0xff]  }
 0x5fa   :  { %5425 = vmatpush1.bf16.msra.mxu0 %v8976_v21  ;;  %v6840_v21 = vld [vmem:[%s9743_s4 + $0xc0] sm:$0xff]  }
 0x5fb   :  { %5507 = vmatpush1.bf16.msra.mxu1 %v8980_v48  ;;  %v6841_v48 = vld [vmem:[%s9743_s4] sm:$0xff]   ;;  %6723 = vmatprep.subr.bf16.mxu0 %v6839_v0 }
 0x5fc   :  { %6745 = vmatprep.subr.bf16.mxu1 %v6840_v21 }
 0x5fd   :  { %5427 = vmatmul.mubr.bf16.vlgmr.msra.gmra.mrb[44].mxu0 %v9163_v5 }
 0x5fe   :  { %5509 = vmatmul.mubr.bf16.vlgmr.msra.gmra.mrb[44].mxu1 %v9163_v5  ;;  %6724 = vmatpush3.bf16.msra.mxu0 %v6841_v48  ;;  %v6844_v5 = vld [vmem:[%s9743_s4 + $0xc8] sm:$0xff]   ;;  %s7176_s4 = smov [#allocation10]  }
 0x5ff   :  { %6746 = vmatpush3.bf16.msra.mxu1 %v6842_v55  ;;  %6725 = vmatprep.subr.bf16.mxu0 %v6843_v57  ;;  %s6062_s27 = sshll.u32 %s7176_s4, 4  ;;  %s6063_s27 = int_to_ptr.vmem [resolvable:$true] %s6062_s27 }
 0x600   :  { %6747 = vmatprep.subr.bf16.mxu1 %v6844_v5  ;;  %s7139_s28 = scalar_lea.vmem %s6063_s27, 32  ;;  %p7144_p5 = scmp.lt.s32.totalorder %s6063_s27, %s6063_s27 }
 0x601   :  { %p7140_p4 = scmp.ne.s32.totalorder %s6063_s27, %s7139_s28  ;;  %p7145_p6 = scmp.lt.s32.totalorder %s7139_s28, %s7139_s28 }
 0x602   :  { %6726 = vmatpush3.bf16.msra.mxu0 %v6845_v7 }
 0x603   :  { %6748 = vmatpush3.bf16.msra.mxu1 %v6846_v27  ;;  %6727 = vmatprep.subr.bf16.mxu0 %v6847_v31  ;;  %p7146_p7 = por %p7145_p6, %p7144_p5 }
 0x604   :  { %6749 = vmatprep.subr.bf16.mxu1 %v6848_v32 }
 0x605   :  { %p7147_p8 = pnand %p7146_p7, %p7140_p4 }
 0x606   :  { %6728 = vmatpush3.bf16.msra.mxu0 %v6849_v33 }
 0x607   :  { %6750 = vmatpush3.bf16.msra.mxu1 %v6850_v34  ;;  %6729 = vmatprep.subr.bf16.mxu0 %v6851_v39 }
 0x608   :  { %6751 = vmatprep.subr.bf16.mxu1 %v6852_v42 }
 0x60a   :  { %6730 = vmatpush3.bf16.msra.mxu0 %v6853_v51 }
 0x60b   :  { %6752 = vmatpush3.bf16.msra.mxu1 %v6854_v35  ;;  %6731 = vmatprep.subr.bf16.mxu0 %v6855_v36 }
 0x60c   :  { %6753 = vmatprep.subr.bf16.mxu1 %v6856_v59 }
 0x60e   :  { %6732 = vmatpush3.bf16.msra.mxu0 %v6857_v53 }
 0x60f   :  { %6754 = vmatpush3.bf16.msra.mxu1 %v6858_v13  ;;  %6733 = vmatprep.subr.bf16.mxu0 %v6859_v22 }
 0x610   :  { %6755 = vmatprep.subr.bf16.mxu1 %v6860_v20 }
 0x612   :  { %6734 = vmatpush3.bf16.msra.mxu0 %v6861_v3 }
 0x613   :  { %6756 = vmatpush3.bf16.msra.mxu1 %v6862_v10  ;;  %6735 = vmatprep.subr.bf16.mxu0 %v6863_v24 }
 0x614   :  { %6757 = vmatprep.subr.bf16.mxu1 %v6864_v14 }
 0x616   :  { %6736 = vmatpush3.bf16.msra.mxu0 %v6865_v1 }
 0x617   :  { %6758 = vmatpush3.bf16.msra.mxu1 %v6866_v16  ;;  %6737 = vmatprep.subr.bf16.mxu0 %v6867_v17 }
 0x618   :  { %6759 = vmatprep.subr.bf16.mxu1 %v6868_v61 }
 0x61a   :  { %6738 = vmatpush3.bf16.msra.mxu0 %v6869_v56 }
 0x61b   :  { %6760 = vmatpush3.bf16.msra.mxu1 %v6870_v46 }
 0x650   :  { %v9599_v25 = vpop.f32.mrb[40].mxu0 }
 0x651   :  { %v9601_v37 = vpop.f32.mrb[40].mxu1  ;;  %v9603_v45 = vpop.f32.mrb[41].mxu0  ;;  %v5541_v26 = vrot.slane %v9599_v25, 4 }
 0x652   :  { %v9605_v54 = vpop.f32.mrb[41].mxu1  ;;  %v5268_v44 = vpop.f32.mrb[42].mxu0  ;;  %v5543_v30 = vrot.slane %v9601_v37, 4  ;;  %v5542_v23 = vrot.slane %v9603_v45, 4 }
 0x653   :  { %v5350_v4 = vpop.f32.mrb[42].mxu1  ;;  %v5269_v29 = vpop.f32.mrb[43].mxu0  ;;  %v5534_v44 = vrot.slane %v9399_v6, 4 }
 0x654   :  { %v5351_v8 = vpop.f32.mrb[43].mxu1  ;;  %v5536_v4 = vrot.slane %v9401_v9, 4  ;;  %v6677_v29 = vmul.f32 -1.442695, %v5565_v18  ;;  %v5544_v9 = vrot.slane %v9605_v54, 4  ;;  %v5574_v5 = vadd.f32 %v5542_v23, %v10773_v12 }
 0x655   :  { %v6679_v8 = vmul.f32 -1.442695, %v5567_v41  ;;  %v5566_v0 = vadd.f32 %v5534_v44, %v10769_v43  ;;  %v5573_v43 = vadd.f32 %v5541_v26, %v10771_v40 }
 0x656   :  { %v5568_v21 = vadd.f32 %v5536_v4, %v10770_v49  ;;  %6999 = vpow2.f32 %v6677_v29  ;;  %v5575_v49 = vadd.f32 %v5543_v30, %v10772_v62  ;;  %v5576_v27 = vadd.f32 %v5544_v9, %v10774_v11 }
 0x657   :  { %7001 = vpow2.f32 %v6679_v8  ;;  %v6678_v48 = vmul.f32 -1.442695, %v5566_v0  ;;  %v6685_v31 = vmul.f32 -1.442695, %v5573_v43  ;;  %v6686_v45 = vmul.f32 -1.442695, %v5574_v5 }
 0x658   :  { %v6680_v38 = vmul.f32 -1.442695, %v5568_v21  ;;  %v6687_v32 = vmul.f32 -1.442695, %v5575_v49  ;;  %v6688_v33 = vmul.f32 -1.442695, %v5576_v27 }
 0x659   :  { %7003 = vpow2.f32 %v6678_v48 }
 0x65a   :  { %7005 = vpow2.f32 %v6680_v38 }
 0x660   :  { %v7000_v6 = vpop.eup %6999 }
 0x661   :  { %v7002_v55 = vpop.eup %7001  ;;  %v5617_v57 = vadd.f32 1.0, %v7000_v6 }
 0x662   :  { %v5619_v7 = vadd.f32 1.0, %v7002_v55 }
 0x663   :  { %v7004_v25 = vpop.eup %7003  ;;  %7007 = vrcp.f32 %v5617_v57 }
 0x664   :  { %v7006_v37 = vpop.eup %7005  ;;  %7009 = vrcp.f32 %v5619_v7  ;;  %v5618_v54 = vadd.f32 1.0, %v7004_v25 }
 0x665   :  { %7011 = vpow2.f32 %v6685_v31  ;;  %v5620_v34 = vadd.f32 1.0, %v7006_v37 }
 0x666   :  { %7013 = vpow2.f32 %v6687_v32 }
 0x667   :  { %7015 = vpow2.f32 %v6686_v45 }
 0x668   :  { %7017 = vpow2.f32 %v6688_v33 }
 0x669   :  { %7019 = vrcp.f32 %v5618_v54  ;;  %v6689_v54 = vld [vmem:[#allocation8] ss:$0 sm:$0xff] }
 0x66a   :  { %7021 = vrcp.f32 %v5620_v34 }
 0x66d   :  { %v7008_v24 = vpop.eup %7007 }
 0x66e   :  { %v7010_v14 = vpop.eup %7009 }
 0x66f   :  { %v7012_v1 = vpop.eup %7011 }
 0x670   :  { %v7014_v16 = vpop.eup %7013  ;;  %v5625_v61 = vadd.f32 1.0, %v7012_v1 }
 0x671   :  { %v5627_v46 = vadd.f32 1.0, %v7014_v16 }
 0x6d0   :  { %v5428_v40 = vpop.f32.mrb[44].mxu0 }
 0x6d1   :  { %v5545_v62 = vrot.slane %v5428_v40, 4  ;;  %v5510_v39 = vpop.f32.mrb[44].mxu1  ;;  %v5430_v12 = vpop.f32.mrb[45].mxu0 }
 0x6d2   :  { %v5547_v42 = vrot.slane %v5510_v39, 4  ;;  %v5546_v11 = vrot.slane %v5430_v12, 4  ;;  %v5512_v51 = vpop.f32.mrb[45].mxu1  ;;  %v5432_v35 = vpop.f32.mrb[46].mxu0 }
 0x6d3   :  { %v5577_v36 = vadd.f32 %v5545_v62, %v10775_v47  ;;  %v5548_v59 = vrot.slane %v5512_v51, 4  ;;  %v5514_v53 = vpop.f32.mrb[46].mxu1  ;;  %v5433_v13 = vpop.f32.mrb[47].mxu0 }
 0x6d4   :  { %v5579_v22 = vadd.f32 %v5547_v42, %v10776_v58  ;;  %v5578_v20 = vadd.f32 %v5546_v11, %v10777_v63  ;;  %v5515_v3 = vpop.f32.mrb[47].mxu1  ;;  %v7016_v47 = vpop.eup %7015 }
 0x6d5   :  { %7023 = vtanh.f32 %v5577_v36  ;;  %v5580_v10 = vadd.f32 %v5548_v59, %v10778_v2  ;;  %v7018_v17 = vpop.eup %7017  ;;  %v5626_v58 = vadd.f32 1.0, %v7016_v47 }
 0x6d6   :  { %7025 = vtanh.f32 %v5579_v22  ;;  %v7020_v56 = vpop.eup %7019  ;;  %v5628_v63 = vadd.f32 1.0, %v7018_v17 }
 0x6d7   :  { %7027 = vtanh.f32 %v5578_v20  ;;  %v7022_v19 = vpop.eup %7021 }
 0x6d8   :  { %7029 = vtanh.f32 %v5580_v10 }
 0x6d9   :  { %7031 = vrcp.f32 %v5625_v61 }
 0x6da   :  { %7033 = vrcp.f32 %v5627_v46 }
 0x6db   :  { %7035 = vrcp.f32 %v5626_v58 }
 0x6dc   :  { %7037 = vrcp.f32 %v5628_v63 }
 0x6df   :  { %v7024_v28 = vpop.eup %7023 }
 0x6e0   :  { %v7026_v18 = vpop.eup %7025  ;;  %v5673_v41 = vmul.f32 %v7024_v28, %v7008_v24 }
 0x6e1   :  { %v7028_v2 = vpop.eup %7027  ;;  %v5675_v44 = vmul.f32 %v7026_v18, %v7010_v14 }
 0x6e2   :  { %v7030_v4 = vpop.eup %7029  ;;  %v5677_v29 = vadd.f32 %v5673_v41, %v9575_v52  ;;  %v5674_v8 = vmul.f32 %v7028_v2, %v7020_v56 }
 0x6e3   :  { %v5679_v0 = vadd.f32 %v5675_v44, %v9580_v60  ;;  %v5676_v21 = vmul.f32 %v7030_v4, %v7022_v19  ;;  %v7032_v26 = vpop.eup %7031 }
 0x6e4   :  { %7039 = vtanh.f32 %v5677_v29  ;;  %v5678_v48 = vadd.f32 %v5674_v8, %v9583_v50  ;;  %v7034_v30 = vpop.eup %7033 }
 0x6e5   :  { %7041 = vtanh.f32 %v5679_v0  ;;  %v5680_v38 = vadd.f32 %v5676_v21, %v9585_v15  ;;  %v7036_v23 = vpop.eup %7035 }
 0x6e6   :  { %7043 = vtanh.f32 %v5678_v48  ;;  %v7038_v6 = vpop.eup %7037 }
 0x6e7   :  { %7045 = vtanh.f32 %v5680_v38 }
 0x6ee   :  { %v7040_v9 = vpop.eup %7039 }
 0x6ef   :  { %v7042_v55 = vpop.eup %7041  ;;  %v5685_v52 = vmul.f32 %v7040_v9, %v7032_v26 }
 0x6f0   :  { %v7044_v43 = vpop.eup %7043  ;;  %v5687_v49 = vmul.f32 %v7042_v55, %v7034_v30 }
 0x6f1   :  { %v7046_v57 = vpop.eup %7045  ;;  %v5686_v60 = vmul.f32 %v7044_v43, %v7036_v23  ;;  %v5689_v7 = vpack.c.bf16 %v5685_v52, %v5685_v52 }
 0x6f2   :  { %v5688_v5 = vmul.f32 %v7046_v57, %v7038_v6  ;;  %v5691_v50 = vpack.c.bf16 %v5687_v49, %v5687_v49 }
 0x6f3   :  { %v5690_v27 = vpack.c.bf16 %v5686_v60, %v5686_v60  ;;  %v5768_v32 = vrot.slane %v5689_v7, 2 }
 0x6f4   :  { %v5692_v31 = vpack.c.bf16 %v5688_v5, %v5688_v5  ;;  %v5770_v37 = vrot.slane %v5691_v50, 2 }
 0x6f5   :  { %v5769_v25 = vrot.slane %v5690_v27, 2 }
 0x6f6   :  { %v5771_v15 = vrot.slane %v5692_v31, 2 }
 0x6f7   :  { %6000 = vmatprep.mubr.bf16.mxu0 %v5769_v25 }
 0x6f8   :  { %6040 = vmatprep.mubr.bf16.mxu1 %v5771_v15  ;;  %6001 = vmatmul.mubr.bf16.vlgmr.msra.gmra.mrb[48].mxu0 %v5768_v32 }
 0x6f9   :  { %6041 = vmatmul.mubr.bf16.vlgmr.msra.gmra.mrb[48].mxu1 %v5770_v37 }
 0x7cb   :  { %v6739_v45 = vpop.f32.mrb[48].mxu0 }
 0x7cc   :  { %v6761_v33 = vpop.f32.mrb[48].mxu1  ;;  %v6740_v34 = vpop.f32.mrb[49].mxu0 }
 0x7cd   :  { %v6741_v40 = vadd.f32 %v6740_v34, %v6739_v45  ;;  %v6762_v62 = vpop.f32.mrb[49].mxu1  ;;  %v6742_v39 = vpop.f32.mrb[50].mxu0 }
 0x7ce   :  { %v6763_v12 = vadd.f32 %v6762_v62, %v6761_v33  ;;  %v6764_v42 = vpop.f32.mrb[50].mxu1  ;;  %v6743_v11 = vpop.f32.mrb[51].mxu0 }
 0x7cf   :  { %v6003_v51 = vadd.f32 %v6741_v40, %v6689_v54  ;;  %v6765_v35 = vpop.f32.mrb[51].mxu1 }
 0x7d1   :  { %v6043_v36 = vadd.f32 %v6763_v12, %v6003_v51 }
 0x7d3   :  { %v6722_v59 = vmul.f32 -1.442695, %v6043_v36 }
 0x7d5   :  { %7047 = vpow2.f32 %v6722_v59 }
 0x7df   :  { %v7048_v53 = vpop.eup %7047 }
 0x7e0   :  { %v6051_v13 = vadd.f32 1.0, %v7048_v53 }
 0x7e2   :  { %7049 = vrcp.f32 %v6051_v13 }
 0x7ec   :  { %v7050_v22 = vpop.eup %7049 }
 0x7ed   :  { %6055 = vst.msk [vmem:[#allocation10] sm:$0x3] %vm6054_vm1, %v7050_v22 }
 0x7ee   :  { %7150 = shalt.err (!%p7147_p8)
}
 0x7ef   :  { %s7151_s7 = scalar_lea.hbm %s9745_s6, 32 }
 0x7f0   :  { %p7152_p9 = scmp.ne.s32.totalorder %s9745_s6, %s7151_s7  ;;  %p7155_p10 = scmp.lt.u32.totalorder %s7151_s7, %s9745_s6 }
 0x7f2   :  { %p7157_p11 = pnand %p7155_p10, %p7152_p9 }
 0x7f4   :  { %7160 = shalt.err (!%p7157_p11)
}
 0x7f5   :  { %6065 = dma.vmem_to_hbm [thread:$0]  %s6063_s27, 32, %s9745_s6, [#allocation4]  }
 0x7f6   :  { %7167 = dma.done.wait [#allocation4], 32  }
 0x7f7   :  { %7168 = vsyncadd [#allocation4], 4294967264 }
 0x7f8   :  { %6069 = vsyncpa [#allocation3], 1 }
 0x7f9   :  { %6070 = vsyncpa [#allocation6], 1 }
 0x7fa   :  { %6071 = vsyncpa [#allocation9], 1 }
 0x7fb   :  { %6072 = vsyncpa [#allocation4], 1 }

</bundles_post_ra>
